<compile_context>
chip_gen: v7x
topology: tpu7x:2x2x1
jax: 0.10.0
libtpu: 0.0.40
codegen_flags: <defaults>
</compile_context>

<pallas_src>
import jax
import jax.numpy as jnp
from jax.experimental import pallas as pl
from jax.experimental.pallas import tpu as pltpu


_LAYER_DIMS = ((1, 16), (16, 32), (32, 64))   # (Cin, Cout) per conv layer
_NUM_CLASSES = 10
_COUT_PAD = 128      # lane-dense channel padding for conv / FC outputs
_TILE_MO = 512       # max pooled-row tile (sublane dim)
_TILE_B = 256        # max row tile for the FC matmul


def _round_up(x, m):
    return (x + m - 1) // m * m


# ----------------------------- Pallas kernels ------------------------------

def conv_bn_relu_pool_kernel(pa_ref, pb_ref, pc_ref, pd_ref,
                             w_ref, s_ref, b_ref, o_ref):
    """Fused conv(im2col matmul) + BatchNorm + 2x2 maxpool + ReLU.

    pa..pd : [TILE_MO, K]   bf16 patch tiles, one per 2x2 pool position.
    w      : [K, 128]       bf16 im2col weight (Cout zero-padded to 128).
    s, b   : [1, 128]       f32 folded BN scale / bias.
    o      : [TILE_MO, 128] bf16 pooled output.
    """
    w = w_ref[...]
    s = s_ref[...]
    b = b_ref[...]

    def branch(p_ref):
        acc = jnp.dot(p_ref[...], w, preferred_element_type=jnp.float32)
        return acc * s + b                      # BN before the pool max

    z = jnp.maximum(jnp.maximum(branch(pa_ref), branch(pb_ref)),
                    jnp.maximum(branch(pc_ref), branch(pd_ref)))
    o_ref[...] = jnp.maximum(z, 0.0).astype(o_ref.dtype)   # ReLU commutes w/ max


def linear_kernel(x_ref, w_ref, b_ref, o_ref):
    # x: [TILE_B, K] bf16, w: [K, 128] bf16, b: [1, 128] f32 -> o f32
    o_ref[...] = jnp.dot(x_ref[...], w_ref[...],
                         preferred_element_type=jnp.float32) + b_ref[...]


# --------------------------- parameter preparation --------------------------

def prepare_params(params, eps=1e-5):
    """One-time conversion of PyTorch-layout params into kernel-ready tensors:
    im2col weight layout, BN folded into scale/bias, lane-dense Cout padding
    (no K padding), bf16 cast for MXU inputs, and FC feature permutation from
    NCHW-flatten order to NHWC-flatten order."""
    prep = {"layers": []}
    for (w, cb, gamma, beta, mean, var) in params["layers"]:
        cout, cin, kh, kw = w.shape
        k = kh * kw * cin
        # PyTorch conv weight [Cout, Cin, Kh, Kw] -> [Kh*Kw*Cin, Cout]
        w_mat = jnp.transpose(w, (2, 3, 1, 0)).reshape(k, cout)
        w_mat = jnp.pad(w_mat, ((0, 0), (0, _COUT_PAD - cout)))   # Cout only
        scale = gamma / jnp.sqrt(var + eps)
        bias = beta + (cb - mean) * scale
        prep["layers"].append({
            "w": w_mat.astype(jnp.bfloat16),
            "scale": jnp.pad(scale, (0, _COUT_PAD - cout)).reshape(1, _COUT_PAD),
            "bias": jnp.pad(bias, (0, _COUT_PAD - cout)).reshape(1, _COUT_PAD),
        })
    fw, fb = params["fc_w"], params["fc_b"]          # [10, 576], [10]
    n, k = fw.shape
    c_last = _LAYER_DIMS[-1][1]                      # 64
    hw = int(round((k // c_last) ** 0.5))            # 3
    # Permute the 576 input features from PyTorch (c,h,w) order to (h,w,c)
    # so the forward pass can flatten the NHWC tensor directly (no transpose).
    fw_hwc = fw.reshape(n, c_last, hw, hw).transpose(0, 2, 3, 1).reshape(n, k)
    n_pad = _round_up(n, 128)
    prep["fc"] = {
        "w": jnp.pad(fw_hwc.T, ((0, 0), (0, n_pad - n))).astype(jnp.bfloat16),
        "b": jnp.pad(fb, (0, n_pad - n)).reshape(1, n_pad).astype(jnp.float32),
    }
    return prep


# ------------------------------- glue / layers ------------------------------

def _pool_split_patches(x_nhwc, k=5, pad=2):
    """im2col split by 2x2 pool position, bf16 end to end.

    Returns 4 bf16 matrices [B*Ho*Wo, k*k*Cin] for pool positions
    (0,0), (0,1), (1,0), (1,1); row order (b, ho, wo); K order (ky, kx, cin)
    to match the weight layout built in prepare_params."""
    B, H, W, C = x_nhwc.shape
    # Cast BEFORE the 25x expansion so the stacked intermediate is bf16.
    xp = jnp.pad(x_nhwc.astype(jnp.bfloat16),
                 ((0, 0), (pad, pad), (pad, pad), (0, 0)))
    mats = []
    for py in range(2):
        for px in range(2):
            views = [xp[:, py + dy:py + dy + H:2, px + dx:px + dx + W:2, :]
                     for dy in range(k) for dx in range(k)]
            p = jnp.stack(views, axis=3)                # [B, Ho, Wo, k*k, C]
            mats.append(p.reshape(B * (H // 2) * (W // 2), k * k * C))
    return mats


def _row_tiling(rows, max_tile):
    """>=2 grid steps (v7x megacore), 16-row tiles (bf16 sublane packing),
    rows padded only to the chosen tile boundary."""
    n_tiles = max(2, pl.cdiv(rows, max_tile))
    tile = _round_up(pl.cdiv(rows, n_tiles), 16)
    n_tiles = pl.cdiv(rows, tile)
    return tile, n_tiles, n_tiles * tile


def conv_bn_relu_pool(x_nhwc, lp, cout):
    B, H, W, Cin = x_nhwc.shape
    Ho, Wo = H // 2, W // 2
    Mo = B * Ho * Wo
    k_real, cout_pad = lp["w"].shape

    tile_mo, n_tiles, mo_pad = _row_tiling(Mo, _TILE_MO)

    def pad_rows(p):
        return jnp.pad(p, ((0, mo_pad - Mo), (0, 0))) if mo_pad != Mo else p

    pa, pb, pc, pd = (pad_rows(p) for p in _pool_split_patches(x_nhwc))

    patch_spec = pl.BlockSpec((tile_mo, k_real), lambda i: (i, 0))
    full_spec = lambda shape: pl.BlockSpec(shape, lambda i: (0, 0))

    pooled = pl.pallas_call(
        conv_bn_relu_pool_kernel,
        out_shape=jax.ShapeDtypeStruct((mo_pad, cout_pad), jnp.bfloat16),
        grid=(n_tiles,),
        in_specs=[patch_spec, patch_spec, patch_spec, patch_spec,
                  full_spec((k_real, cout_pad)),
                  full_spec((1, cout_pad)),
                  full_spec((1, cout_pad))],
        out_specs=pl.BlockSpec((tile_mo, cout_pad), lambda i: (i, 0)),
        compiler_params=pltpu.CompilerParams(
            dimension_semantics=("parallel",)),
    )(pa, pb, pc, pd, lp["w"], lp["scale"], lp["bias"])

    # Padded rows evaluate to ReLU(bias); they are discarded by this slice.
    return pooled[:Mo, :cout].reshape(B, Ho, Wo, cout)


def linear(x2d, fc, n_real):
    B, K = x2d.shape
    k_w, n_pad = fc["w"].shape
    assert K == k_w
    tile_b, n_tiles, b_pad = _row_tiling(B, _TILE_B)

    x = x2d.astype(jnp.bfloat16)            # no-op: layer-3 output is bf16
    if b_pad != B:
        x = jnp.pad(x, ((0, b_pad - B), (0, 0)))

    out = pl.pallas_call(
        linear_kernel,
        out_shape=jax.ShapeDtypeStruct((b_pad, n_pad), jnp.float32),
        grid=(n_tiles,),
        in_specs=[pl.BlockSpec((tile_b, K), lambda i: (i, 0)),
                  pl.BlockSpec((K, n_pad), lambda i: (0, 0)),
                  pl.BlockSpec((1, n_pad), lambda i: (0, 0))],
        out_specs=pl.BlockSpec((tile_b, n_pad), lambda i: (i, 0)),
        compiler_params=pltpu.CompilerParams(
            dimension_semantics=("parallel",)),
    )(x, fc["w"], fc["b"])
    return out[:B, :n_real]


# ------------------------------ parameter init ------------------------------

def init_params(key, num_classes=_NUM_CLASSES):
    params = {"layers": []}
    for cin, cout in _LAYER_DIMS:
        key, kw, kb, kg, kbe, km, kv = jax.random.split(key, 7)
        w = jax.random.normal(kw, (cout, cin, 5, 5), jnp.float32) * 0.05
        cb = jax.random.normal(kb, (cout,), jnp.float32) * 0.01
        gamma = 1.0 + 0.1 * jax.random.normal(kg, (cout,), jnp.float32)
        beta = 0.1 * jax.random.normal(kbe, (cout,), jnp.float32)
        mean = 0.1 * jax.random.normal(km, (cout,), jnp.float32)
        var = 0.5 + jnp.abs(jax.random.normal(kv, (cout,), jnp.float32))
        params["layers"].append((w, cb, gamma, beta, mean, var))
    key, kfw, kfb = jax.random.split(key, 3)
    params["fc_w"] = jax.random.normal(kfw, (num_classes, 576), jnp.float32) * 0.05
    params["fc_b"] = jax.random.normal(kfb, (num_classes,), jnp.float32) * 0.01
    return params


# ------------------------------- forward pass --------------------------------

def digitnet_forward(prep, x_nchw):
    x = jnp.transpose(x_nchw, (0, 2, 3, 1))          # NCHW -> NHWC (Cin=1)
    for (_, cout), lp in zip(_LAYER_DIMS, prep["layers"]):
        x = conv_bn_relu_pool(x, lp, cout)
    B = x.shape[0]
    # FC weight features were pre-permuted to (h, w, c) order in
    # prepare_params, so the NHWC flatten matches PyTorch's NCHW flatten.
    feat = x.reshape(B, -1)                           # [B, 576] bf16
    return linear(feat, prep["fc"], _NUM_CLASSES)     # [B, num_classes] f32


if __name__ == "__main__":
    key = jax.random.PRNGKey(0)
    pkey, xkey = jax.random.split(key)
    params = init_params(pkey, num_classes=_NUM_CLASSES)
    prep = prepare_params(params)   # one-time transpose / permute / bf16 / BN fold
    # fc expects 576 = 64*3*3 features  =>  input spatial size 24x24
    x = jax.random.normal(xkey, (2, 1, 24, 24), jnp.float32)

    fwd = jax.jit(digitnet_forward)
    out = fwd(prep, x)
    jax.block_until_ready(out)
    assert out.shape == (2, _NUM_CLASSES)
    print("KERNEL_OK")
</pallas_src>

<mosaic_0001>
module attributes {stable_mosaic.version = 11 : i64} {
  func.func @conv_bn_relu_pool_kernel(%arg0: i32, %arg1: memref<144x25xbf16, #tpu.memory_space<vmem>>, %arg2: memref<144x25xbf16, #tpu.memory_space<vmem>>, %arg3: memref<144x25xbf16, #tpu.memory_space<vmem>>, %arg4: memref<144x25xbf16, #tpu.memory_space<vmem>>, %arg5: memref<25x128xbf16, #tpu.memory_space<vmem>>, %arg6: memref<1x128xf32, #tpu.memory_space<vmem>>, %arg7: memref<1x128xf32, #tpu.memory_space<vmem>>, %arg8: memref<144x128xbf16, #tpu.memory_space<vmem>>) attributes {dimension_semantics = [#tpu.dimension_semantics<parallel>], iteration_bounds = array<i64: 2>, scalar_prefetch = 0 : i64, scratch_operands = 0 : i64, tpu.core_type = #tpu.core_type<tc>, window_params = [{transform_indices = @transform_0, window_bounds = array<i64: 144, 25>}, {transform_indices = @transform_1, window_bounds = array<i64: 144, 25>}, {transform_indices = @transform_2, window_bounds = array<i64: 144, 25>}, {transform_indices = @transform_3, window_bounds = array<i64: 144, 25>}, {pipeline_mode = #tpu.pipeline_mode<synchronous>, transform_indices = @transform_4, window_bounds = array<i64: 25, 128>}, {pipeline_mode = #tpu.pipeline_mode<synchronous>, transform_indices = @transform_5, window_bounds = array<i64: 1, 128>}, {pipeline_mode = #tpu.pipeline_mode<synchronous>, transform_indices = @transform_6, window_bounds = array<i64: 1, 128>}, {transform_indices = @transform_7, window_bounds = array<i64: 144, 128>}]} {
    %c0 = arith.constant 0 : index
    %c0_0 = arith.constant 0 : index
    %0 = vector.load %arg5[%c0, %c0_0] : memref<25x128xbf16, #tpu.memory_space<vmem>>, vector<25x128xbf16>
    %c0_1 = arith.constant 0 : index
    %c0_2 = arith.constant 0 : index
    %1 = vector.load %arg6[%c0_1, %c0_2] : memref<1x128xf32, #tpu.memory_space<vmem>>, vector<1x128xf32>
    %c0_3 = arith.constant 0 : index
    %c0_4 = arith.constant 0 : index
    %2 = vector.load %arg7[%c0_3, %c0_4] : memref<1x128xf32, #tpu.memory_space<vmem>>, vector<1x128xf32>
    %c0_5 = arith.constant 0 : index
    %c0_6 = arith.constant 0 : index
    %3 = vector.load %arg1[%c0_5, %c0_6] : memref<144x25xbf16, #tpu.memory_space<vmem>>, vector<144x25xbf16>
    %cst = arith.constant dense<0.000000e+00> : vector<144x128xf32>
    %4 = tpu.matmul %3, %0, %cst {dimension_numbers = #tpu.dot_dimension_numbers<[1], [0], [0], [1], [0, 0, 1, 1], [], []>} : vector<144x25xbf16>, vector<25x128xbf16>, vector<144x128xf32> -> vector<144x128xf32>
    %5 = vector.broadcast %1 : vector<1x128xf32> to vector<144x128xf32>
    %6 = arith.mulf %4, %5 : vector<144x128xf32>
    %7 = vector.broadcast %2 : vector<1x128xf32> to vector<144x128xf32>
    %8 = arith.addf %6, %7 : vector<144x128xf32>
    %c0_7 = arith.constant 0 : index
    %c0_8 = arith.constant 0 : index
    %9 = vector.load %arg2[%c0_7, %c0_8] : memref<144x25xbf16, #tpu.memory_space<vmem>>, vector<144x25xbf16>
    %cst_9 = arith.constant dense<0.000000e+00> : vector<144x128xf32>
    %10 = tpu.matmul %9, %0, %cst_9 {dimension_numbers = #tpu.dot_dimension_numbers<[1], [0], [0], [1], [0, 0, 1, 1], [], []>} : vector<144x25xbf16>, vector<25x128xbf16>, vector<144x128xf32> -> vector<144x128xf32>
    %11 = vector.broadcast %1 : vector<1x128xf32> to vector<144x128xf32>
    %12 = arith.mulf %10, %11 : vector<144x128xf32>
    %13 = vector.broadcast %2 : vector<1x128xf32> to vector<144x128xf32>
    %14 = arith.addf %12, %13 : vector<144x128xf32>
    %15 = arith.maximumf %8, %14 : vector<144x128xf32>
    %c0_10 = arith.constant 0 : index
    %c0_11 = arith.constant 0 : index
    %16 = vector.load %arg3[%c0_10, %c0_11] : memref<144x25xbf16, #tpu.memory_space<vmem>>, vector<144x25xbf16>
    %cst_12 = arith.constant dense<0.000000e+00> : vector<144x128xf32>
    %17 = tpu.matmul %16, %0, %cst_12 {dimension_numbers = #tpu.dot_dimension_numbers<[1], [0], [0], [1], [0, 0, 1, 1], [], []>} : vector<144x25xbf16>, vector<25x128xbf16>, vector<144x128xf32> -> vector<144x128xf32>
    %18 = vector.broadcast %1 : vector<1x128xf32> to vector<144x128xf32>
    %19 = arith.mulf %17, %18 : vector<144x128xf32>
    %20 = vector.broadcast %2 : vector<1x128xf32> to vector<144x128xf32>
    %21 = arith.addf %19, %20 : vector<144x128xf32>
    %c0_13 = arith.constant 0 : index
    %c0_14 = arith.constant 0 : index
    %22 = vector.load %arg4[%c0_13, %c0_14] : memref<144x25xbf16, #tpu.memory_space<vmem>>, vector<144x25xbf16>
    %cst_15 = arith.constant dense<0.000000e+00> : vector<144x128xf32>
    %23 = tpu.matmul %22, %0, %cst_15 {dimension_numbers = #tpu.dot_dimension_numbers<[1], [0], [0], [1], [0, 0, 1, 1], [], []>} : vector<144x25xbf16>, vector<25x128xbf16>, vector<144x128xf32> -> vector<144x128xf32>
    %24 = vector.broadcast %1 : vector<1x128xf32> to vector<144x128xf32>
    %25 = arith.mulf %23, %24 : vector<144x128xf32>
    %26 = vector.broadcast %2 : vector<1x128xf32> to vector<144x128xf32>
    %27 = arith.addf %25, %26 : vector<144x128xf32>
    %28 = arith.maximumf %21, %27 : vector<144x128xf32>
    %29 = arith.maximumf %15, %28 : vector<144x128xf32>
    %cst_16 = arith.constant 0.000000e+00 : f32
    %30 = vector.broadcast %cst_16 : f32 to vector<144x128xf32>
    %31 = arith.maximumf %29, %30 : vector<144x128xf32>
    %32 = arith.truncf %31 : vector<144x128xf32> to vector<144x128xbf16>
    %c0_17 = arith.constant 0 : index
    %c0_18 = arith.constant 0 : index
    %33 = vector.load %arg8[%c0_17, %c0_18] : memref<144x128xbf16, #tpu.memory_space<vmem>>, vector<144x128xbf16>
    tpu.vector_store %arg8[%c0_17, %c0_18], %32 {strides = array<i32>} : memref<144x128xbf16, #tpu.memory_space<vmem>>, vector<144x128xbf16>,
    return
  }
  func.func @transform_0(%arg0: i32) -> (i32, i32) {
    %c0_i32 = arith.constant 0 : i32
    %c0_i32_0 = arith.constant 0 : i32
    return %arg0, %c0_i32 : i32, i32
  }
  func.func @transform_1(%arg0: i32) -> (i32, i32) {
    %c0_i32 = arith.constant 0 : i32
    %c0_i32_0 = arith.constant 0 : i32
    return %arg0, %c0_i32 : i32, i32
  }
  func.func @transform_2(%arg0: i32) -> (i32, i32) {
    %c0_i32 = arith.constant 0 : i32
    %c0_i32_0 = arith.constant 0 : i32
    return %arg0, %c0_i32 : i32, i32
  }
  func.func @transform_3(%arg0: i32) -> (i32, i32) {
    %c0_i32 = arith.constant 0 : i32
    %c0_i32_0 = arith.constant 0 : i32
    return %arg0, %c0_i32 : i32, i32
  }
  func.func @transform_4(%arg0: i32) -> (i32, i32) {
    %c0_i32 = arith.constant 0 : i32
    %c0_i32_0 = arith.constant 0 : i32
    %c0_i32_1 = arith.constant 0 : i32
    return %c0_i32, %c0_i32_0 : i32, i32
  }
  func.func @transform_5(%arg0: i32) -> (i32, i32) {
    %c0_i32 = arith.constant 0 : i32
    %c0_i32_0 = arith.constant 0 : i32
    %c0_i32_1 = arith.constant 0 : i32
    return %c0_i32, %c0_i32_0 : i32, i32
  }
  func.func @transform_6(%arg0: i32) -> (i32, i32) {
    %c0_i32 = arith.constant 0 : i32
    %c0_i32_0 = arith.constant 0 : i32
    %c0_i32_1 = arith.constant 0 : i32
    return %c0_i32, %c0_i32_0 : i32, i32
  }
  func.func @transform_7(%arg0: i32) -> (i32, i32) {
    %c0_i32 = arith.constant 0 : i32
    %c0_i32_0 = arith.constant 0 : i32
    return %arg0, %c0_i32 : i32, i32
  }
}

module attributes {stable_mosaic.version = 11 : i64} {
  func.func @conv_bn_relu_pool_kernel(%arg0: i32, %arg1: memref<48x400xbf16, #tpu.memory_space<vmem>>, %arg2: memref<48x400xbf16, #tpu.memory_space<vmem>>, %arg3: memref<48x400xbf16, #tpu.memory_space<vmem>>, %arg4: memref<48x400xbf16, #tpu.memory_space<vmem>>, %arg5: memref<400x128xbf16, #tpu.memory_space<vmem>>, %arg6: memref<1x128xf32, #tpu.memory_space<vmem>>, %arg7: memref<1x128xf32, #tpu.memory_space<vmem>>, %arg8: memref<48x128xbf16, #tpu.memory_space<vmem>>) attributes {dimension_semantics = [#tpu.dimension_semantics<parallel>], iteration_bounds = array<i64: 2>, scalar_prefetch = 0 : i64, scratch_operands = 0 : i64, tpu.core_type = #tpu.core_type<tc>, window_params = [{transform_indices = @transform_0, window_bounds = array<i64: 48, 400>}, {transform_indices = @transform_1, window_bounds = array<i64: 48, 400>}, {transform_indices = @transform_2, window_bounds = array<i64: 48, 400>}, {transform_indices = @transform_3, window_bounds = array<i64: 48, 400>}, {pipeline_mode = #tpu.pipeline_mode<synchronous>, transform_indices = @transform_4, window_bounds = array<i64: 400, 128>}, {pipeline_mode = #tpu.pipeline_mode<synchronous>, transform_indices = @transform_5, window_bounds = array<i64: 1, 128>}, {pipeline_mode = #tpu.pipeline_mode<synchronous>, transform_indices = @transform_6, window_bounds = array<i64: 1, 128>}, {transform_indices = @transform_7, window_bounds = array<i64: 48, 128>}]} {
    %c0 = arith.constant 0 : index
    %c0_0 = arith.constant 0 : index
    %0 = vector.load %arg5[%c0, %c0_0] : memref<400x128xbf16, #tpu.memory_space<vmem>>, vector<400x128xbf16>
    %c0_1 = arith.constant 0 : index
    %c0_2 = arith.constant 0 : index
    %1 = vector.load %arg6[%c0_1, %c0_2] : memref<1x128xf32, #tpu.memory_space<vmem>>, vector<1x128xf32>
    %c0_3 = arith.constant 0 : index
    %c0_4 = arith.constant 0 : index
    %2 = vector.load %arg7[%c0_3, %c0_4] : memref<1x128xf32, #tpu.memory_space<vmem>>, vector<1x128xf32>
    %c0_5 = arith.constant 0 : index
    %c0_6 = arith.constant 0 : index
    %3 = vector.load %arg1[%c0_5, %c0_6] : memref<48x400xbf16, #tpu.memory_space<vmem>>, vector<48x400xbf16>
    %cst = arith.constant dense<0.000000e+00> : vector<48x128xf32>
    %4 = tpu.matmul %3, %0, %cst {dimension_numbers = #tpu.dot_dimension_numbers<[1], [0], [0], [1], [0, 0, 1, 1], [], []>} : vector<48x400xbf16>, vector<400x128xbf16>, vector<48x128xf32> -> vector<48x128xf32>
    %5 = vector.broadcast %1 : vector<1x128xf32> to vector<48x128xf32>
    %6 = arith.mulf %4, %5 : vector<48x128xf32>
    %7 = vector.broadcast %2 : vector<1x128xf32> to vector<48x128xf32>
    %8 = arith.addf %6, %7 : vector<48x128xf32>
    %c0_7 = arith.constant 0 : index
    %c0_8 = arith.constant 0 : index
    %9 = vector.load %arg2[%c0_7, %c0_8] : memref<48x400xbf16, #tpu.memory_space<vmem>>, vector<48x400xbf16>
    %cst_9 = arith.constant dense<0.000000e+00> : vector<48x128xf32>
    %10 = tpu.matmul %9, %0, %cst_9 {dimension_numbers = #tpu.dot_dimension_numbers<[1], [0], [0], [1], [0, 0, 1, 1], [], []>} : vector<48x400xbf16>, vector<400x128xbf16>, vector<48x128xf32> -> vector<48x128xf32>
    %11 = vector.broadcast %1 : vector<1x128xf32> to vector<48x128xf32>
    %12 = arith.mulf %10, %11 : vector<48x128xf32>
    %13 = vector.broadcast %2 : vector<1x128xf32> to vector<48x128xf32>
    %14 = arith.addf %12, %13 : vector<48x128xf32>
    %15 = arith.maximumf %8, %14 : vector<48x128xf32>
    %c0_10 = arith.constant 0 : index
    %c0_11 = arith.constant 0 : index
    %16 = vector.load %arg3[%c0_10, %c0_11] : memref<48x400xbf16, #tpu.memory_space<vmem>>, vector<48x400xbf16>
    %cst_12 = arith.constant dense<0.000000e+00> : vector<48x128xf32>
    %17 = tpu.matmul %16, %0, %cst_12 {dimension_numbers = #tpu.dot_dimension_numbers<[1], [0], [0], [1], [0, 0, 1, 1], [], []>} : vector<48x400xbf16>, vector<400x128xbf16>, vector<48x128xf32> -> vector<48x128xf32>
    %18 = vector.broadcast %1 : vector<1x128xf32> to vector<48x128xf32>
    %19 = arith.mulf %17, %18 : vector<48x128xf32>
    %20 = vector.broadcast %2 : vector<1x128xf32> to vector<48x128xf32>
    %21 = arith.addf %19, %20 : vector<48x128xf32>
    %c0_13 = arith.constant 0 : index
    %c0_14 = arith.constant 0 : index
    %22 = vector.load %arg4[%c0_13, %c0_14] : memref<48x400xbf16, #tpu.memory_space<vmem>>, vector<48x400xbf16>
    %cst_15 = arith.constant dense<0.000000e+00> : vector<48x128xf32>
    %23 = tpu.matmul %22, %0, %cst_15 {dimension_numbers = #tpu.dot_dimension_numbers<[1], [0], [0], [1], [0, 0, 1, 1], [], []>} : vector<48x400xbf16>, vector<400x128xbf16>, vector<48x128xf32> -> vector<48x128xf32>
    %24 = vector.broadcast %1 : vector<1x128xf32> to vector<48x128xf32>
    %25 = arith.mulf %23, %24 : vector<48x128xf32>
    %26 = vector.broadcast %2 : vector<1x128xf32> to vector<48x128xf32>
    %27 = arith.addf %25, %26 : vector<48x128xf32>
    %28 = arith.maximumf %21, %27 : vector<48x128xf32>
    %29 = arith.maximumf %15, %28 : vector<48x128xf32>
    %cst_16 = arith.constant 0.000000e+00 : f32
    %30 = vector.broadcast %cst_16 : f32 to vector<48x128xf32>
    %31 = arith.maximumf %29, %30 : vector<48x128xf32>
    %32 = arith.truncf %31 : vector<48x128xf32> to vector<48x128xbf16>
    %c0_17 = arith.constant 0 : index
    %c0_18 = arith.constant 0 : index
    %33 = vector.load %arg8[%c0_17, %c0_18] : memref<48x128xbf16, #tpu.memory_space<vmem>>, vector<48x128xbf16>
    tpu.vector_store %arg8[%c0_17, %c0_18], %32 {strides = array<i32>} : memref<48x128xbf16, #tpu.memory_space<vmem>>, vector<48x128xbf16>,
    return
  }
  func.func @transform_0(%arg0: i32) -> (i32, i32) {
    %c0_i32 = arith.constant 0 : i32
    %c0_i32_0 = arith.constant 0 : i32
    return %arg0, %c0_i32 : i32, i32
  }
  func.func @transform_1(%arg0: i32) -> (i32, i32) {
    %c0_i32 = arith.constant 0 : i32
    %c0_i32_0 = arith.constant 0 : i32
    return %arg0, %c0_i32 : i32, i32
  }
  func.func @transform_2(%arg0: i32) -> (i32, i32) {
    %c0_i32 = arith.constant 0 : i32
    %c0_i32_0 = arith.constant 0 : i32
    return %arg0, %c0_i32 : i32, i32
  }
  func.func @transform_3(%arg0: i32) -> (i32, i32) {
    %c0_i32 = arith.constant 0 : i32
    %c0_i32_0 = arith.constant 0 : i32
    return %arg0, %c0_i32 : i32, i32
  }
  func.func @transform_4(%arg0: i32) -> (i32, i32) {
    %c0_i32 = arith.constant 0 : i32
    %c0_i32_0 = arith.constant 0 : i32
    %c0_i32_1 = arith.constant 0 : i32
    return %c0_i32, %c0_i32_0 : i32, i32
  }
  func.func @transform_5(%arg0: i32) -> (i32, i32) {
    %c0_i32 = arith.constant 0 : i32
    %c0_i32_0 = arith.constant 0 : i32
    %c0_i32_1 = arith.constant 0 : i32
    return %c0_i32, %c0_i32_0 : i32, i32
  }
  func.func @transform_6(%arg0: i32) -> (i32, i32) {
    %c0_i32 = arith.constant 0 : i32
    %c0_i32_0 = arith.constant 0 : i32
    %c0_i32_1 = arith.constant 0 : i32
    return %c0_i32, %c0_i32_0 : i32, i32
  }
  func.func @transform_7(%arg0: i32) -> (i32, i32) {
    %c0_i32 = arith.constant 0 : i32
    %c0_i32_0 = arith.constant 0 : i32
    return %arg0, %c0_i32 : i32, i32
  }
}

module attributes {stable_mosaic.version = 11 : i64} {
  func.func @conv_bn_relu_pool_kernel(%arg0: i32, %arg1: memref<16x800xbf16, #tpu.memory_space<vmem>>, %arg2: memref<16x800xbf16, #tpu.memory_space<vmem>>, %arg3: memref<16x800xbf16, #tpu.memory_space<vmem>>, %arg4: memref<16x800xbf16, #tpu.memory_space<vmem>>, %arg5: memref<800x128xbf16, #tpu.memory_space<vmem>>, %arg6: memref<1x128xf32, #tpu.memory_space<vmem>>, %arg7: memref<1x128xf32, #tpu.memory_space<vmem>>, %arg8: memref<16x128xbf16, #tpu.memory_space<vmem>>) attributes {dimension_semantics = [#tpu.dimension_semantics<parallel>], iteration_bounds = array<i64: 2>, scalar_prefetch = 0 : i64, scratch_operands = 0 : i64, tpu.core_type = #tpu.core_type<tc>, window_params = [{transform_indices = @transform_0, window_bounds = array<i64: 16, 800>}, {transform_indices = @transform_1, window_bounds = array<i64: 16, 800>}, {transform_indices = @transform_2, window_bounds = array<i64: 16, 800>}, {transform_indices = @transform_3, window_bounds = array<i64: 16, 800>}, {pipeline_mode = #tpu.pipeline_mode<synchronous>, transform_indices = @transform_4, window_bounds = array<i64: 800, 128>}, {pipeline_mode = #tpu.pipeline_mode<synchronous>, transform_indices = @transform_5, window_bounds = array<i64: 1, 128>}, {pipeline_mode = #tpu.pipeline_mode<synchronous>, transform_indices = @transform_6, window_bounds = array<i64: 1, 128>}, {transform_indices = @transform_7, window_bounds = array<i64: 16, 128>}]} {
    %c0 = arith.constant 0 : index
    %c0_0 = arith.constant 0 : index
    %0 = vector.load %arg5[%c0, %c0_0] : memref<800x128xbf16, #tpu.memory_space<vmem>>, vector<800x128xbf16>
    %c0_1 = arith.constant 0 : index
    %c0_2 = arith.constant 0 : index
    %1 = vector.load %arg6[%c0_1, %c0_2] : memref<1x128xf32, #tpu.memory_space<vmem>>, vector<1x128xf32>
    %c0_3 = arith.constant 0 : index
    %c0_4 = arith.constant 0 : index
    %2 = vector.load %arg7[%c0_3, %c0_4] : memref<1x128xf32, #tpu.memory_space<vmem>>, vector<1x128xf32>
    %c0_5 = arith.constant 0 : index
    %c0_6 = arith.constant 0 : index
    %3 = vector.load %arg1[%c0_5, %c0_6] : memref<16x800xbf16, #tpu.memory_space<vmem>>, vector<16x800xbf16>
    %cst = arith.constant dense<0.000000e+00> : vector<16x128xf32>
    %4 = tpu.matmul %3, %0, %cst {dimension_numbers = #tpu.dot_dimension_numbers<[1], [0], [0], [1], [0, 0, 1, 1], [], []>} : vector<16x800xbf16>, vector<800x128xbf16>, vector<16x128xf32> -> vector<16x128xf32>
    %5 = vector.broadcast %1 : vector<1x128xf32> to vector<16x128xf32>
    %6 = arith.mulf %4, %5 : vector<16x128xf32>
    %7 = vector.broadcast %2 : vector<1x128xf32> to vector<16x128xf32>
    %8 = arith.addf %6, %7 : vector<16x128xf32>
    %c0_7 = arith.constant 0 : index
    %c0_8 = arith.constant 0 : index
    %9 = vector.load %arg2[%c0_7, %c0_8] : memref<16x800xbf16, #tpu.memory_space<vmem>>, vector<16x800xbf16>
    %cst_9 = arith.constant dense<0.000000e+00> : vector<16x128xf32>
    %10 = tpu.matmul %9, %0, %cst_9 {dimension_numbers = #tpu.dot_dimension_numbers<[1], [0], [0], [1], [0, 0, 1, 1], [], []>} : vector<16x800xbf16>, vector<800x128xbf16>, vector<16x128xf32> -> vector<16x128xf32>
    %11 = vector.broadcast %1 : vector<1x128xf32> to vector<16x128xf32>
    %12 = arith.mulf %10, %11 : vector<16x128xf32>
    %13 = vector.broadcast %2 : vector<1x128xf32> to vector<16x128xf32>
    %14 = arith.addf %12, %13 : vector<16x128xf32>
    %15 = arith.maximumf %8, %14 : vector<16x128xf32>
    %c0_10 = arith.constant 0 : index
    %c0_11 = arith.constant 0 : index
    %16 = vector.load %arg3[%c0_10, %c0_11] : memref<16x800xbf16, #tpu.memory_space<vmem>>, vector<16x800xbf16>
    %cst_12 = arith.constant dense<0.000000e+00> : vector<16x128xf32>
    %17 = tpu.matmul %16, %0, %cst_12 {dimension_numbers = #tpu.dot_dimension_numbers<[1], [0], [0], [1], [0, 0, 1, 1], [], []>} : vector<16x800xbf16>, vector<800x128xbf16>, vector<16x128xf32> -> vector<16x128xf32>
    %18 = vector.broadcast %1 : vector<1x128xf32> to vector<16x128xf32>
    %19 = arith.mulf %17, %18 : vector<16x128xf32>
    %20 = vector.broadcast %2 : vector<1x128xf32> to vector<16x128xf32>
    %21 = arith.addf %19, %20 : vector<16x128xf32>
    %c0_13 = arith.constant 0 : index
    %c0_14 = arith.constant 0 : index
    %22 = vector.load %arg4[%c0_13, %c0_14] : memref<16x800xbf16, #tpu.memory_space<vmem>>, vector<16x800xbf16>
    %cst_15 = arith.constant dense<0.000000e+00> : vector<16x128xf32>
    %23 = tpu.matmul %22, %0, %cst_15 {dimension_numbers = #tpu.dot_dimension_numbers<[1], [0], [0], [1], [0, 0, 1, 1], [], []>} : vector<16x800xbf16>, vector<800x128xbf16>, vector<16x128xf32> -> vector<16x128xf32>
    %24 = vector.broadcast %1 : vector<1x128xf32> to vector<16x128xf32>
    %25 = arith.mulf %23, %24 : vector<16x128xf32>
    %26 = vector.broadcast %2 : vector<1x128xf32> to vector<16x128xf32>
    %27 = arith.addf %25, %26 : vector<16x128xf32>
    %28 = arith.maximumf %21, %27 : vector<16x128xf32>
    %29 = arith.maximumf %15, %28 : vector<16x128xf32>
    %cst_16 = arith.constant 0.000000e+00 : f32
    %30 = vector.broadcast %cst_16 : f32 to vector<16x128xf32>
    %31 = arith.maximumf %29, %30 : vector<16x128xf32>
    %32 = arith.truncf %31 : vector<16x128xf32> to vector<16x128xbf16>
    %c0_17 = arith.constant 0 : index
    %c0_18 = arith.constant 0 : index
    %33 = vector.load %arg8[%c0_17, %c0_18] : memref<16x128xbf16, #tpu.memory_space<vmem>>, vector<16x128xbf16>
    tpu.vector_store %arg8[%c0_17, %c0_18], %32 {strides = array<i32>} : memref<16x128xbf16, #tpu.memory_space<vmem>>, vector<16x128xbf16>,
    return
  }
  func.func @transform_0(%arg0: i32) -> (i32, i32) {
    %c0_i32 = arith.constant 0 : i32
    %c0_i32_0 = arith.constant 0 : i32
    return %arg0, %c0_i32 : i32, i32
  }
  func.func @transform_1(%arg0: i32) -> (i32, i32) {
    %c0_i32 = arith.constant 0 : i32
    %c0_i32_0 = arith.constant 0 : i32
    return %arg0, %c0_i32 : i32, i32
  }
  func.func @transform_2(%arg0: i32) -> (i32, i32) {
    %c0_i32 = arith.constant 0 : i32
    %c0_i32_0 = arith.constant 0 : i32
    return %arg0, %c0_i32 : i32, i32
  }
  func.func @transform_3(%arg0: i32) -> (i32, i32) {
    %c0_i32 = arith.constant 0 : i32
    %c0_i32_0 = arith.constant 0 : i32
    return %arg0, %c0_i32 : i32, i32
  }
  func.func @transform_4(%arg0: i32) -> (i32, i32) {
    %c0_i32 = arith.constant 0 : i32
    %c0_i32_0 = arith.constant 0 : i32
    %c0_i32_1 = arith.constant 0 : i32
    return %c0_i32, %c0_i32_0 : i32, i32
  }
  func.func @transform_5(%arg0: i32) -> (i32, i32) {
    %c0_i32 = arith.constant 0 : i32
    %c0_i32_0 = arith.constant 0 : i32
    %c0_i32_1 = arith.constant 0 : i32
    return %c0_i32, %c0_i32_0 : i32, i32
  }
  func.func @transform_6(%arg0: i32) -> (i32, i32) {
    %c0_i32 = arith.constant 0 : i32
    %c0_i32_0 = arith.constant 0 : i32
    %c0_i32_1 = arith.constant 0 : i32
    return %c0_i32, %c0_i32_0 : i32, i32
  }
  func.func @transform_7(%arg0: i32) -> (i32, i32) {
    %c0_i32 = arith.constant 0 : i32
    %c0_i32_0 = arith.constant 0 : i32
    return %arg0, %c0_i32 : i32, i32
  }
}

module attributes {stable_mosaic.version = 11 : i64} {
  func.func @linear_kernel(%arg0: i32, %arg1: memref<16x576xbf16, #tpu.memory_space<vmem>>, %arg2: memref<576x128xbf16, #tpu.memory_space<vmem>>, %arg3: memref<1x128xf32, #tpu.memory_space<vmem>>, %arg4: memref<16x128xf32, #tpu.memory_space<vmem>>) attributes {dimension_semantics = [#tpu.dimension_semantics<parallel>], iteration_bounds = array<i64: 1>, scalar_prefetch = 0 : i64, scratch_operands = 0 : i64, tpu.core_type = #tpu.core_type<tc>, window_params = [{transform_indices = @transform_0, window_bounds = array<i64: 16, 576>}, {pipeline_mode = #tpu.pipeline_mode<synchronous>, transform_indices = @transform_1, window_bounds = array<i64: 576, 128>}, {pipeline_mode = #tpu.pipeline_mode<synchronous>, transform_indices = @transform_2, window_bounds = array<i64: 1, 128>}, {transform_indices = @transform_3, window_bounds = array<i64: 16, 128>}]} {
    %c0 = arith.constant 0 : index
    %c0_0 = arith.constant 0 : index
    %0 = vector.load %arg1[%c0, %c0_0] : memref<16x576xbf16, #tpu.memory_space<vmem>>, vector<16x576xbf16>
    %c0_1 = arith.constant 0 : index
    %c0_2 = arith.constant 0 : index
    %1 = vector.load %arg2[%c0_1, %c0_2] : memref<576x128xbf16, #tpu.memory_space<vmem>>, vector<576x128xbf16>
    %cst = arith.constant dense<0.000000e+00> : vector<16x128xf32>
    %2 = tpu.matmul %0, %1, %cst {dimension_numbers = #tpu.dot_dimension_numbers<[1], [0], [0], [1], [0, 0, 1, 1], [], []>} : vector<16x576xbf16>, vector<576x128xbf16>, vector<16x128xf32> -> vector<16x128xf32>
    %c0_3 = arith.constant 0 : index
    %c0_4 = arith.constant 0 : index
    %3 = vector.load %arg3[%c0_3, %c0_4] : memref<1x128xf32, #tpu.memory_space<vmem>>, vector<1x128xf32>
    %4 = vector.broadcast %3 : vector<1x128xf32> to vector<16x128xf32>
    %5 = arith.addf %2, %4 : vector<16x128xf32>
    %c0_5 = arith.constant 0 : index
    %c0_6 = arith.constant 0 : index
    %6 = vector.load %arg4[%c0_5, %c0_6] : memref<16x128xf32, #tpu.memory_space<vmem>>, vector<16x128xf32>
    tpu.vector_store %arg4[%c0_5, %c0_6], %5 {strides = array<i32>} : memref<16x128xf32, #tpu.memory_space<vmem>>, vector<16x128xf32>,
    return
  }
  func.func @transform_0(%arg0: i32) -> (i32, i32) {
    %c0_i32 = arith.constant 0 : i32
    %c0_i32_0 = arith.constant 0 : i32
    return %arg0, %c0_i32 : i32, i32
  }
  func.func @transform_1(%arg0: i32) -> (i32, i32) {
    %c0_i32 = arith.constant 0 : i32
    %c0_i32_0 = arith.constant 0 : i32
    %c0_i32_1 = arith.constant 0 : i32
    return %c0_i32, %c0_i32_0 : i32, i32
  }
  func.func @transform_2(%arg0: i32) -> (i32, i32) {
    %c0_i32 = arith.constant 0 : i32
    %c0_i32_0 = arith.constant 0 : i32
    %c0_i32_1 = arith.constant 0 : i32
    return %c0_i32, %c0_i32_0 : i32, i32
  }
  func.func @transform_3(%arg0: i32) -> (i32, i32) {
    %c0_i32 = arith.constant 0 : i32
    %c0_i32_0 = arith.constant 0 : i32
    return %arg0, %c0_i32 : i32, i32
  }
}

</mosaic_0001>

<bundles_post_ra>
// kernel: digitnet_forward.4
= control target key start
LH: loop header
LB: loop body
LE: loop exit
PB: predicated region body
PF: predicated region fallthrough
CT: control target
= control target key end

     0   :  { %s2045_s24 = smov 0   ;;  %s2571_s0 = inlined_call_operand.vmem [shape: bf16[288,25], index: 0, kind: input, shape index: {}]   ;;  %s2572_s1 = inlined_call_operand.vmem [shape: bf16[288,25], index: 1, kind: input, shape index: {}]   ;;  %s2573_s2 = inlined_call_operand.vmem [shape: bf16[288,25], index: 2, kind: input, shape index: {}]   ;;  %s2574_s3 = inlined_call_operand.vmem [shape: bf16[288,25], index: 3, kind: input, shape index: {}]   ;;  %s2575_s4 = inlined_call_operand.vmem [shape: bf16[25,128], index: 4, kind: input, shape index: {}]   ;;  %s2576_s5 = inlined_call_operand.vmem [shape: f32[1,128], index: 5, kind: input, shape index: {}]   ;;  %s2577_s6 = inlined_call_operand.vmem [shape: f32[1,128], index: 6, kind: input, shape index: {}]   ;;  %s2578_s7 = inlined_call_operand.vmem [shape: bf16[288,128], index: 7, kind: output, shape index: {}]  }
   0x1 LB: > { %s1564_s25 = sadd.s32 4294967295, %s2000_s24   ;;  %p1568_p0 = scmp.ge.s32.totalorder %s2000_s24, 1  ;;  %s2000_s24 = sphi %s2045_s24, %s17_s24  }
   0x2   : > { %p271_p1 = scmp.lt.s32.totalorder %s2000_s24, 3 }
   0x4   : > { %p272_p2 = pnand %p1568_p0, %p271_p1 }
   0x5   : > { %v1956_v0 = vld [vmem:[%s2575_s4] sm:$0xff] (!%p272_p2)   ;;  %v2002_v1 = vmov (!%p272_p2), 0.0   ;;  %v1957_v2 = vld [vmem:[%s2575_s4 + $0x8] sm:$0x1f] (!%p272_p2)   ;;  %vm457_vm0 = vcmask (!%p272_p2), 1043456   ;;  %vm458_vm1 = vcmask (!%p272_p2), 1044480  }
   0x6   : > { %275 = sbr.rel (%p272_p2) target bundleno = 381 (0x17d), region = 48  ;;  %1785 = vmatprep.subr.bf16.mxu0 (!%p272_p2), %v2002_v1  ;;  %1825 = vmatprep.subr.bf16.mxu1 (!%p272_p2), %v2002_v1  ;;  %v2003_v3 = vmov (!%p272_p2), 65535   ;;  %vm2004_vm2 = vmmov (!%p272_p2), 0   ;;  %vm429_vm3 = vcmask (!%p272_p2), 203776   ;;  %v2240_v43 = vld [vmem:[%s2576_s5] ss:$0 sm:$0xff] (!%p272_p2) }
   0x7   : > { %1786 = vmatpush3.bf16.msra.mxu0 (!%p272_p2), %v1956_v0  ;;  %1826 = vmatpush3.bf16.msra.mxu1 (!%p272_p2), %v1956_v0  ;;  %s318_s30 = smul.u32 (!%p272_p2), 18, %s1564_s25  ;;  %v459_v4 = vsel (!%p272_p2), %vm457_vm0, 4294967295, %v2003_v3  ;;  %v2245_v44 = vld [vmem:[%s2577_s6] ss:$0 sm:$0xff] (!%p272_p2) }
   0x8   : > { %1787 = vmatprep.subr.bf16.mxu0 (!%p272_p2), %v2002_v1  ;;  %1827 = vmatprep.subr.bf16.mxu1 (!%p272_p2), %v2002_v1  ;;  %v460_v5 = vsel (!%p272_p2), %vm458_vm1, %v459_v4, 0 }
   0x9   : > { %1789 = vmatprep.mubr.msk.bf16.mxu0 (!%p272_p2), %vm2004_vm2, %v2002_v1  ;;  %1829 = vmatprep.mubr.msk.bf16.mxu1 (!%p272_p2), %vm2004_vm2, %v2002_v1  ;;  %p319_p3 = scmp.lt.s32.totalorder (!%p272_p2), %s318_s30, 35  ;;  %v462_v6 = vand.u32 (!%p272_p2), %v1957_v2, %v460_v5 }
   0xb   : > { %1788 = vmatpush3.bf16.msra.mxu0 (!%p272_p2), %v462_v6  ;;  %1828 = vmatpush3.bf16.msra.mxu1 (!%p272_p2), %v462_v6 }
   0xc   : > { %1865 = vmatprep.subr.bf16.mxu0 (!%p272_p2), %v2002_v1  ;;  %1905 = vmatprep.subr.bf16.mxu1 (!%p272_p2), %v2002_v1 }
   0xd   : > { %s2588_s30 = smov (!%p319_p3, %s318_s30), 35 }
   0xe   : > { %s2069_s8 = sshll.u32 %s2588_s30, 2 }
   0xf   : > { %s2075_s11 = scalar_lea.vmem %s2571_s0, %s2069_s8  ;;  %s2081_s14 = scalar_lea.vmem %s2572_s1, %s2069_s8 }
  0x10   : > { %v1958_v7 = vld [vmem:[%s2075_s11] sm:$0xff]   ;;  %v1960_v9 = vld [vmem:[%s2075_s11 + $0x8] sm:$0xff]   ;;  %v1962_v11 = vld [vmem:[%s2075_s11 + $0x10] sm:$0xff]   ;;  %s2107_s17 = scalar_lea.vmem %s2573_s2, %s2069_s8  ;;  %s2114_s20 = scalar_lea.vmem %s2574_s3, %s2069_s8 }
  0x11   : > { %v1959_v8 = vld [vmem:[%s2081_s14] sm:$0xff]   ;;  %1790 = vmatmul.mubr.msk.bf16.vlgmr.msra.gmra.mrb[0].mxu0 %vm429_vm3, %v1958_v7  ;;  %v1961_v10 = vld [vmem:[%s2081_s14 + $0x8] sm:$0xff]   ;;  %v1963_v12 = vld [vmem:[%s2081_s14 + $0x10] sm:$0xff]   ;;  %s2451_s28 = scalar_lea.vmem %s2578_s7, %s2069_s8 }
  0x12   : > { %1830 = vmatmul.mubr.msk.bf16.vlgmr.msra.gmra.mrb[0].mxu1 %vm429_vm3, %v1959_v8  ;;  %1866 = vmatpush3.bf16.msra.mxu0 %v1956_v0  ;;  %v1964_v13 = vld [vmem:[%s2075_s11 + $0x18] sm:$0xff]   ;;  %v1966_v15 = vld [vmem:[%s2075_s11 + $0x20] sm:$0xff]   ;;  %v1968_v17 = vld [vmem:[%s2075_s11 + $0x28] sm:$0xff]  }
  0x13   : > { %1906 = vmatpush3.bf16.msra.mxu1 %v1956_v0  ;;  %1793 = vmatprep.mubr.msk.bf16.mxu0 %vm2004_vm2, %v2002_v1  ;;  %v1965_v14 = vld [vmem:[%s2081_s14 + $0x18] sm:$0xff]   ;;  %v1967_v16 = vld [vmem:[%s2081_s14 + $0x20] sm:$0xff]   ;;  %v1969_v18 = vld [vmem:[%s2081_s14 + $0x28] sm:$0xff]  }
  0x14   : > { %1833 = vmatprep.mubr.msk.bf16.mxu1 %vm2004_vm2, %v2002_v1  ;;  %1867 = vmatprep.subr.bf16.mxu0 %v2002_v1  ;;  %v1970_v19 = vld [vmem:[%s2075_s11 + $0x30] sm:$0xff]   ;;  %v1972_v21 = vld [vmem:[%s2075_s11 + $0x38] sm:$0xff]   ;;  %v1974_v23 = vld [vmem:[%s2075_s11 + $0x40] sm:$0xff]  }
  0x15   : > { %1907 = vmatprep.subr.bf16.mxu1 %v2002_v1  ;;  %v1971_v20 = vld [vmem:[%s2081_s14 + $0x30] sm:$0xff]   ;;  %v1973_v22 = vld [vmem:[%s2081_s14 + $0x38] sm:$0xff]   ;;  %v1975_v24 = vld [vmem:[%s2081_s14 + $0x40] sm:$0xff]  }
  0x16   : > { %1868 = vmatpush3.bf16.msra.mxu0 %v462_v6  ;;  %v1976_v25 = vld [vmem:[%s2107_s17] sm:$0xff]   ;;  %v1978_v27 = vld [vmem:[%s2107_s17 + $0x8] sm:$0xff]   ;;  %v1980_v29 = vld [vmem:[%s2107_s17 + $0x10] sm:$0xff]  }
  0x17   : > { %1908 = vmatpush3.bf16.msra.mxu1 %v462_v6  ;;  %v1977_v26 = vld [vmem:[%s2114_s20] sm:$0xff]   ;;  %v1979_v28 = vld [vmem:[%s2114_s20 + $0x8] sm:$0xff]   ;;  %v1981_v30 = vld [vmem:[%s2114_s20 + $0x10] sm:$0xff]  }
  0x18   : > { %v1982_v31 = vld [vmem:[%s2107_s17 + $0x18] sm:$0xff]   ;;  %v1984_v33 = vld [vmem:[%s2107_s17 + $0x20] sm:$0xff]   ;;  %v1986_v35 = vld [vmem:[%s2107_s17 + $0x28] sm:$0xff]  }
  0x19   : > { %1794 = vmatmul.mubr.msk.bf16.gmra.mrb[4].mxu0 %vm429_vm3, %v1960_v9  ;;  %v1983_v32 = vld [vmem:[%s2114_s20 + $0x18] sm:$0xff]   ;;  %v1985_v34 = vld [vmem:[%s2114_s20 + $0x20] sm:$0xff]   ;;  %v1987_v36 = vld [vmem:[%s2114_s20 + $0x28] sm:$0xff]  }
  0x1a   : > { %1834 = vmatmul.mubr.msk.bf16.gmra.mrb[4].mxu1 %vm429_vm3, %v1961_v10  ;;  %1797 = vmatprep.mubr.msk.bf16.mxu0 %vm2004_vm2, %v2002_v1  ;;  %v1988_v37 = vld [vmem:[%s2107_s17 + $0x30] sm:$0xff]   ;;  %v1990_v39 = vld [vmem:[%s2107_s17 + $0x38] sm:$0xff]   ;;  %v1992_v41 = vld [vmem:[%s2107_s17 + $0x40] sm:$0xff]  }
  0x1b   : > { %1837 = vmatprep.mubr.msk.bf16.mxu1 %vm2004_vm2, %v2002_v1  ;;  %v1989_v38 = vld [vmem:[%s2114_s20 + $0x30] sm:$0xff]   ;;  %v1991_v40 = vld [vmem:[%s2114_s20 + $0x38] sm:$0xff]   ;;  %v1993_v42 = vld [vmem:[%s2114_s20 + $0x40] sm:$0xff]  }
  0x21   : > { %1798 = vmatmul.mubr.msk.bf16.gmra.mrb[8].mxu0 %vm429_vm3, %v1962_v11 }
  0x22   : > { %1838 = vmatmul.mubr.msk.bf16.gmra.mrb[8].mxu1 %vm429_vm3, %v1963_v12  ;;  %1801 = vmatprep.mubr.msk.bf16.mxu0 %vm2004_vm2, %v2002_v1 }
  0x23   : > { %1841 = vmatprep.mubr.msk.bf16.mxu1 %vm2004_vm2, %v2002_v1 }
  0x29   : > { %1802 = vmatmul.mubr.msk.bf16.gmra.mrb[12].mxu0 %vm429_vm3, %v1964_v13 }
  0x2a   : > { %1842 = vmatmul.mubr.msk.bf16.gmra.mrb[12].mxu1 %vm429_vm3, %v1965_v14  ;;  %1805 = vmatprep.mubr.msk.bf16.mxu0 %vm2004_vm2, %v2002_v1 }
  0x2b   : > { %1845 = vmatprep.mubr.msk.bf16.mxu1 %vm2004_vm2, %v2002_v1 }
  0x31   : > { %1806 = vmatmul.mubr.msk.bf16.gmra.mrb[16].mxu0 %vm429_vm3, %v1966_v15 }
  0x32   : > { %1846 = vmatmul.mubr.msk.bf16.gmra.mrb[16].mxu1 %vm429_vm3, %v1967_v16  ;;  %1809 = vmatprep.mubr.msk.bf16.mxu0 %vm2004_vm2, %v2002_v1 }
  0x33   : > { %1849 = vmatprep.mubr.msk.bf16.mxu1 %vm2004_vm2, %v2002_v1 }
  0x39   : > { %1810 = vmatmul.mubr.msk.bf16.gmra.mrb[20].mxu0 %vm429_vm3, %v1968_v17 }
  0x3a   : > { %1850 = vmatmul.mubr.msk.bf16.gmra.mrb[20].mxu1 %vm429_vm3, %v1969_v18  ;;  %1813 = vmatprep.mubr.msk.bf16.mxu0 %vm2004_vm2, %v2002_v1 }
  0x3b   : > { %1853 = vmatprep.mubr.msk.bf16.mxu1 %vm2004_vm2, %v2002_v1 }
  0x41   : > { %1814 = vmatmul.mubr.msk.bf16.gmra.mrb[24].mxu0 %vm429_vm3, %v1970_v19 }
  0x42   : > { %1854 = vmatmul.mubr.msk.bf16.gmra.mrb[24].mxu1 %vm429_vm3, %v1971_v20  ;;  %1817 = vmatprep.mubr.msk.bf16.mxu0 %vm2004_vm2, %v2002_v1 }
  0x43   : > { %1857 = vmatprep.mubr.msk.bf16.mxu1 %vm2004_vm2, %v2002_v1 }
  0x49   : > { %1818 = vmatmul.mubr.msk.bf16.gmra.mrb[28].mxu0 %vm429_vm3, %v1972_v21 }
  0x4a   : > { %1858 = vmatmul.mubr.msk.bf16.gmra.mrb[28].mxu1 %vm429_vm3, %v1973_v22  ;;  %1821 = vmatprep.mubr.msk.bf16.mxu0 %vm2004_vm2, %v2002_v1 }
  0x4b   : > { %1861 = vmatprep.mubr.msk.bf16.mxu1 %vm2004_vm2, %v2002_v1 }
  0x51   : > { %1822 = vmatmul.mubr.msk.bf16.gmra.mrb[32].mxu0 %vm429_vm3, %v1974_v23 }
  0x52   : > { %1862 = vmatmul.mubr.msk.bf16.gmra.mrb[32].mxu1 %vm429_vm3, %v1975_v24  ;;  %1869 = vmatprep.mubr.msk.bf16.mxu0 %vm2004_vm2, %v2002_v1 }
  0x53   : > { %1909 = vmatprep.mubr.msk.bf16.mxu1 %vm2004_vm2, %v2002_v1 }
  0x59   : > { %1870 = vmatmul.mubr.msk.bf16.vlgmr.msra.gmra.mrb[36].mxu0 %vm429_vm3, %v1976_v25 }
  0x5a   : > { %1910 = vmatmul.mubr.msk.bf16.vlgmr.msra.gmra.mrb[36].mxu1 %vm429_vm3, %v1977_v26  ;;  %1873 = vmatprep.mubr.msk.bf16.mxu0 %vm2004_vm2, %v2002_v1 }
  0x5b   : > { %1913 = vmatprep.mubr.msk.bf16.mxu1 %vm2004_vm2, %v2002_v1 }
  0x61   : > { %1874 = vmatmul.mubr.msk.bf16.gmra.mrb[40].mxu0 %vm429_vm3, %v1978_v27 }
  0x62   : > { %1914 = vmatmul.mubr.msk.bf16.gmra.mrb[40].mxu1 %vm429_vm3, %v1979_v28  ;;  %1877 = vmatprep.mubr.msk.bf16.mxu0 %vm2004_vm2, %v2002_v1 }
  0x63   : > { %1917 = vmatprep.mubr.msk.bf16.mxu1 %vm2004_vm2, %v2002_v1 }
  0x69   : > { %1878 = vmatmul.mubr.msk.bf16.gmra.mrb[44].mxu0 %vm429_vm3, %v1980_v29 }
  0x6a   : > { %1918 = vmatmul.mubr.msk.bf16.gmra.mrb[44].mxu1 %vm429_vm3, %v1981_v30  ;;  %1881 = vmatprep.mubr.msk.bf16.mxu0 %vm2004_vm2, %v2002_v1 }
  0x6b   : > { %1921 = vmatprep.mubr.msk.bf16.mxu1 %vm2004_vm2, %v2002_v1 }
  0x71   : > { %1882 = vmatmul.mubr.msk.bf16.gmra.mrb[48].mxu0 %vm429_vm3, %v1982_v31 }
  0x72   : > { %1922 = vmatmul.mubr.msk.bf16.gmra.mrb[48].mxu1 %vm429_vm3, %v1983_v32  ;;  %1885 = vmatprep.mubr.msk.bf16.mxu0 %vm2004_vm2, %v2002_v1 }
  0x73   : > { %1925 = vmatprep.mubr.msk.bf16.mxu1 %vm2004_vm2, %v2002_v1 }
  0x79   : > { %1886 = vmatmul.mubr.msk.bf16.gmra.mrb[52].mxu0 %vm429_vm3, %v1984_v33 }
  0x7a   : > { %1926 = vmatmul.mubr.msk.bf16.gmra.mrb[52].mxu1 %vm429_vm3, %v1985_v34  ;;  %1889 = vmatprep.mubr.msk.bf16.mxu0 %vm2004_vm2, %v2002_v1 }
  0x7b   : > { %1929 = vmatprep.mubr.msk.bf16.mxu1 %vm2004_vm2, %v2002_v1 }
  0x81   : > { %1890 = vmatmul.mubr.msk.bf16.gmra.mrb[56].mxu0 %vm429_vm3, %v1986_v35 }
  0x82   : > { %1930 = vmatmul.mubr.msk.bf16.gmra.mrb[56].mxu1 %vm429_vm3, %v1987_v36  ;;  %1893 = vmatprep.mubr.msk.bf16.mxu0 %vm2004_vm2, %v2002_v1 }
  0x83   : > { %1933 = vmatprep.mubr.msk.bf16.mxu1 %vm2004_vm2, %v2002_v1 }
  0x89   : > { %1894 = vmatmul.mubr.msk.bf16.gmra.mrb[60].mxu0 %vm429_vm3, %v1988_v37 }
  0x8a   : > { %1934 = vmatmul.mubr.msk.bf16.gmra.mrb[60].mxu1 %vm429_vm3, %v1989_v38  ;;  %1897 = vmatprep.mubr.msk.bf16.mxu0 %vm2004_vm2, %v2002_v1 }
  0x8b   : > { %1937 = vmatprep.mubr.msk.bf16.mxu1 %vm2004_vm2, %v2002_v1 }
  0x91   : > { %1898 = vmatmul.mubr.msk.bf16.gmra.mrb[64].mxu0 %vm429_vm3, %v1990_v39 }
  0x92   : > { %1938 = vmatmul.mubr.msk.bf16.gmra.mrb[64].mxu1 %vm429_vm3, %v1991_v40  ;;  %1901 = vmatprep.mubr.msk.bf16.mxu0 %vm2004_vm2, %v2002_v1 }
  0x93   : > { %1941 = vmatprep.mubr.msk.bf16.mxu1 %vm2004_vm2, %v2002_v1 }
  0x99   : > { %1902 = vmatmul.mubr.msk.bf16.gmra.mrb[68].mxu0 %vm429_vm3, %v1992_v41 }
  0x9a   : > { %1942 = vmatmul.mubr.msk.bf16.gmra.mrb[68].mxu1 %vm429_vm3, %v1993_v42 }
  0xe4   : > { %v498_v45 = vpop.f32.mrb[0].mxu0 }
  0xe5   : > { %v575_v46 = vmul.f32 %v2240_v43, %v498_v45  ;;  %v741_v47 = vpop.f32.mrb[0].mxu1  ;;  %v1791_v48 = vpop.f32.mrb[1].mxu0 }
  0xe6   : > { %v812_v49 = vmul.f32 %v2240_v43, %v741_v47  ;;  %v1831_v50 = vpop.f32.mrb[1].mxu1  ;;  %v501_v51 = vpop.f32.mrb[2].mxu0 }
  0xe7   : > { %v2250_v52 = vadd.f32 %v2245_v44, %v575_v46  ;;  %v576_v53 = vmul.f32 %v2240_v43, %v501_v51  ;;  %v744_v54 = vpop.f32.mrb[2].mxu1  ;;  %v1792_v55 = vpop.f32.mrb[3].mxu0 }
  0xe8   : > { %v2254_v56 = vadd.f32 %v2245_v44, %v812_v49  ;;  %v813_v57 = vmul.f32 %v2240_v43, %v744_v54  ;;  %v1832_v58 = vpop.f32.mrb[3].mxu1 }
  0xe9   : > { %v2258_v59 = vadd.f32 %v2245_v44, %v576_v53 }
  0xea   : > { %v848_v60 = vmax.f32 %v2250_v52, %v2254_v56  ;;  %v2263_v61 = vadd.f32 %v2245_v44, %v813_v57 }
  0xec   : > { %v849_v62 = vmax.f32 %v2258_v59, %v2263_v61  ;;  %v506_v63 = vpop.f32.mrb[4].mxu0 }
  0xed   : > { %v577_v0 = vmul.f32 %v2240_v43, %v506_v63  ;;  %v749_v1 = vpop.f32.mrb[4].mxu1  ;;  %v1795_v2 = vpop.f32.mrb[5].mxu0 }
  0xee   : > { %v814_v3 = vmul.f32 %v2240_v43, %v749_v1  ;;  %v1835_v4 = vpop.f32.mrb[5].mxu1  ;;  %v509_v5 = vpop.f32.mrb[6].mxu0 }
  0xef   : > { %v2270_v6 = vadd.f32 %v2245_v44, %v577_v0  ;;  %v578_v7 = vmul.f32 %v2240_v43, %v509_v5  ;;  %v752_v8 = vpop.f32.mrb[6].mxu1  ;;  %v1796_v9 = vpop.f32.mrb[7].mxu0 }
  0xf0   : > { %v2274_v10 = vadd.f32 %v2245_v44, %v814_v3  ;;  %v815_v11 = vmul.f32 %v2240_v43, %v752_v8  ;;  %v1836_v12 = vpop.f32.mrb[7].mxu1 }
  0xf1   : > { %v2278_v13 = vadd.f32 %v2245_v44, %v578_v7 }
  0xf2   : > { %v850_v14 = vmax.f32 %v2270_v6, %v2274_v10  ;;  %v2283_v15 = vadd.f32 %v2245_v44, %v815_v11 }
  0xf4   : > { %v851_v16 = vmax.f32 %v2278_v13, %v2283_v15  ;;  %v514_v17 = vpop.f32.mrb[8].mxu0 }
  0xf5   : > { %v579_v18 = vmul.f32 %v2240_v43, %v514_v17  ;;  %v757_v19 = vpop.f32.mrb[8].mxu1  ;;  %v1799_v20 = vpop.f32.mrb[9].mxu0 }
  0xf6   : > { %v816_v21 = vmul.f32 %v2240_v43, %v757_v19  ;;  %v1839_v22 = vpop.f32.mrb[9].mxu1  ;;  %v517_v23 = vpop.f32.mrb[10].mxu0 }
  0xf7   : > { %v2290_v24 = vadd.f32 %v2245_v44, %v579_v18  ;;  %v580_v25 = vmul.f32 %v2240_v43, %v517_v23  ;;  %v760_v26 = vpop.f32.mrb[10].mxu1  ;;  %v1800_v27 = vpop.f32.mrb[11].mxu0 }
  0xf8   : > { %v2294_v28 = vadd.f32 %v2245_v44, %v816_v21  ;;  %v817_v29 = vmul.f32 %v2240_v43, %v760_v26  ;;  %v1840_v30 = vpop.f32.mrb[11].mxu1 }
  0xf9   : > { %v2298_v31 = vadd.f32 %v2245_v44, %v580_v25 }
  0xfa   : > { %v852_v32 = vmax.f32 %v2290_v24, %v2294_v28  ;;  %v2303_v33 = vadd.f32 %v2245_v44, %v817_v29 }
  0xfc   : > { %v853_v34 = vmax.f32 %v2298_v31, %v2303_v33  ;;  %v522_v35 = vpop.f32.mrb[12].mxu0 }
  0xfd   : > { %v581_v36 = vmul.f32 %v2240_v43, %v522_v35  ;;  %v765_v37 = vpop.f32.mrb[12].mxu1  ;;  %v1803_v38 = vpop.f32.mrb[13].mxu0 }
  0xfe   : > { %v818_v39 = vmul.f32 %v2240_v43, %v765_v37  ;;  %v1843_v40 = vpop.f32.mrb[13].mxu1  ;;  %v525_v41 = vpop.f32.mrb[14].mxu0 }
  0xff   : > { %v2310_v42 = vadd.f32 %v2245_v44, %v581_v36  ;;  %v582_v45 = vmul.f32 %v2240_v43, %v525_v41  ;;  %v768_v46 = vpop.f32.mrb[14].mxu1  ;;  %v1804_v47 = vpop.f32.mrb[15].mxu0 }
 0x100   : > { %v2314_v48 = vadd.f32 %v2245_v44, %v818_v39  ;;  %v819_v49 = vmul.f32 %v2240_v43, %v768_v46  ;;  %v1844_v50 = vpop.f32.mrb[15].mxu1 }
 0x101   : > { %v2318_v51 = vadd.f32 %v2245_v44, %v582_v45 }
 0x102   : > { %v854_v53 = vmax.f32 %v2310_v42, %v2314_v48  ;;  %v2323_v54 = vadd.f32 %v2245_v44, %v819_v49 }
 0x104   : > { %v855_v55 = vmax.f32 %v2318_v51, %v2323_v54  ;;  %v530_v57 = vpop.f32.mrb[16].mxu0 }
 0x105   : > { %v583_v58 = vmul.f32 %v2240_v43, %v530_v57  ;;  %v773_v63 = vpop.f32.mrb[16].mxu1  ;;  %v1807_v0 = vpop.f32.mrb[17].mxu0 }
 0x106   : > { %v820_v1 = vmul.f32 %v2240_v43, %v773_v63  ;;  %v1847_v2 = vpop.f32.mrb[17].mxu1  ;;  %v533_v3 = vpop.f32.mrb[18].mxu0 }
 0x107   : > { %v2330_v4 = vadd.f32 %v2245_v44, %v583_v58  ;;  %v584_v5 = vmul.f32 %v2240_v43, %v533_v3  ;;  %v776_v7 = vpop.f32.mrb[18].mxu1  ;;  %v1808_v8 = vpop.f32.mrb[19].mxu0 }
 0x108   : > { %v2334_v9 = vadd.f32 %v2245_v44, %v820_v1  ;;  %v821_v11 = vmul.f32 %v2240_v43, %v776_v7  ;;  %v1848_v12 = vpop.f32.mrb[19].mxu1 }
 0x109   : > { %v2338_v17 = vadd.f32 %v2245_v44, %v584_v5 }
 0x10a   : > { %v856_v18 = vmax.f32 %v2330_v4, %v2334_v9  ;;  %v2343_v19 = vadd.f32 %v2245_v44, %v821_v11 }
 0x10c   : > { %v857_v20 = vmax.f32 %v2338_v17, %v2343_v19  ;;  %v538_v21 = vpop.f32.mrb[20].mxu0 }
 0x10d   : > { %v585_v22 = vmul.f32 %v2240_v43, %v538_v21  ;;  %v781_v23 = vpop.f32.mrb[20].mxu1  ;;  %v1811_v25 = vpop.f32.mrb[21].mxu0 }
 0x10e   : > { %v822_v26 = vmul.f32 %v2240_v43, %v781_v23  ;;  %v1851_v27 = vpop.f32.mrb[21].mxu1  ;;  %v541_v29 = vpop.f32.mrb[22].mxu0 }
 0x10f   : > { %v2350_v30 = vadd.f32 %v2245_v44, %v585_v22  ;;  %v586_v35 = vmul.f32 %v2240_v43, %v541_v29  ;;  %v784_v36 = vpop.f32.mrb[22].mxu1  ;;  %v1812_v37 = vpop.f32.mrb[23].mxu0 }
 0x110   : > { %v2354_v38 = vadd.f32 %v2245_v44, %v822_v26  ;;  %v823_v39 = vmul.f32 %v2240_v43, %v784_v36  ;;  %v1852_v40 = vpop.f32.mrb[23].mxu1 }
 0x111   : > { %v2358_v41 = vadd.f32 %v2245_v44, %v586_v35 }
 0x112   : > { %v2363_v46 = vadd.f32 %v2245_v44, %v823_v39 }
 0x114   : > { %v546_v49 = vpop.f32.mrb[24].mxu0 }
 0x115   : > { %v587_v50 = vmul.f32 %v2240_v43, %v546_v49  ;;  %v789_v57 = vpop.f32.mrb[24].mxu1  ;;  %v1815_v58 = vpop.f32.mrb[25].mxu0 }
 0x116   : > { %v824_v63 = vmul.f32 %v2240_v43, %v789_v57  ;;  %v1855_v0 = vpop.f32.mrb[25].mxu1  ;;  %v549_v1 = vpop.f32.mrb[26].mxu0 }
 0x117   : > { %v2370_v2 = vadd.f32 %v2245_v44, %v587_v50  ;;  %v588_v3 = vmul.f32 %v2240_v43, %v549_v1  ;;  %v792_v5 = vpop.f32.mrb[26].mxu1  ;;  %v1816_v7 = vpop.f32.mrb[27].mxu0 }
 0x118   : > { %v2374_v8 = vadd.f32 %v2245_v44, %v824_v63  ;;  %v825_v11 = vmul.f32 %v2240_v43, %v792_v5  ;;  %v1856_v12 = vpop.f32.mrb[27].mxu1 }
 0x119   : > { %v2378_v21 = vadd.f32 %v2245_v44, %v588_v3 }
 0x11a   : > { %v2383_v23 = vadd.f32 %v2245_v44, %v825_v11 }
 0x11c   : > { %v554_v26 = vpop.f32.mrb[28].mxu0 }
 0x11d   : > { %v589_v27 = vmul.f32 %v2240_v43, %v554_v26  ;;  %v797_v29 = vpop.f32.mrb[28].mxu1  ;;  %v1819_v35 = vpop.f32.mrb[29].mxu0 }
 0x11e   : > { %v826_v36 = vmul.f32 %v2240_v43, %v797_v29  ;;  %v1859_v37 = vpop.f32.mrb[29].mxu1  ;;  %v557_v39 = vpop.f32.mrb[30].mxu0 }
 0x11f   : > { %v2390_v40 = vadd.f32 %v2245_v44, %v589_v27  ;;  %v590_v49 = vmul.f32 %v2240_v43, %v557_v39  ;;  %v800_v50 = vpop.f32.mrb[30].mxu1  ;;  %v1820_v57 = vpop.f32.mrb[31].mxu0 }
 0x120   : > { %v2394_v58 = vadd.f32 %v2245_v44, %v826_v36  ;;  %v827_v63 = vmul.f32 %v2240_v43, %v800_v50  ;;  %v1860_v0 = vpop.f32.mrb[31].mxu1 }
 0x121   : > { %v2398_v1 = vadd.f32 %v2245_v44, %v590_v49 }
 0x122   : > { %v2403_v5 = vadd.f32 %v2245_v44, %v827_v63 }
 0x124   : > { %v562_v11 = vpop.f32.mrb[32].mxu0 }
 0x125   : > { %v591_v12 = vmul.f32 %v2240_v43, %v562_v11  ;;  %v805_v26 = vpop.f32.mrb[32].mxu1  ;;  %v1823_v27 = vpop.f32.mrb[33].mxu0 }
 0x126   : > { %v828_v29 = vmul.f32 %v2240_v43, %v805_v26  ;;  %v1863_v35 = vpop.f32.mrb[33].mxu1  ;;  %v565_v36 = vpop.f32.mrb[34].mxu0 }
 0x127   : > { %v2410_v37 = vadd.f32 %v2245_v44, %v591_v12  ;;  %v592_v39 = vmul.f32 %v2240_v43, %v565_v36  ;;  %v808_v49 = vpop.f32.mrb[34].mxu1  ;;  %v1824_v50 = vpop.f32.mrb[35].mxu0 }
 0x128   : > { %v2414_v57 = vadd.f32 %v2245_v44, %v828_v29  ;;  %v829_v63 = vmul.f32 %v2240_v43, %v808_v49  ;;  %v1864_v0 = vpop.f32.mrb[35].mxu1 }
 0x129   : > { %v2418_v11 = vadd.f32 %v2245_v44, %v592_v39 }
 0x12a   : > { %v2423_v27 = vadd.f32 %v2245_v44, %v829_v63 }
 0x12c   : > { %v990_v35 = vpop.f32.mrb[36].mxu0 }
 0x12d   : > { %v1061_v36 = vmul.f32 %v2240_v43, %v990_v35  ;;  %v1221_v29 = vpop.f32.mrb[36].mxu1  ;;  %v1871_v50 = vpop.f32.mrb[37].mxu0 }
 0x12e   : > { %v1292_v49 = vmul.f32 %v2240_v43, %v1221_v29  ;;  %v1911_v0 = vpop.f32.mrb[37].mxu1  ;;  %v993_v7 = vpop.f32.mrb[38].mxu0 }
 0x12f   : > { %v1079_v39 = vadd.f32 %v2245_v44, %v1061_v36  ;;  %v1062_v3 = vmul.f32 %v2240_v43, %v993_v7  ;;  %v1224_v26 = vpop.f32.mrb[38].mxu1  ;;  %v1872_v25 = vpop.f32.mrb[39].mxu0 }
 0x130   : > { %v1310_v63 = vadd.f32 %v2245_v44, %v1292_v49  ;;  %v1293_v22 = vmul.f32 %v2240_v43, %v1224_v26  ;;  %v1912_v12 = vpop.f32.mrb[39].mxu1 }
 0x131   : > { %v1080_v47 = vadd.f32 %v2245_v44, %v1062_v3 }
 0x132   : > { %v1328_v35 = vmax.f32 %v1079_v39, %v1310_v63  ;;  %v1311_v50 = vadd.f32 %v2245_v44, %v1293_v22 }
 0x134   : > { %v1346_v29 = vmax.f32 %v848_v60, %v1328_v35  ;;  %v1329_v0 = vmax.f32 %v1080_v47, %v1311_v50  ;;  %v998_v36 = vpop.f32.mrb[40].mxu0 }
 0x135   : > { %v1063_v7 = vmul.f32 %v2240_v43, %v998_v36  ;;  %v1229_v25 = vpop.f32.mrb[40].mxu1  ;;  %v1875_v45 = vpop.f32.mrb[41].mxu0 }
 0x136   : > { %v1347_v26 = vmax.f32 %v849_v62, %v1329_v0  ;;  %v1294_v3 = vmul.f32 %v2240_v43, %v1229_v25  ;;  %v1915_v12 = vpop.f32.mrb[41].mxu1  ;;  %v1001_v49 = vpop.f32.mrb[42].mxu0  ;;  %v1364_v47 = vmax.f32 %v1346_v29, 0.0 }
 0x137   : > { %v1081_v22 = vadd.f32 %v2245_v44, %v1063_v7  ;;  %v1064_v52 = vmul.f32 %v2240_v43, %v1001_v49  ;;  %v1232_v56 = vpop.f32.mrb[42].mxu1  ;;  %v1876_v60 = vpop.f32.mrb[43].mxu0 }
 0x138   : > { %v1365_v39 = vmax.f32 %v1347_v26, 0.0  ;;  %v1312_v63 = vadd.f32 %v2245_v44, %v1294_v3  ;;  %v1295_v45 = vmul.f32 %v2240_v43, %v1232_v56  ;;  %v1916_v35 = vpop.f32.mrb[43].mxu1 }
 0x139   : > { %v1082_v59 = vadd.f32 %v2245_v44, %v1064_v52 }
 0x13a   : > { %v1691_v61 = vpack.c.bf16 %v1365_v39, %v1364_v47  ;;  %v1330_v62 = vmax.f32 %v1081_v22, %v1312_v63  ;;  %v1313_v50 = vadd.f32 %v2245_v44, %v1295_v45 }
 0x13c   : > { %1692 = vst [vmem:[%s2451_s28] sm:$0xff] %v1691_v61   ;;  %v1348_v29 = vmax.f32 %v850_v14, %v1330_v62  ;;  %v1331_v0 = vmax.f32 %v1082_v59, %v1313_v50  ;;  %v1006_v36 = vpop.f32.mrb[44].mxu0 }
 0x13d   : > { %v1065_v7 = vmul.f32 %v2240_v43, %v1006_v36  ;;  %v1237_v25 = vpop.f32.mrb[44].mxu1  ;;  %v1879_v26 = vpop.f32.mrb[45].mxu0 }
 0x13e   : > { %v1349_v3 = vmax.f32 %v851_v16, %v1331_v0  ;;  %v1296_v12 = vmul.f32 %v2240_v43, %v1237_v25  ;;  %v1919_v49 = vpop.f32.mrb[45].mxu1  ;;  %v1009_v22 = vpop.f32.mrb[46].mxu0  ;;  %v1366_v56 = vmax.f32 %v1348_v29, 0.0 }
 0x13f   : > { %v1083_v52 = vadd.f32 %v2245_v44, %v1065_v7  ;;  %v1066_v6 = vmul.f32 %v2240_v43, %v1009_v22  ;;  %v1240_v10 = vpop.f32.mrb[46].mxu1  ;;  %v1880_v14 = vpop.f32.mrb[47].mxu0 }
 0x140   : > { %v1367_v60 = vmax.f32 %v1349_v3, 0.0  ;;  %v1314_v47 = vadd.f32 %v2245_v44, %v1296_v12  ;;  %v1297_v39 = vmul.f32 %v2240_v43, %v1240_v10  ;;  %v1920_v63 = vpop.f32.mrb[47].mxu1 }
 0x141   : > { %v1084_v13 = vadd.f32 %v2245_v44, %v1066_v6 }
 0x142   : > { %v1696_v15 = vpack.c.bf16 %v1367_v60, %v1366_v56  ;;  %v1332_v16 = vmax.f32 %v1083_v52, %v1314_v47  ;;  %v1315_v45 = vadd.f32 %v2245_v44, %v1297_v39 }
 0x144   : > { %1733 = vst [vmem:[%s2451_s28 + $0x8] sm:$0xff] %v1696_v15   ;;  %v1350_v35 = vmax.f32 %v852_v32, %v1332_v16  ;;  %v1333_v59 = vmax.f32 %v1084_v13, %v1315_v45  ;;  %v1014_v61 = vpop.f32.mrb[48].mxu0 }
 0x145   : > { %v1067_v62 = vmul.f32 %v2240_v43, %v1014_v61  ;;  %v1245_v50 = vpop.f32.mrb[48].mxu1  ;;  %v1883_v29 = vpop.f32.mrb[49].mxu0 }
 0x146   : > { %v1351_v0 = vmax.f32 %v853_v34, %v1333_v59  ;;  %v1298_v36 = vmul.f32 %v2240_v43, %v1245_v50  ;;  %v1923_v7 = vpop.f32.mrb[49].mxu1  ;;  %v1017_v25 = vpop.f32.mrb[50].mxu0  ;;  %v1368_v3 = vmax.f32 %v1350_v35, 0.0 }
 0x147   : > { %v1085_v26 = vadd.f32 %v2245_v44, %v1067_v62  ;;  %v1068_v24 = vmul.f32 %v2240_v43, %v1017_v25  ;;  %v1248_v28 = vpop.f32.mrb[50].mxu1  ;;  %v1884_v32 = vpop.f32.mrb[51].mxu0 }
 0x148   : > { %v1369_v12 = vmax.f32 %v1351_v0, 0.0  ;;  %v1316_v49 = vadd.f32 %v2245_v44, %v1298_v36  ;;  %v1299_v22 = vmul.f32 %v2240_v43, %v1248_v28  ;;  %v1924_v52 = vpop.f32.mrb[51].mxu1 }
 0x149   : > { %v1086_v31 = vadd.f32 %v2245_v44, %v1068_v24 }
 0x14a   : > { %v1701_v33 = vpack.c.bf16 %v1369_v12, %v1368_v3  ;;  %v1334_v34 = vmax.f32 %v1085_v26, %v1316_v49  ;;  %v1317_v6 = vadd.f32 %v2245_v44, %v1299_v22 }
 0x14c   : > { %1734 = vst [vmem:[%s2451_s28 + $0x10] sm:$0xff] %v1701_v33   ;;  %v1352_v10 = vmax.f32 %v854_v53, %v1334_v34  ;;  %v1335_v14 = vmax.f32 %v1086_v31, %v1317_v6  ;;  %v1022_v56 = vpop.f32.mrb[52].mxu0 }
 0x14d   : > { %v1069_v60 = vmul.f32 %v2240_v43, %v1022_v56  ;;  %v1253_v47 = vpop.f32.mrb[52].mxu1  ;;  %v1887_v39 = vpop.f32.mrb[53].mxu0 }
 0x14e   : > { %v1353_v63 = vmax.f32 %v855_v55, %v1335_v14  ;;  %v1300_v13 = vmul.f32 %v2240_v43, %v1253_v47  ;;  %v1927_v15 = vpop.f32.mrb[53].mxu1  ;;  %v1025_v16 = vpop.f32.mrb[54].mxu0  ;;  %v1370_v35 = vmax.f32 %v1352_v10, 0.0  ;;  %v2579_v10 = vmax.f32 %v2350_v30, %v2354_v38 }
 0x14f   : > { %v1087_v45 = vadd.f32 %v2245_v44, %v1069_v60  ;;  %v1070_v42 = vmul.f32 %v2240_v43, %v1025_v16  ;;  %v1256_v48 = vpop.f32.mrb[54].mxu1  ;;  %v1888_v53 = vpop.f32.mrb[55].mxu0 }
 0x150   : > { %v1371_v59 = vmax.f32 %v1353_v63, 0.0  ;;  %v1318_v61 = vadd.f32 %v2245_v44, %v1300_v13  ;;  %v1301_v62 = vmul.f32 %v2240_v43, %v1256_v48  ;;  %v1928_v50 = vpop.f32.mrb[55].mxu1  ;;  %v2580_v13 = vmax.f32 %v2358_v41, %v2363_v46 }
 0x151   : > { %v1088_v51 = vadd.f32 %v2245_v44, %v1070_v42 }
 0x152   : > { %v1706_v54 = vpack.c.bf16 %v1371_v59, %v1370_v35  ;;  %v1336_v55 = vmax.f32 %v1087_v45, %v1318_v61  ;;  %v1319_v29 = vadd.f32 %v2245_v44, %v1301_v62 }
 0x154   : > { %1735 = vst [vmem:[%s2451_s28 + $0x18] sm:$0xff] %v1706_v54   ;;  %v1354_v0 = vmax.f32 %v856_v18, %v1336_v55  ;;  %v1337_v36 = vmax.f32 %v1088_v51, %v1319_v29  ;;  %v1030_v7 = vpop.f32.mrb[56].mxu0  ;;  %v2581_v55 = vmax.f32 %v2370_v2, %v2374_v8 }
 0x155   : > { %v1071_v25 = vmul.f32 %v2240_v43, %v1030_v7  ;;  %v1261_v26 = vpop.f32.mrb[56].mxu1  ;;  %v1891_v24 = vpop.f32.mrb[57].mxu0 }
 0x156   : > { %v1355_v28 = vmax.f32 %v857_v20, %v1337_v36  ;;  %v1302_v32 = vmul.f32 %v2240_v43, %v1261_v26  ;;  %v1931_v3 = vpop.f32.mrb[57].mxu1  ;;  %v1033_v12 = vpop.f32.mrb[58].mxu0  ;;  %v1372_v22 = vmax.f32 %v1354_v0, 0.0  ;;  %v2582_v24 = vmax.f32 %v2378_v21, %v2383_v23 }
 0x157   : > { %v1089_v49 = vadd.f32 %v2245_v44, %v1071_v25  ;;  %v1072_v4 = vmul.f32 %v2240_v43, %v1033_v12  ;;  %v1264_v9 = vpop.f32.mrb[58].mxu1  ;;  %v1892_v18 = vpop.f32.mrb[59].mxu0 }
 0x158   : > { %v1373_v52 = vmax.f32 %v1355_v28, 0.0  ;;  %v1320_v31 = vadd.f32 %v2245_v44, %v1302_v32  ;;  %v1303_v33 = vmul.f32 %v2240_v43, %v1264_v9  ;;  %v1932_v34 = vpop.f32.mrb[59].mxu1 }
 0x159   : > { %v1090_v17 = vadd.f32 %v2245_v44, %v1072_v4 }
 0x15a   : > { %v1711_v19 = vpack.c.bf16 %v1373_v52, %v1372_v22  ;;  %v1338_v20 = vmax.f32 %v1089_v49, %v1320_v31  ;;  %v1321_v6 = vadd.f32 %v2245_v44, %v1303_v33 }
 0x15c   : > { %1736 = vst [vmem:[%s2451_s28 + $0x20] sm:$0xff] %v1711_v19   ;;  %v1356_v14 = vmax.f32 %v2579_v10, %v1338_v20  ;;  %v1339_v56 = vmax.f32 %v1090_v17, %v1321_v6  ;;  %v1038_v60 = vpop.f32.mrb[60].mxu0  ;;  %v2583_v17 = vmax.f32 %v2390_v40, %v2394_v58 }
 0x15d   : > { %v1073_v47 = vmul.f32 %v2240_v43, %v1038_v60  ;;  %v1269_v39 = vpop.f32.mrb[60].mxu1  ;;  %v1895_v63 = vpop.f32.mrb[61].mxu0  ;;  %v2584_v60 = vmax.f32 %v2398_v1, %v2403_v5 }
 0x15e   : > { %v1357_v15 = vmax.f32 %v2580_v13, %v1339_v56  ;;  %v1304_v16 = vmul.f32 %v2240_v43, %v1269_v39  ;;  %v1935_v45 = vpop.f32.mrb[61].mxu1  ;;  %v1041_v42 = vpop.f32.mrb[62].mxu0  ;;  %v1374_v35 = vmax.f32 %v1356_v14, 0.0 }
 0x15f   : > { %v1091_v48 = vadd.f32 %v2245_v44, %v1073_v47  ;;  %v1074_v30 = vmul.f32 %v2240_v43, %v1041_v42  ;;  %v1272_v38 = vpop.f32.mrb[62].mxu1  ;;  %v1896_v53 = vpop.f32.mrb[63].mxu0 }
 0x160   : > { %v1375_v59 = vmax.f32 %v1357_v15, 0.0  ;;  %v1322_v61 = vadd.f32 %v2245_v44, %v1304_v16  ;;  %v1305_v62 = vmul.f32 %v2240_v43, %v1272_v38  ;;  %v1936_v50 = vpop.f32.mrb[63].mxu1 }
 0x161   : > { %v1092_v41 = vadd.f32 %v2245_v44, %v1074_v30  ;;  %v2586_v50 = vmax.f32 %v2418_v11, %v2423_v27 }
 0x162   : > { %v1716_v46 = vpack.c.bf16 %v1375_v59, %v1374_v35  ;;  %v1340_v51 = vmax.f32 %v1091_v48, %v1322_v61  ;;  %v1323_v54 = vadd.f32 %v2245_v44, %v1305_v62  ;;  %v2585_v59 = vmax.f32 %v2410_v37, %v2414_v57 }
 0x164   : > { %1737 = vst [vmem:[%s2451_s28 + $0x28] sm:$0xff] %v1716_v46   ;;  %v1358_v29 = vmax.f32 %v2581_v55, %v1340_v51  ;;  %v1341_v0 = vmax.f32 %v1092_v41, %v1323_v54  ;;  %v1046_v36 = vpop.f32.mrb[64].mxu0 }
 0x165   : > { %v1075_v7 = vmul.f32 %v2240_v43, %v1046_v36  ;;  %v1277_v25 = vpop.f32.mrb[64].mxu1  ;;  %v1899_v26 = vpop.f32.mrb[65].mxu0 }
 0x166   : > { %v1359_v28 = vmax.f32 %v2582_v24, %v1341_v0  ;;  %v1306_v32 = vmul.f32 %v2240_v43, %v1277_v25  ;;  %v1939_v3 = vpop.f32.mrb[65].mxu1  ;;  %v1049_v12 = vpop.f32.mrb[66].mxu0  ;;  %v1376_v9 = vmax.f32 %v1358_v29, 0.0 }
 0x167   : > { %v1093_v49 = vadd.f32 %v2245_v44, %v1075_v7  ;;  %v1076_v2 = vmul.f32 %v2240_v43, %v1049_v12  ;;  %v1280_v8 = vpop.f32.mrb[66].mxu1  ;;  %v1900_v4 = vpop.f32.mrb[67].mxu0 }
 0x168   : > { %v1377_v18 = vmax.f32 %v1359_v28, 0.0  ;;  %v1324_v22 = vadd.f32 %v2245_v44, %v1306_v32  ;;  %v1307_v52 = vmul.f32 %v2240_v43, %v1280_v8  ;;  %v1940_v31 = vpop.f32.mrb[67].mxu1 }
 0x169   : > { %v1094_v21 = vadd.f32 %v2245_v44, %v1076_v2 }
 0x16a   : > { %v1721_v23 = vpack.c.bf16 %v1377_v18, %v1376_v9  ;;  %v1342_v33 = vmax.f32 %v1093_v49, %v1324_v22  ;;  %v1325_v34 = vadd.f32 %v2245_v44, %v1307_v52 }
 0x16c   : > { %1738 = vst [vmem:[%s2451_s28 + $0x30] sm:$0xff] %v1721_v23   ;;  %v1360_v19 = vmax.f32 %v2583_v17, %v1342_v33  ;;  %v1343_v20 = vmax.f32 %v1094_v21, %v1325_v34  ;;  %v1054_v6 = vpop.f32.mrb[68].mxu0 }
 0x16d   : > { %v1077_v10 = vmul.f32 %v2240_v43, %v1054_v6  ;;  %v1285_v14 = vpop.f32.mrb[68].mxu1  ;;  %v1903_v56 = vpop.f32.mrb[69].mxu0 }
 0x16e   : > { %v1361_v47 = vmax.f32 %v2584_v60, %v1343_v20  ;;  %v1308_v39 = vmul.f32 %v2240_v43, %v1285_v14  ;;  %v1943_v63 = vpop.f32.mrb[69].mxu1  ;;  %v1057_v13 = vpop.f32.mrb[70].mxu0  ;;  %v1378_v45 = vmax.f32 %v1360_v19, 0.0 }
 0x16f   : > { %v1095_v15 = vadd.f32 %v2245_v44, %v1077_v10  ;;  %v1078_v40 = vmul.f32 %v2240_v43, %v1057_v13  ;;  %v1288_v58 = vpop.f32.mrb[70].mxu1  ;;  %v1904_v16 = vpop.f32.mrb[71].mxu0 }
 0x170   : > { %v1379_v42 = vmax.f32 %v1361_v47, 0.0  ;;  %v1326_v48 = vadd.f32 %v2245_v44, %v1308_v39  ;;  %v1309_v30 = vmul.f32 %v2240_v43, %v1288_v58  ;;  %v1944_v1 = vpop.f32.mrb[71].mxu1 }
 0x171   : > { %v1096_v5 = vadd.f32 %v2245_v44, %v1078_v40 }
 0x172   : > { %v1726_v38 = vpack.c.bf16 %v1379_v42, %v1378_v45  ;;  %v1344_v53 = vmax.f32 %v1095_v15, %v1326_v48  ;;  %v1327_v35 = vadd.f32 %v2245_v44, %v1309_v30 }
 0x174   : > { %1739 = vst [vmem:[%s2451_s28 + $0x38] sm:$0xff] %v1726_v38   ;;  %v1362_v61 = vmax.f32 %v2585_v59, %v1344_v53  ;;  %v1345_v62 = vmax.f32 %v1096_v5, %v1327_v35 }
 0x176   : > { %v1363_v41 = vmax.f32 %v2586_v50, %v1345_v62  ;;  %v1380_v46 = vmax.f32 %v1362_v61, 0.0 }
 0x178   : > { %v1381_v51 = vmax.f32 %v1363_v41, 0.0 }
 0x17a   : > { %v1731_v43 = vpack.c.bf16 %v1381_v51, %v1380_v46 }
 0x17c   : > { %1740 = vst [vmem:[%s2451_s28 + $0x40] sm:$0xff] %v1731_v43  }
 0x17d PF: > { %s17_s24 = sadd.s32 1, %s2000_s24  }
 0x17e   : > { %p14_p4 = scmp.ge.s32.totalorder %s17_s24, 4  }
 0x180   :  { %16 = sbr.rel (!%p14_p4) target bundleno = 1 (0x1), region = 87 }

// kernel: digitnet_forward.5
= control target key start
LH: loop header
LB: loop body
LE: loop exit
PB: predicated region body
PF: predicated region fallthrough
CT: control target
= control target key end

     0   :  { %s1965_s24 = smov 0   ;;  %s2450_s0 = inlined_call_operand.vmem [shape: bf16[96,400], index: 0, kind: input, shape index: {}]   ;;  %s2451_s1 = inlined_call_operand.vmem [shape: bf16[96,400], index: 1, kind: input, shape index: {}]   ;;  %s2452_s2 = inlined_call_operand.vmem [shape: bf16[96,400], index: 2, kind: input, shape index: {}]   ;;  %s2453_s3 = inlined_call_operand.vmem [shape: bf16[96,400], index: 3, kind: input, shape index: {}]   ;;  %s2454_s4 = inlined_call_operand.vmem [shape: bf16[400,128], index: 4, kind: input, shape index: {}]   ;;  %s2455_s5 = inlined_call_operand.vmem [shape: f32[1,128], index: 5, kind: input, shape index: {}]   ;;  %s2456_s6 = inlined_call_operand.vmem [shape: f32[1,128], index: 6, kind: input, shape index: {}]   ;;  %s2457_s7 = inlined_call_operand.vmem [shape: bf16[96,128], index: 7, kind: output, shape index: {}]  }
   0x1 LB: > { %s1538_s25 = sadd.s32 4294967295, %s1922_s24   ;;  %p1542_p0 = scmp.ge.s32.totalorder %s1922_s24, 1  ;;  %s1922_s24 = sphi %s1965_s24, %s17_s24  }
   0x2   : > { %p275_p1 = scmp.lt.s32.totalorder %s1922_s24, 3 }
   0x4   : > { %p276_p2 = pnand %p1542_p0, %p275_p1 }
   0x5   : > { %v1976_v0 = vld [vmem:[%s2454_s4 + $0x40] sm:$0xff] (!%p276_p2)   ;;  %v1924_v1 = vmov (!%p276_p2), 0   ;;  %v1994_v4 = vld [vmem:[%s2454_s4 + $0x48] sm:$0xff] (!%p276_p2)   ;;  %v2012_v7 = vld [vmem:[%s2454_s4 + $0x50] sm:$0xff] (!%p276_p2)   ;;  %s326_s19 = smul.u32 (!%p276_p2), 6, %s1538_s25  ;;  %vm632_vm0 = vcmask (!%p276_p2), 130048  }
   0x6   : > { %279 = sbr.rel (%p276_p2) target bundleno = 395 (0x18b), region = 48  ;;  %699 = vmatprep.subr.bf16.mxu1 (!%p276_p2), %v1924_v1  ;;  %v1982_v2 = vld [vmem:[%s2454_s4 + $0x80] sm:$0xff] (!%p276_p2)   ;;  %1674 = vmatprep.subr.bf16.mxu0 (!%p276_p2), %v1976_v0  ;;  %v2001_v5 = vld [vmem:[%s2454_s4 + $0x88] sm:$0xff] (!%p276_p2)   ;;  %v2018_v8 = vld [vmem:[%s2454_s4 + $0x90] sm:$0xff] (!%p276_p2)  }
   0x7   : > { %v1988_v3 = vld [vmem:[%s2454_s4] sm:$0xff] (!%p276_p2)   ;;  %700 = vmatpush1.bf16.msra.mxu1 (!%p276_p2), %v1982_v2  ;;  %v2007_v6 = vld [vmem:[%s2454_s4 + $0x8] sm:$0xff] (!%p276_p2)   ;;  %v2025_v9 = vld [vmem:[%s2454_s4 + $0x10] sm:$0xff] (!%p276_p2)   ;;  %p327_p3 = scmp.lt.s32.totalorder (!%p276_p2), %s326_s19, 11 }
   0x8   : > { %1675 = vmatpush3.bf16.msra.mxu0 (!%p276_p2), %v1988_v3  ;;  %701 = vmatprep.subr.bf16.mxu1 (!%p276_p2), %v1924_v1  ;;  %v2031_v10 = vld [vmem:[%s2454_s4 + $0x58] sm:$0xff] (!%p276_p2)   ;;  %v2050_v13 = vld [vmem:[%s2454_s4 + $0x60] sm:$0xff] (!%p276_p2)   ;;  %v2071_v16 = vld [vmem:[%s2454_s4 + $0x68] sm:$0xff] (!%p276_p2)  }
   0x9   : > { %1676 = vmatprep.subr.bf16.mxu0 (!%p276_p2), %v1994_v4  ;;  %v2037_v11 = vld [vmem:[%s2454_s4 + $0x98] sm:$0xff] (!%p276_p2)   ;;  %v2056_v14 = vld [vmem:[%s2454_s4 + $0xa0] sm:$0xff] (!%p276_p2)   ;;  %v2077_v17 = vld [vmem:[%s2454_s4 + $0xa8] sm:$0xff] (!%p276_p2)  }
   0xa   : > { %v2044_v12 = vld [vmem:[%s2454_s4 + $0x18] sm:$0xff] (!%p276_p2)   ;;  %v2065_v15 = vld [vmem:[%s2454_s4 + $0x20] sm:$0xff] (!%p276_p2)   ;;  %v2087_v18 = vld [vmem:[%s2454_s4 + $0x28] sm:$0xff] (!%p276_p2)  }
   0xb   : > { %702 = vmatpush1.bf16.msra.mxu1 (!%p276_p2), %v2001_v5  ;;  %v2093_v19 = vld [vmem:[%s2454_s4 + $0x70] sm:$0xff] (!%p276_p2)   ;;  %v2117_v22 = vld [vmem:[%s2454_s4 + $0x78] sm:$0xff] (!%p276_p2)   ;;  %v2142_v28 = vld [vmem:[%s2454_s4 + $0xc0] sm:$0xff] (!%p276_p2)  }
   0xc   : > { %1677 = vmatpush3.bf16.msra.mxu0 (!%p276_p2), %v2007_v6  ;;  %703 = vmatprep.subr.bf16.mxu1 (!%p276_p2), %v1924_v1  ;;  %v2098_v20 = vld [vmem:[%s2454_s4 + $0xb0] sm:$0xff] (!%p276_p2)   ;;  %v2125_v24 = vld [vmem:[%s2454_s4 + $0xb8] sm:$0xff] (!%p276_p2)  }
   0xd   : > { %1678 = vmatprep.subr.bf16.mxu0 %v2012_v7  ;;  %s2459_s19 = smov (!%p327_p3, %s326_s19), 11  ;;  %v2110_v21 = vld [vmem:[%s2454_s4 + $0x30] sm:$0xff]   ;;  %v2133_v26 = vld [vmem:[%s2454_s4 + $0x38] sm:$0xff]  }
   0xe   : > { %s2080_s16 = sshll.u32 %s2459_s19, 4  ;;  %s1551_s30 = sshll.u32 %s2459_s19, 2 }
   0xf   : > { %704 = vmatpush1.bf16.msra.mxu1 %v2018_v8  ;;  %s2104_s27 = scalar_lea.vmem %s2450_s0, %s2080_s16  ;;  %s2150_s18 = scalar_lea.vmem %s2451_s1, %s2080_s16 }
  0x10   : > { %1679 = vmatpush3.bf16.msra.mxu0 %v2025_v9  ;;  %705 = vmatprep.subr.bf16.mxu1 %v1924_v1  ;;  %v1845_v23 = vld [vmem:[%s2104_s27 + $0x4] ss:$16 sps:$4 sm:$0xff]   ;;  %v1849_v25 = vld [vmem:[%s2104_s27 + $0xc] ss:$16 sps:$4 sm:$0xff]   ;;  %v1843_v27 = vld [vmem:[%s2104_s27] ss:$16 sps:$4 sm:$0xff]   ;;  %s2169_s22 = scalar_lea.vmem %s2452_s2, %s2080_s16  ;;  %s2188_s25 = scalar_lea.vmem %s2453_s3, %s2080_s16 }
  0x11   : > { %1680 = vmatprep.subr.bf16.mxu0 %v2031_v10  ;;  %674 = vmatprep.mubr.bf16.mxu0 %v1845_v23  ;;  %v1850_v29 = vld [vmem:[%s2104_s27 + $0x24] ss:$16 sps:$4 sm:$0xff]   ;;  %v1847_v30 = vld [vmem:[%s2104_s27 + $0x8] ss:$16 sps:$4 sm:$0xff]   ;;  %v1853_v31 = vld [vmem:[%s2104_s27 + $0x2c] ss:$16 sps:$4 sm:$0xff]   ;;  %s2419_s19 = scalar_lea.vmem %s2457_s7, %s1551_s30 }
  0x12   : > { %1589 = vmatprep.mubr.msk.bf16.mxu1 %vm632_vm0, %v1849_v25  ;;  %v1852_v32 = vld [vmem:[%s2104_s27 + $0x20] ss:$16 sps:$4 sm:$0xff]   ;;  %v1856_v33 = vld [vmem:[%s2104_s27 + $0x44] ss:$16 sps:$4 sm:$0xff]   ;;  %v1855_v34 = vld [vmem:[%s2104_s27 + $0x28] ss:$16 sps:$4 sm:$0xff]  }
  0x13   : > { %706 = vmatpush1.bf16.msra.mxu1 %v2037_v11  ;;  %v1859_v35 = vld [vmem:[%s2104_s27 + $0x4c] ss:$16 sps:$4 sm:$0xff]   ;;  %v1858_v36 = vld [vmem:[%s2104_s27 + $0x40] ss:$16 sps:$4 sm:$0xff]   ;;  %v1864_v37 = vld [vmem:[%s2150_s18 + $0x4] ss:$16 sps:$4 sm:$0xff]  }
  0x14   : > { %1681 = vmatpush3.bf16.msra.mxu0 %v2044_v12  ;;  %707 = vmatprep.subr.bf16.mxu1 %v1924_v1  ;;  %v1861_v38 = vld [vmem:[%s2104_s27 + $0x48] ss:$16 sps:$4 sm:$0xff]   ;;  %v1867_v39 = vld [vmem:[%s2150_s18 + $0xc] ss:$16 sps:$4 sm:$0xff]   ;;  %v1862_v40 = vld [vmem:[%s2150_s18] ss:$16 sps:$4 sm:$0xff]  }
  0x15   : > { %1682 = vmatprep.subr.bf16.mxu0 %v2050_v13  ;;  %v1868_v41 = vld [vmem:[%s2150_s18 + $0x24] ss:$16 sps:$4 sm:$0xff]   ;;  %v1865_v42 = vld [vmem:[%s2150_s18 + $0x8] ss:$16 sps:$4 sm:$0xff]   ;;  %v1870_v43 = vld [vmem:[%s2150_s18 + $0x20] ss:$16 sps:$4 sm:$0xff]  }
  0x16   : > { %v1871_v44 = vld [vmem:[%s2150_s18 + $0x2c] ss:$16 sps:$4 sm:$0xff]   ;;  %v1874_v45 = vld [vmem:[%s2150_s18 + $0x44] ss:$16 sps:$4 sm:$0xff]   ;;  %v1873_v46 = vld [vmem:[%s2150_s18 + $0x28] ss:$16 sps:$4 sm:$0xff]  }
  0x17   : > { %708 = vmatpush1.bf16.msra.mxu1 %v2056_v14  ;;  %v1876_v47 = vld [vmem:[%s2150_s18 + $0x40] ss:$16 sps:$4 sm:$0xff]   ;;  %v1877_v48 = vld [vmem:[%s2150_s18 + $0x4c] ss:$16 sps:$4 sm:$0xff]   ;;  %v1882_v49 = vld [vmem:[%s2169_s22 + $0x4] ss:$16 sps:$4 sm:$0xff]  }
  0x18   : > { %1683 = vmatpush3.bf16.msra.mxu0 %v2065_v15  ;;  %709 = vmatprep.subr.bf16.mxu1 %v1924_v1  ;;  %v1879_v50 = vld [vmem:[%s2150_s18 + $0x48] ss:$16 sps:$4 sm:$0xff]   ;;  %v1885_v51 = vld [vmem:[%s2169_s22 + $0xc] ss:$16 sps:$4 sm:$0xff]   ;;  %v1880_v52 = vld [vmem:[%s2169_s22] ss:$16 sps:$4 sm:$0xff]  }
  0x19   : > { %1684 = vmatprep.subr.bf16.mxu0 %v2071_v16  ;;  %v1886_v53 = vld [vmem:[%s2169_s22 + $0x24] ss:$16 sps:$4 sm:$0xff]   ;;  %v1888_v54 = vld [vmem:[%s2169_s22 + $0x20] ss:$16 sps:$4 sm:$0xff]   ;;  %v1883_v56 = vld [vmem:[%s2169_s22 + $0x8] ss:$16 sps:$4 sm:$0xff]  }
  0x1a   : > { %v1892_v55 = vld [vmem:[%s2169_s22 + $0x44] ss:$16 sps:$4 sm:$0xff]   ;;  %v1889_v57 = vld [vmem:[%s2169_s22 + $0x2c] ss:$16 sps:$4 sm:$0xff]   ;;  %v1894_v58 = vld [vmem:[%s2169_s22 + $0x40] ss:$16 sps:$4 sm:$0xff]  }
  0x1b   : > { %710 = vmatpush1.bf16.msra.mxu1 %v2077_v17  ;;  %v1900_v59 = vld [vmem:[%s2188_s25 + $0x4] ss:$16 sps:$4 sm:$0xff]   ;;  %v1891_v60 = vld [vmem:[%s2169_s22 + $0x28] ss:$16 sps:$4 sm:$0xff]   ;;  %v1895_v61 = vld [vmem:[%s2169_s22 + $0x4c] ss:$16 sps:$4 sm:$0xff]  }
  0x1c   : > { %1685 = vmatpush3.bf16.msra.mxu0 %v2087_v18  ;;  %711 = vmatprep.subr.bf16.mxu1 %v1924_v1  ;;  %v1897_v62 = vld [vmem:[%s2169_s22 + $0x48] ss:$16 sps:$4 sm:$0xff]   ;;  %v1903_v63 = vld [vmem:[%s2188_s25 + $0xc] ss:$16 sps:$4 sm:$0xff]  }
  0x1d   : > { %1686 = vmatprep.subr.bf16.mxu0 %v2093_v19 }
  0x1f   : > { %712 = vmatpush1.bf16.msra.mxu1 %v2098_v20 }
  0x20   : > { %1687 = vmatpush3.bf16.msra.mxu0 %v2110_v21  ;;  %713 = vmatprep.subr.bf16.mxu1 %v1924_v1 }
  0x21   : > { %1688 = vmatprep.subr.bf16.mxu0 %v2117_v22 }
  0x23   : > { %714 = vmatpush1.bf16.msra.mxu1 %v2125_v24 }
  0x24   : > { %1689 = vmatpush3.bf16.msra.mxu0 %v2133_v26  ;;  %715 = vmatprep.subr.bf16.mxu1 %v1924_v1 }
  0x25   : > { %1708 = vmatprep.subr.bf16.mxu0 %v1976_v0 }
  0x27   : > { %675 = vmatmul.mubr.bf16.vlgmr.msra.gmra.mrb[0].mxu0 %v1843_v27  ;;  %716 = vmatpush1.bf16.msra.mxu1 %v2142_v28 }
  0x28   : > { %915 = vmatprep.subr.bf16.mxu1 %v1924_v1  ;;  %1709 = vmatpush3.bf16.msra.mxu0 %v1988_v3 }
  0x29   : > { %1710 = vmatprep.subr.bf16.mxu0 %v1994_v4  ;;  %682 = vmatprep.mubr.bf16.mxu0 %v1850_v29 }
  0x2a   : > { %732 = vmatmul.mubr.bf16.vlgmr.msra.gmra.mrb[0].mxu1 %v1847_v30 }
  0x2b   : > { %916 = vmatpush1.bf16.msra.mxu1 %v1982_v2  ;;  %1590 = vmatprep.mubr.msk.bf16.mxu1 %vm632_vm0, %v1853_v31 }
  0x2c   : > { %917 = vmatprep.subr.bf16.mxu1 %v1924_v1  ;;  %1711 = vmatpush3.bf16.msra.mxu0 %v2007_v6 }
  0x2d   : > { %1712 = vmatprep.subr.bf16.mxu0 %v2012_v7 }
  0x2f   : > { %918 = vmatpush1.bf16.msra.mxu1 %v2001_v5  ;;  %683 = vmatmul.mubr.bf16.gmra.mrb[4].mxu0 %v1852_v32 }
  0x30   : > { %919 = vmatprep.subr.bf16.mxu1 %v1924_v1  ;;  %1713 = vmatpush3.bf16.msra.mxu0 %v2025_v9 }
  0x31   : > { %1714 = vmatprep.subr.bf16.mxu0 %v2031_v10  ;;  %690 = vmatprep.mubr.bf16.mxu0 %v1856_v33 }
  0x32   : > { %740 = vmatmul.mubr.bf16.gmra.mrb[4].mxu1 %v1855_v34 }
  0x33   : > { %920 = vmatpush1.bf16.msra.mxu1 %v2018_v8  ;;  %1591 = vmatprep.mubr.msk.bf16.mxu1 %vm632_vm0, %v1859_v35 }
  0x34   : > { %921 = vmatprep.subr.bf16.mxu1 %v1924_v1  ;;  %1715 = vmatpush3.bf16.msra.mxu0 %v2044_v12 }
  0x35   : > { %1716 = vmatprep.subr.bf16.mxu0 %v2050_v13 }
  0x37   : > { %922 = vmatpush1.bf16.msra.mxu1 %v2037_v11  ;;  %691 = vmatmul.mubr.bf16.gmra.mrb[8].mxu0 %v1858_v36 }
  0x38   : > { %923 = vmatprep.subr.bf16.mxu1 %v1924_v1  ;;  %1717 = vmatpush3.bf16.msra.mxu0 %v2065_v15 }
  0x39   : > { %1718 = vmatprep.subr.bf16.mxu0 %v2071_v16  ;;  %890 = vmatprep.mubr.bf16.mxu0 %v1864_v37 }
  0x3a   : > { %748 = vmatmul.mubr.bf16.gmra.mrb[8].mxu1 %v1861_v38 }
  0x3b   : > { %924 = vmatpush1.bf16.msra.mxu1 %v2056_v14  ;;  %1606 = vmatprep.mubr.msk.bf16.mxu1 %vm632_vm0, %v1867_v39 }
  0x3c   : > { %925 = vmatprep.subr.bf16.mxu1 %v1924_v1  ;;  %1719 = vmatpush3.bf16.msra.mxu0 %v2087_v18 }
  0x3d   : > { %1720 = vmatprep.subr.bf16.mxu0 %v2093_v19 }
  0x3f   : > { %926 = vmatpush1.bf16.msra.mxu1 %v2077_v17 }
  0x40   : > { %927 = vmatprep.subr.bf16.mxu1 %v1924_v1  ;;  %1721 = vmatpush3.bf16.msra.mxu0 %v2110_v21 }
  0x41   : > { %1722 = vmatprep.subr.bf16.mxu0 %v2117_v22 }
  0x43   : > { %928 = vmatpush1.bf16.msra.mxu1 %v2098_v20 }
  0x44   : > { %929 = vmatprep.subr.bf16.mxu1 %v1924_v1  ;;  %1723 = vmatpush3.bf16.msra.mxu0 %v2133_v26 }
  0x45   : > { %1742 = vmatprep.subr.bf16.mxu0 %v1976_v0 }
  0x47   : > { %930 = vmatpush1.bf16.msra.mxu1 %v2125_v24  ;;  %891 = vmatmul.mubr.bf16.vlgmr.msra.gmra.mrb[12].mxu0 %v1862_v40 }
  0x48   : > { %931 = vmatprep.subr.bf16.mxu1 %v1924_v1  ;;  %1743 = vmatpush3.bf16.msra.mxu0 %v1988_v3 }
  0x49   : > { %898 = vmatprep.mubr.bf16.mxu0 %v1868_v41  ;;  %1744 = vmatprep.subr.bf16.mxu0 %v1994_v4 }
  0x4b   : > { %932 = vmatpush1.bf16.msra.mxu1 %v2142_v28 }
  0x4c   : > { %1125 = vmatprep.subr.bf16.mxu1 %v1924_v1  ;;  %1745 = vmatpush3.bf16.msra.mxu0 %v2007_v6 }
  0x4d   : > { %1746 = vmatprep.subr.bf16.mxu0 %v2012_v7 }
  0x4e   : > { %948 = vmatmul.mubr.bf16.vlgmr.msra.gmra.mrb[12].mxu1 %v1865_v42 }
  0x4f   : > { %1126 = vmatpush1.bf16.msra.mxu1 %v1982_v2  ;;  %899 = vmatmul.mubr.bf16.gmra.mrb[16].mxu0 %v1870_v43 }
  0x50   : > { %1127 = vmatprep.subr.bf16.mxu1 %v1924_v1  ;;  %1607 = vmatprep.mubr.msk.bf16.mxu1 %vm632_vm0, %v1871_v44 }
  0x51   : > { %1747 = vmatpush3.bf16.msra.mxu0 %v2025_v9  ;;  %906 = vmatprep.mubr.bf16.mxu0 %v1874_v45 }
  0x52   : > { %1748 = vmatprep.subr.bf16.mxu0 %v2031_v10 }
  0x53   : > { %1128 = vmatpush1.bf16.msra.mxu1 %v2001_v5 }
  0x54   : > { %1129 = vmatprep.subr.bf16.mxu1 %v1924_v1 }
  0x55   : > { %1749 = vmatpush3.bf16.msra.mxu0 %v2044_v12 }
  0x56   : > { %956 = vmatmul.mubr.bf16.gmra.mrb[16].mxu1 %v1873_v46  ;;  %1750 = vmatprep.subr.bf16.mxu0 %v2050_v13 }
  0x57   : > { %1130 = vmatpush1.bf16.msra.mxu1 %v2018_v8  ;;  %907 = vmatmul.mubr.bf16.gmra.mrb[20].mxu0 %v1876_v47 }
  0x58   : > { %1131 = vmatprep.subr.bf16.mxu1 %v1924_v1  ;;  %1608 = vmatprep.mubr.msk.bf16.mxu1 %vm632_vm0, %v1877_v48 }
  0x59   : > { %1751 = vmatpush3.bf16.msra.mxu0 %v2065_v15  ;;  %1100 = vmatprep.mubr.bf16.mxu0 %v1882_v49 }
  0x5a   : > { %1752 = vmatprep.subr.bf16.mxu0 %v2071_v16 }
  0x5b   : > { %1132 = vmatpush1.bf16.msra.mxu1 %v2037_v11 }
  0x5c   : > { %1133 = vmatprep.subr.bf16.mxu1 %v1924_v1 }
  0x5d   : > { %1753 = vmatpush3.bf16.msra.mxu0 %v2087_v18 }
  0x5e   : > { %964 = vmatmul.mubr.bf16.gmra.mrb[20].mxu1 %v1879_v50  ;;  %1754 = vmatprep.subr.bf16.mxu0 %v2093_v19 }
  0x5f   : > { %1134 = vmatpush1.bf16.msra.mxu1 %v2056_v14  ;;  %1621 = vmatprep.mubr.msk.bf16.mxu1 %vm632_vm0, %v1885_v51 }
  0x60   : > { %1135 = vmatprep.subr.bf16.mxu1 %v1924_v1 }
  0x61   : > { %1755 = vmatpush3.bf16.msra.mxu0 %v2110_v21 }
  0x62   : > { %1756 = vmatprep.subr.bf16.mxu0 %v2117_v22 }
  0x63   : > { %1136 = vmatpush1.bf16.msra.mxu1 %v2077_v17 }
  0x64   : > { %1137 = vmatprep.subr.bf16.mxu1 %v1924_v1 }
  0x65   : > { %1757 = vmatpush3.bf16.msra.mxu0 %v2133_v26 }
  0x66   : > { %1776 = vmatprep.subr.bf16.mxu0 %v1976_v0  ;;  %v1898_v0 = vld [vmem:[%s2188_s25] ss:$16 sps:$4 sm:$0xff]  }
  0x67   : > { %1138 = vmatpush1.bf16.msra.mxu1 %v2098_v20 }
  0x68   : > { %1139 = vmatprep.subr.bf16.mxu1 %v1924_v1  ;;  %1101 = vmatmul.mubr.bf16.vlgmr.msra.gmra.mrb[24].mxu0 %v1880_v52  ;;  %v2326_v52 = vld [vmem:[%s2455_s5] ss:$0 sm:$0xff] }
  0x69   : > { %1777 = vmatpush3.bf16.msra.mxu0 %v1988_v3  ;;  %1108 = vmatprep.mubr.bf16.mxu0 %v1886_v53  ;;  %v1906_v3 = vld [vmem:[%s2188_s25 + $0x20] ss:$16 sps:$4 sm:$0xff]  }
  0x6a   : > { %1778 = vmatprep.subr.bf16.mxu0 %v1994_v4  ;;  %v1910_v4 = vld [vmem:[%s2188_s25 + $0x44] ss:$16 sps:$4 sm:$0xff]  }
  0x6b   : > { %1140 = vmatpush1.bf16.msra.mxu1 %v2125_v24 }
  0x6c   : > { %1141 = vmatprep.subr.bf16.mxu1 %v1924_v1 }
  0x6d   : > { %1779 = vmatpush3.bf16.msra.mxu0 %v2007_v6  ;;  %v1907_v6 = vld [vmem:[%s2188_s25 + $0x2c] ss:$16 sps:$4 sm:$0xff]  }
  0x6e   : > { %1780 = vmatprep.subr.bf16.mxu0 %v2012_v7  ;;  %v1912_v7 = vld [vmem:[%s2188_s25 + $0x40] ss:$16 sps:$4 sm:$0xff]  }
  0x6f   : > { %1142 = vmatpush1.bf16.msra.mxu1 %v2142_v28 }
  0x70   : > { %1329 = vmatprep.subr.bf16.mxu1 %v1924_v1  ;;  %1109 = vmatmul.mubr.bf16.gmra.mrb[28].mxu0 %v1888_v54 }
  0x71   : > { %1781 = vmatpush3.bf16.msra.mxu0 %v2025_v9  ;;  %1116 = vmatprep.mubr.bf16.mxu0 %v1892_v55  ;;  %v1913_v9 = vld [vmem:[%s2188_s25 + $0x4c] ss:$16 sps:$4 sm:$0xff]  }
  0x72   : > { %1158 = vmatmul.mubr.bf16.vlgmr.msra.gmra.mrb[24].mxu1 %v1883_v56  ;;  %1782 = vmatprep.subr.bf16.mxu0 %v2031_v10  ;;  %v1915_v10 = vld [vmem:[%s2188_s25 + $0x48] ss:$16 sps:$4 sm:$0xff]  }
  0x73   : > { %1330 = vmatpush1.bf16.msra.mxu1 %v1982_v2  ;;  %1622 = vmatprep.mubr.msk.bf16.mxu1 %vm632_vm0, %v1889_v57  ;;  %v1904_v2 = vld [vmem:[%s2188_s25 + $0x24] ss:$16 sps:$4 sm:$0xff]  }
  0x74   : > { %1331 = vmatprep.subr.bf16.mxu1 %v1924_v1 }
  0x75   : > { %1783 = vmatpush3.bf16.msra.mxu0 %v2044_v12 }
  0x76   : > { %1784 = vmatprep.subr.bf16.mxu0 %v2050_v13 }
  0x77   : > { %1332 = vmatpush1.bf16.msra.mxu1 %v2001_v5  ;;  %v1901_v5 = vld [vmem:[%s2188_s25 + $0x8] ss:$16 sps:$4 sm:$0xff]  }
  0x78   : > { %1333 = vmatprep.subr.bf16.mxu1 %v1924_v1  ;;  %1117 = vmatmul.mubr.bf16.gmra.mrb[32].mxu0 %v1894_v58  ;;  %v2332_v58 = vld [vmem:[%s2456_s6] ss:$0 sm:$0xff] }
  0x79   : > { %1785 = vmatpush3.bf16.msra.mxu0 %v2065_v15  ;;  %1304 = vmatprep.mubr.bf16.mxu0 %v1900_v59 }
  0x7a   : > { %1166 = vmatmul.mubr.bf16.gmra.mrb[28].mxu1 %v1891_v60  ;;  %1786 = vmatprep.subr.bf16.mxu0 %v2071_v16 }
  0x7b   : > { %1334 = vmatpush1.bf16.msra.mxu1 %v2018_v8  ;;  %1623 = vmatprep.mubr.msk.bf16.mxu1 %vm632_vm0, %v1895_v61  ;;  %v1909_v8 = vld [vmem:[%s2188_s25 + $0x28] ss:$16 sps:$4 sm:$0xff]  }
  0x7c   : > { %1335 = vmatprep.subr.bf16.mxu1 %v1924_v1 }
  0x7d   : > { %1787 = vmatpush3.bf16.msra.mxu0 %v2087_v18 }
  0x7e   : > { %1788 = vmatprep.subr.bf16.mxu0 %v2093_v19 }
  0x7f   : > { %1336 = vmatpush1.bf16.msra.mxu1 %v2037_v11 }
  0x80   : > { %1337 = vmatprep.subr.bf16.mxu1 %v1924_v1 }
  0x81   : > { %1789 = vmatpush3.bf16.msra.mxu0 %v2110_v21 }
  0x82   : > { %1174 = vmatmul.mubr.bf16.gmra.mrb[32].mxu1 %v1897_v62  ;;  %1790 = vmatprep.subr.bf16.mxu0 %v2117_v22 }
  0x83   : > { %1338 = vmatpush1.bf16.msra.mxu1 %v2056_v14  ;;  %1636 = vmatprep.mubr.msk.bf16.mxu1 %vm632_vm0, %v1903_v63 }
  0x84   : > { %1339 = vmatprep.subr.bf16.mxu1 %v1924_v1 }
  0x85   : > { %1791 = vmatpush3.bf16.msra.mxu0 %v2133_v26 }
  0x87   : > { %1340 = vmatpush1.bf16.msra.mxu1 %v2077_v17 }
  0x88   : > { %1341 = vmatprep.subr.bf16.mxu1 %v1924_v1  ;;  %1305 = vmatmul.mubr.bf16.vlgmr.msra.gmra.mrb[36].mxu0 %v1898_v0 }
  0x89   : > { %1312 = vmatprep.mubr.bf16.mxu0 %v1904_v2 }
  0x8b   : > { %1342 = vmatpush1.bf16.msra.mxu1 %v2098_v20 }
  0x8c   : > { %1343 = vmatprep.subr.bf16.mxu1 %v1924_v1 }
  0x8f   : > { %1344 = vmatpush1.bf16.msra.mxu1 %v2125_v24 }
  0x90   : > { %1345 = vmatprep.subr.bf16.mxu1 %v1924_v1  ;;  %1313 = vmatmul.mubr.bf16.gmra.mrb[40].mxu0 %v1906_v3 }
  0x91   : > { %1320 = vmatprep.mubr.bf16.mxu0 %v1910_v4 }
  0x93   : > { %1346 = vmatpush1.bf16.msra.mxu1 %v2142_v28 }
  0x96   : > { %1362 = vmatmul.mubr.bf16.vlgmr.msra.gmra.mrb[36].mxu1 %v1901_v5 }
  0x97   : > { %1637 = vmatprep.mubr.msk.bf16.mxu1 %vm632_vm0, %v1907_v6 }
  0x98   : > { %1321 = vmatmul.mubr.bf16.gmra.mrb[44].mxu0 %v1912_v7 }
  0x9e   : > { %1370 = vmatmul.mubr.bf16.gmra.mrb[40].mxu1 %v1909_v8 }
  0x9f   : > { %1638 = vmatprep.mubr.msk.bf16.mxu1 %vm632_vm0, %v1913_v9 }
  0xa6   : > { %1378 = vmatmul.mubr.bf16.gmra.mrb[44].mxu1 %v1915_v10 }
  0xfa   : > { %v1690_v11 = vpop.f32.mrb[0].mxu0 }
  0xfb   : > { %v1691_v1 = vpop.f32.mrb[1].mxu0 }
  0xfc   : > { %v1692_v12 = vadd.f32 %v1691_v1, %v1690_v11  ;;  %v1693_v13 = vpop.f32.mrb[2].mxu0 }
  0xfd   : > { %v1694_v14 = vpop.f32.mrb[3].mxu0  ;;  %v733_v15 = vpop.f32.mrb[0].mxu1 }
  0xfe   : > { %v1695_v16 = vadd.f32 %v1694_v14, %v1693_v13  ;;  %v734_v17 = vadd.f32 %v1692_v12, %v733_v15  ;;  %v735_v18 = vpop.f32.mrb[1].mxu1 }
  0xff   : > { %v736_v19 = vpop.f32.mrb[2].mxu1 }
 0x100   : > { %v737_v20 = vadd.f32 %v1695_v16, %v736_v19  ;;  %v738_v21 = vpop.f32.mrb[3].mxu1  ;;  %v762_v54 = vmul.f32 %v2326_v52, %v734_v17 }
 0x102   : > { %v1696_v22 = vpop.f32.mrb[4].mxu0  ;;  %v763_v61 = vmul.f32 %v2326_v52, %v737_v20  ;;  %v2337_v5 = vadd.f32 %v2332_v58, %v762_v54 }
 0x103   : > { %v1697_v23 = vpop.f32.mrb[5].mxu0 }
 0x104   : > { %v1698_v24 = vadd.f32 %v1697_v23, %v1696_v22  ;;  %v1699_v25 = vpop.f32.mrb[6].mxu0  ;;  %v2344_v9 = vadd.f32 %v2332_v58, %v763_v61 }
 0x105   : > { %v741_v26 = vpop.f32.mrb[4].mxu1  ;;  %v1700_v27 = vpop.f32.mrb[7].mxu0 }
 0x106   : > { %v742_v28 = vadd.f32 %v1698_v24, %v741_v26  ;;  %v1701_v29 = vadd.f32 %v1700_v27, %v1699_v25  ;;  %v743_v30 = vpop.f32.mrb[5].mxu1 }
 0x107   : > { %v744_v31 = vpop.f32.mrb[6].mxu1 }
 0x108   : > { %v745_v32 = vadd.f32 %v1701_v29, %v744_v31  ;;  %v746_v33 = vpop.f32.mrb[7].mxu1  ;;  %v764_v12 = vmul.f32 %v2326_v52, %v742_v28 }
 0x10a   : > { %v1702_v34 = vpop.f32.mrb[8].mxu0  ;;  %v765_v19 = vmul.f32 %v2326_v52, %v745_v32  ;;  %v2357_v26 = vadd.f32 %v2332_v58, %v764_v12 }
 0x10b   : > { %v1703_v35 = vpop.f32.mrb[9].mxu0 }
 0x10c   : > { %v1704_v36 = vadd.f32 %v1703_v35, %v1702_v34  ;;  %v1705_v37 = vpop.f32.mrb[10].mxu0  ;;  %v2364_v30 = vadd.f32 %v2332_v58, %v765_v19 }
 0x10d   : > { %v749_v38 = vpop.f32.mrb[8].mxu1  ;;  %v1706_v39 = vpop.f32.mrb[11].mxu0 }
 0x10e   : > { %v750_v40 = vadd.f32 %v1704_v36, %v749_v38  ;;  %v1707_v41 = vadd.f32 %v1706_v39, %v1705_v37  ;;  %v751_v42 = vpop.f32.mrb[9].mxu1 }
 0x10f   : > { %v752_v43 = vpop.f32.mrb[10].mxu1 }
 0x110   : > { %v753_v44 = vadd.f32 %v1707_v41, %v752_v43  ;;  %v754_v45 = vpop.f32.mrb[11].mxu1  ;;  %v766_v34 = vmul.f32 %v2326_v52, %v750_v40 }
 0x112   : > { %v767_v39 = vmul.f32 %v2326_v52, %v753_v44  ;;  %v2377_v45 = vadd.f32 %v2332_v58, %v766_v34 }
 0x11a   : > { %v1724_v46 = vpop.f32.mrb[12].mxu0 }
 0x11b   : > { %v1725_v47 = vpop.f32.mrb[13].mxu0 }
 0x11c   : > { %v1726_v48 = vadd.f32 %v1725_v47, %v1724_v46  ;;  %v1727_v49 = vpop.f32.mrb[14].mxu0  ;;  %v2384_v47 = vadd.f32 %v2332_v58, %v767_v39 }
 0x11d   : > { %v1728_v50 = vpop.f32.mrb[15].mxu0 }
 0x11e   : > { %v1729_v51 = vadd.f32 %v1728_v50, %v1727_v49 }
 0x121   : > { %v949_v53 = vpop.f32.mrb[12].mxu1 }
 0x122   : > { %v950_v55 = vadd.f32 %v1726_v48, %v949_v53  ;;  %v951_v56 = vpop.f32.mrb[13].mxu1  ;;  %v1730_v57 = vpop.f32.mrb[16].mxu0 }
 0x123   : > { %v952_v59 = vpop.f32.mrb[14].mxu1  ;;  %v1731_v60 = vpop.f32.mrb[17].mxu0 }
 0x124   : > { %v972_v62 = vmul.f32 %v2326_v52, %v950_v55  ;;  %v953_v63 = vadd.f32 %v1729_v51, %v952_v59  ;;  %v954_v0 = vpop.f32.mrb[15].mxu1  ;;  %v1732_v2 = vadd.f32 %v1731_v60, %v1730_v57  ;;  %v1733_v3 = vpop.f32.mrb[18].mxu0 }
 0x125   : > { %v1734_v4 = vpop.f32.mrb[19].mxu0 }
 0x126   : > { %v2340_v6 = vadd.f32 %v2332_v58, %v972_v62  ;;  %v973_v7 = vmul.f32 %v2326_v52, %v953_v63  ;;  %v1735_v8 = vadd.f32 %v1734_v4, %v1733_v3 }
 0x128   : > { %v984_v10 = vmax.f32 %v2337_v5, %v2340_v6  ;;  %v2349_v11 = vadd.f32 %v2332_v58, %v973_v7 }
 0x129   : > { %v957_v1 = vpop.f32.mrb[16].mxu1 }
 0x12a   : > { %v985_v13 = vmax.f32 %v2344_v9, %v2349_v11  ;;  %v958_v14 = vadd.f32 %v1732_v2, %v957_v1  ;;  %v959_v15 = vpop.f32.mrb[17].mxu1  ;;  %v1736_v16 = vpop.f32.mrb[20].mxu0 }
 0x12b   : > { %v960_v17 = vpop.f32.mrb[18].mxu1  ;;  %v1737_v18 = vpop.f32.mrb[21].mxu0 }
 0x12c   : > { %v974_v20 = vmul.f32 %v2326_v52, %v958_v14  ;;  %v961_v21 = vadd.f32 %v1735_v8, %v960_v17  ;;  %v1738_v22 = vadd.f32 %v1737_v18, %v1736_v16  ;;  %v1739_v23 = vpop.f32.mrb[22].mxu0  ;;  %v962_v24 = vpop.f32.mrb[19].mxu1 }
 0x12d   : > { %v1740_v25 = vpop.f32.mrb[23].mxu0 }
 0x12e   : > { %v2360_v27 = vadd.f32 %v2332_v58, %v974_v20  ;;  %v975_v28 = vmul.f32 %v2326_v52, %v961_v21  ;;  %v1741_v29 = vadd.f32 %v1740_v25, %v1739_v23 }
 0x130   : > { %v986_v31 = vmax.f32 %v2357_v26, %v2360_v27  ;;  %v2369_v32 = vadd.f32 %v2332_v58, %v975_v28 }
 0x131   : > { %v965_v33 = vpop.f32.mrb[20].mxu1 }
 0x132   : > { %v987_v35 = vmax.f32 %v2364_v30, %v2369_v32  ;;  %v966_v36 = vadd.f32 %v1738_v22, %v965_v33  ;;  %v967_v37 = vpop.f32.mrb[21].mxu1 }
 0x133   : > { %v968_v38 = vpop.f32.mrb[22].mxu1 }
 0x134   : > { %v976_v41 = vmul.f32 %v2326_v52, %v966_v36  ;;  %v969_v42 = vadd.f32 %v1741_v29, %v968_v38  ;;  %v970_v43 = vpop.f32.mrb[23].mxu1 }
 0x136   : > { %v2380_v46 = vadd.f32 %v2332_v58, %v976_v41  ;;  %v977_v40 = vmul.f32 %v2326_v52, %v969_v42 }
 0x138   : > { %v988_v48 = vmax.f32 %v2377_v45, %v2380_v46  ;;  %v2389_v44 = vadd.f32 %v2332_v58, %v977_v40 }
 0x13a   : > { %v989_v49 = vmax.f32 %v2384_v47, %v2389_v44 }
 0x13b   : > { %v1758_v50 = vpop.f32.mrb[24].mxu0 }
 0x13c   : > { %v1759_v51 = vpop.f32.mrb[25].mxu0 }
 0x13d   : > { %v1760_v53 = vadd.f32 %v1759_v51, %v1758_v50  ;;  %v1761_v54 = vpop.f32.mrb[26].mxu0 }
 0x13e   : > { %v1762_v55 = vpop.f32.mrb[27].mxu0 }
 0x13f   : > { %v1763_v56 = vadd.f32 %v1762_v55, %v1761_v54 }
 0x143   : > { %v1764_v57 = vpop.f32.mrb[28].mxu0 }
 0x144   : > { %v1765_v59 = vpop.f32.mrb[29].mxu0 }
 0x145   : > { %v1159_v60 = vpop.f32.mrb[24].mxu1  ;;  %v1766_v61 = vadd.f32 %v1765_v59, %v1764_v57  ;;  %v1767_v62 = vpop.f32.mrb[30].mxu0 }
 0x146   : > { %v1160_v63 = vadd.f32 %v1760_v53, %v1159_v60  ;;  %v1161_v0 = vpop.f32.mrb[25].mxu1  ;;  %v1768_v2 = vpop.f32.mrb[31].mxu0 }
 0x147   : > { %v1162_v3 = vpop.f32.mrb[26].mxu1  ;;  %v1769_v4 = vadd.f32 %v1768_v2, %v1767_v62 }
 0x148   : > { %v1163_v7 = vadd.f32 %v1763_v56, %v1162_v3  ;;  %v1164_v8 = vpop.f32.mrb[27].mxu1  ;;  %v1182_v56 = vmul.f32 %v2326_v52, %v1160_v63 }
 0x14a   : > { %v1183_v62 = vmul.f32 %v2326_v52, %v1163_v7 }
 0x14b   : > { %v1770_v1 = vpop.f32.mrb[32].mxu0 }
 0x14c   : > { %v1771_v12 = vpop.f32.mrb[33].mxu0 }
 0x14d   : > { %v1167_v14 = vpop.f32.mrb[28].mxu1  ;;  %v1772_v15 = vadd.f32 %v1771_v12, %v1770_v1  ;;  %v1773_v16 = vpop.f32.mrb[34].mxu0  ;;  %v1188_v12 = vadd.f32 %v2332_v58, %v1182_v56 }
 0x14e   : > { %v1168_v17 = vadd.f32 %v1766_v61, %v1167_v14  ;;  %v1169_v18 = vpop.f32.mrb[29].mxu1  ;;  %v1774_v19 = vpop.f32.mrb[35].mxu0 }
 0x14f   : > { %v1170_v20 = vpop.f32.mrb[30].mxu1  ;;  %v1775_v21 = vadd.f32 %v1774_v19, %v1773_v16  ;;  %v1189_v18 = vadd.f32 %v2332_v58, %v1183_v62 }
 0x150   : > { %v1171_v22 = vadd.f32 %v1769_v4, %v1170_v20  ;;  %v1172_v23 = vpop.f32.mrb[31].mxu1  ;;  %v1184_v20 = vmul.f32 %v2326_v52, %v1168_v17 }
 0x155   : > { %v1175_v24 = vpop.f32.mrb[32].mxu1 }
 0x156   : > { %v1176_v25 = vadd.f32 %v1772_v15, %v1175_v24  ;;  %v1177_v28 = vpop.f32.mrb[33].mxu1 }
 0x157   : > { %v1178_v29 = vpop.f32.mrb[34].mxu1 }
 0x158   : > { %v2393_v33 = vadd.f32 %v1775_v21, %v1178_v29  ;;  %v1180_v34 = vpop.f32.mrb[35].mxu1 }
 0x15a   : > { %v1187_v56 = vmul.f32 %v2326_v52, %v2393_v33 }
 0x15b   : > { %v1792_v36 = vpop.f32.mrb[36].mxu0 }
 0x15c   : > { %v1793_v37 = vpop.f32.mrb[37].mxu0 }
 0x15d   : > { %v1794_v38 = vadd.f32 %v1793_v37, %v1792_v36  ;;  %v1795_v39 = vpop.f32.mrb[38].mxu0  ;;  %v1185_v36 = vmul.f32 %v2326_v52, %v1171_v22 }
 0x15e   : > { %v1796_v41 = vpop.f32.mrb[39].mxu0 }
 0x15f   : > { %v1797_v42 = vadd.f32 %v1796_v41, %v1795_v39  ;;  %v1190_v41 = vadd.f32 %v2332_v58, %v1184_v20  ;;  %v1191_v9 = vadd.f32 %v2332_v58, %v1185_v36 }
 0x163   : > { %v1798_v43 = vpop.f32.mrb[40].mxu0 }
 0x164   : > { %v1799_v40 = vpop.f32.mrb[41].mxu0 }
 0x165   : > { %v1800_v50 = vadd.f32 %v1799_v40, %v1798_v43  ;;  %v1801_v51 = vpop.f32.mrb[42].mxu0  ;;  %v1186_v43 = vmul.f32 %v2326_v52, %v1176_v25 }
 0x166   : > { %v1802_v53 = vpop.f32.mrb[43].mxu0 }
 0x167   : > { %v1803_v54 = vadd.f32 %v1802_v53, %v1801_v51 }
 0x169   : > { %v1363_v55 = vpop.f32.mrb[36].mxu1 }
 0x16a   : > { %v1364_v57 = vadd.f32 %v1794_v38, %v1363_v55  ;;  %v1365_v59 = vpop.f32.mrb[37].mxu1 }
 0x16b   : > { %v1366_v60 = vpop.f32.mrb[38].mxu1  ;;  %v1804_v61 = vpop.f32.mrb[44].mxu0 }
 0x16c   : > { %v1386_v0 = vmul.f32 %v2326_v52, %v1364_v57  ;;  %v1367_v2 = vadd.f32 %v1797_v42, %v1366_v60  ;;  %v1368_v3 = vpop.f32.mrb[39].mxu1  ;;  %v1805_v4 = vpop.f32.mrb[45].mxu0 }
 0x16d   : > { %v1806_v8 = vadd.f32 %v1805_v4, %v1804_v61  ;;  %v1807_v1 = vpop.f32.mrb[46].mxu0  ;;  %v1192_v61 = vadd.f32 %v2332_v58, %v1186_v43 }
 0x16e   : > { %v1392_v14 = vadd.f32 %v2332_v58, %v1386_v0  ;;  %v1387_v63 = vmul.f32 %v2326_v52, %v1367_v2  ;;  %v1808_v15 = vpop.f32.mrb[47].mxu0  ;;  %v1193_v0 = vadd.f32 %v2332_v58, %v1187_v56 }
 0x16f   : > { %v1809_v16 = vadd.f32 %v1808_v15, %v1807_v1 }
 0x170   : > { %v1398_v19 = vmax.f32 %v1188_v12, %v1392_v14  ;;  %v1393_v7 = vadd.f32 %v2332_v58, %v1387_v63 }
 0x171   : > { %v1371_v21 = vpop.f32.mrb[40].mxu1 }
 0x172   : > { %v1404_v23 = vmax.f32 %v984_v10, %v1398_v19  ;;  %v1399_v24 = vmax.f32 %v1189_v18, %v1393_v7  ;;  %v1372_v28 = vadd.f32 %v1800_v50, %v1371_v21  ;;  %v1373_v29 = vpop.f32.mrb[41].mxu1 }
 0x173   : > { %v1374_v34 = vpop.f32.mrb[42].mxu1 }
 0x174   : > { %v1405_v37 = vmax.f32 %v985_v13, %v1399_v24  ;;  %v1388_v38 = vmul.f32 %v2326_v52, %v1372_v28  ;;  %v1375_v39 = vadd.f32 %v1803_v54, %v1374_v34  ;;  %v1376_v17 = vpop.f32.mrb[43].mxu1  ;;  %v1410_v42 = vmax.f32 %v1404_v23, 0.0 }
 0x176   : > { %v1411_v5 = vmax.f32 %v1405_v37, 0.0  ;;  %v1394_v6 = vadd.f32 %v2332_v58, %v1388_v38  ;;  %v1389_v10 = vmul.f32 %v2326_v52, %v1375_v39 }
 0x178   : > { %v1660_v11 = vpack.c.bf16 %v1411_v5, %v1410_v42  ;;  %v1400_v13 = vmax.f32 %v1190_v41, %v1394_v6  ;;  %v1395_v22 = vadd.f32 %v2332_v58, %v1389_v10 }
 0x179   : > { %v1379_v40 = vpop.f32.mrb[44].mxu1 }
 0x17a   : > { %1661 = vst [vmem:[%s2419_s19] sm:$0xff] %v1660_v11   ;;  %v1406_v50 = vmax.f32 %v986_v31, %v1400_v13  ;;  %v1401_v51 = vmax.f32 %v1191_v9, %v1395_v22  ;;  %v1380_v53 = vadd.f32 %v1806_v8, %v1379_v40  ;;  %v1381_v54 = vpop.f32.mrb[45].mxu1 }
 0x17b   : > { %v1382_v55 = vpop.f32.mrb[46].mxu1 }
 0x17c   : > { %v1407_v57 = vmax.f32 %v987_v35, %v1401_v51  ;;  %v1390_v25 = vmul.f32 %v2326_v52, %v1380_v53  ;;  %v1383_v59 = vadd.f32 %v1809_v16, %v1382_v55  ;;  %v1384_v60 = vpop.f32.mrb[47].mxu1  ;;  %v1412_v26 = vmax.f32 %v1406_v50, 0.0 }
 0x17e   : > { %v1413_v27 = vmax.f32 %v1407_v57, 0.0  ;;  %v1396_v31 = vadd.f32 %v2332_v58, %v1390_v25  ;;  %v1391_v62 = vmul.f32 %v2326_v52, %v1383_v59 }
 0x180   : > { %v1665_v33 = vpack.c.bf16 %v1413_v27, %v1412_v26  ;;  %v1402_v2 = vmax.f32 %v1192_v61, %v1396_v31  ;;  %v1397_v30 = vadd.f32 %v2332_v58, %v1391_v62 }
 0x182   : > { %1672 = vst [vmem:[%s2419_s19 + $0x8] sm:$0xff] %v1665_v33   ;;  %v1408_v32 = vmax.f32 %v988_v48, %v1402_v2  ;;  %v1403_v35 = vmax.f32 %v1193_v0, %v1397_v30 }
 0x184   : > { %v1409_v3 = vmax.f32 %v989_v49, %v1403_v35  ;;  %v1414_v4 = vmax.f32 %v1408_v32, 0.0 }
 0x186   : > { %v1415_v8 = vmax.f32 %v1409_v3, 0.0 }
 0x188   : > { %v1670_v1 = vpack.c.bf16 %v1415_v8, %v1414_v4 }
 0x18a   : > { %1673 = vst [vmem:[%s2419_s19 + $0x10] sm:$0xff] %v1670_v1  }
 0x18b PF: > { %s17_s24 = sadd.s32 1, %s1922_s24  }
 0x18c   : > { %p14_p4 = scmp.ge.s32.totalorder %s17_s24, 4  }
 0x18e   :  { %16 = sbr.rel (!%p14_p4) target bundleno = 1 (0x1), region = 87 }

// kernel: digitnet_forward.7
= control target key start
LH: loop header
LB: loop body
LE: loop exit
PB: predicated region body
PF: predicated region fallthrough
CT: control target
= control target key end

     0   :  { %v623_v33 = vmov 0.0   ;;  %vm624_vm0 = vmmov 0   ;;  %vm341_vm1 = vcmask 523264   ;;  %s777_s1 = inlined_call_operand.vmem [shape: bf16[576,128], index: 1, kind: input, shape index: {}]   ;;  %s778_s0 = inlined_call_operand.vmem [shape: bf16[16,576], index: 0, kind: input, shape index: {}]   ;;  %s779_s2 = inlined_call_operand.vmem [shape: f32[1,128], index: 2, kind: input, shape index: {}]   ;;  %s780_s3 = inlined_call_operand.vmem [shape: f32[16,128], index: 3, kind: output, shape index: {}]  }
   0x1   :  { %v580_v0 = vld [vmem:[%s777_s1 + $0x40] sm:$0xff]   ;;  %v584_v4 = vld [vmem:[%s777_s1 + $0x48] sm:$0xff]   ;;  %v588_v8 = vld [vmem:[%s777_s1 + $0x50] sm:$0xff]  }
   0x2   :  { %v581_v1 = vld [vmem:[%s777_s1] sm:$0xff]   ;;  %517 = vmatprep.subr.bf16.mxu0 %v580_v0  ;;  %v585_v5 = vld [vmem:[%s777_s1 + $0x8] sm:$0xff]   ;;  %v589_v9 = vld [vmem:[%s777_s1 + $0x10] sm:$0xff]  }
   0x3   :  { %v582_v2 = vld [vmem:[%s777_s1 + $0xc0] sm:$0xff]   ;;  %518 = vmatpush3.bf16.msra.mxu0 %v581_v1  ;;  %v586_v6 = vld [vmem:[%s777_s1 + $0xc8] sm:$0xff]   ;;  %v590_v10 = vld [vmem:[%s777_s1 + $0xd0] sm:$0xff]  }
   0x4   :  { %v583_v3 = vld [vmem:[%s777_s1 + $0x80] sm:$0xff]   ;;  %539 = vmatprep.subr.bf16.mxu1 %v582_v2  ;;  %519 = vmatprep.subr.bf16.mxu0 %v584_v4  ;;  %v587_v7 = vld [vmem:[%s777_s1 + $0x88] sm:$0xff]   ;;  %v591_v11 = vld [vmem:[%s777_s1 + $0x90] sm:$0xff]  }
   0x5   :  { %540 = vmatpush3.bf16.msra.mxu1 %v583_v3  ;;  %v592_v12 = vld [vmem:[%s777_s1 + $0x58] sm:$0xff]   ;;  %v596_v16 = vld [vmem:[%s777_s1 + $0x60] sm:$0xff]   ;;  %v600_v20 = vld [vmem:[%s777_s1 + $0x68] sm:$0xff]  }
   0x6   :  { %541 = vmatprep.subr.bf16.mxu1 %v586_v6  ;;  %v593_v13 = vld [vmem:[%s777_s1 + $0x18] sm:$0xff]   ;;  %v597_v17 = vld [vmem:[%s777_s1 + $0x20] sm:$0xff]   ;;  %v601_v21 = vld [vmem:[%s777_s1 + $0x28] sm:$0xff]  }
   0x7   :  { %520 = vmatpush3.bf16.msra.mxu0 %v585_v5  ;;  %v594_v14 = vld [vmem:[%s777_s1 + $0xd8] sm:$0xff]   ;;  %v598_v18 = vld [vmem:[%s777_s1 + $0xe0] sm:$0xff]   ;;  %v602_v22 = vld [vmem:[%s777_s1 + $0xe8] sm:$0xff]  }
   0x8   :  { %521 = vmatprep.subr.bf16.mxu0 %v588_v8  ;;  %v595_v15 = vld [vmem:[%s777_s1 + $0x98] sm:$0xff]   ;;  %v599_v19 = vld [vmem:[%s777_s1 + $0xa0] sm:$0xff]   ;;  %v603_v23 = vld [vmem:[%s777_s1 + $0xa8] sm:$0xff]  }
   0x9   :  { %542 = vmatpush3.bf16.msra.mxu1 %v587_v7  ;;  %v604_v24 = vld [vmem:[%s777_s1 + $0x70] sm:$0xff]   ;;  %v608_v28 = vld [vmem:[%s777_s1 + $0x78] sm:$0xff]   ;;  %v617_v36 = vld [vmem:[%s778_s0 + $0xc] ss:$20 sps:$4 sm:$0xff]  }
   0xa   :  { %543 = vmatprep.subr.bf16.mxu1 %v590_v10  ;;  %v605_v25 = vld [vmem:[%s777_s1 + $0x30] sm:$0xff]   ;;  %v609_v29 = vld [vmem:[%s777_s1 + $0x38] sm:$0xff]   ;;  %v618_v37 = vld [vmem:[%s777_s1 + $0x100] sm:$0xff]   ;;  %418 = vmatprep.mubr.bf16.mxu1 %v617_v36 }
   0xb   :  { %522 = vmatpush3.bf16.msra.mxu0 %v589_v9  ;;  %v606_v26 = vld [vmem:[%s777_s1 + $0xf0] sm:$0xff]   ;;  %v610_v30 = vld [vmem:[%s777_s1 + $0xf8] sm:$0xff]   ;;  %v619_v38 = vld [vmem:[%s777_s1 + $0x108] sm:$0xff]  }
   0xc   :  { %523 = vmatprep.subr.bf16.mxu0 %v592_v12  ;;  %v607_v27 = vld [vmem:[%s777_s1 + $0xb0] sm:$0xff]   ;;  %v613_v32 = vld [vmem:[%s778_s0 + $0x4] ss:$20 sps:$4 sm:$0xff]   ;;  %v615_v35 = vld [vmem:[%s778_s0 + $0x8] ss:$20 sps:$4 sm:$0xff]  }
   0xd   :  { %544 = vmatpush3.bf16.msra.mxu1 %v591_v11  ;;  %v611_v31 = vld [vmem:[%s778_s0] ss:$20 sps:$4 sm:$0xff]   ;;  %v614_v34 = vld [vmem:[%s777_s1 + $0xb8] sm:$0xff]   ;;  %377 = vmatprep.mubr.bf16.mxu0 %v613_v32  ;;  %v622_v41 = vld [vmem:[%s778_s0 + $0x10] ss:$20 sps:$4 sm:$0xff]  }
   0xe   :  { %545 = vmatprep.subr.bf16.mxu1 %v594_v14  ;;  %v620_v39 = vld [vmem:[%s777_s1 + $0x110] sm:$0xff]   ;;  %v621_v40 = vld [vmem:[%s777_s1 + $0x118] sm:$0xff]   ;;  %v474_v43 = vld [vmem:[%s779_s2] ss:$0 sm:$0xff] }
   0xf   :  { %524 = vmatpush3.bf16.msra.mxu0 %v593_v13 }
  0x10   :  { %525 = vmatprep.subr.bf16.mxu0 %v596_v16 }
  0x11   :  { %546 = vmatpush3.bf16.msra.mxu1 %v595_v15 }
  0x12   :  { %547 = vmatprep.subr.bf16.mxu1 %v598_v18 }
  0x13   :  { %526 = vmatpush3.bf16.msra.mxu0 %v597_v17 }
  0x14   :  { %527 = vmatprep.subr.bf16.mxu0 %v600_v20 }
  0x15   :  { %548 = vmatpush3.bf16.msra.mxu1 %v599_v19 }
  0x16   :  { %549 = vmatprep.subr.bf16.mxu1 %v602_v22 }
  0x17   :  { %528 = vmatpush3.bf16.msra.mxu0 %v601_v21 }
  0x18   :  { %529 = vmatprep.subr.bf16.mxu0 %v604_v24 }
  0x19   :  { %550 = vmatpush3.bf16.msra.mxu1 %v603_v23 }
  0x1a   :  { %551 = vmatprep.subr.bf16.mxu1 %v606_v26 }
  0x1b   :  { %530 = vmatpush3.bf16.msra.mxu0 %v605_v25 }
  0x1c   :  { %531 = vmatprep.subr.bf16.mxu0 %v608_v28 }
  0x1d   :  { %552 = vmatpush3.bf16.msra.mxu1 %v607_v27 }
  0x1e   :  { %553 = vmatprep.subr.bf16.mxu1 %v610_v30 }
  0x1f   :  { %532 = vmatpush3.bf16.msra.mxu0 %v609_v29 }
  0x20   :  { %566 = vmatprep.subr.bf16.mxu0 %v623_v33 }
  0x21   :  { %554 = vmatpush3.bf16.msra.mxu1 %v614_v34 }
  0x22   :  { %378 = vmatmul.mubr.bf16.vlgmr.msra.gmra.mrb[0].mxu0 %v611_v31 }
  0x23   :  { %574 = vmatprep.mubr.msk.bf16.mxu0 %vm624_vm0, %v623_v33  ;;  %567 = vmatpush3.bf16.msra.mxu0 %v618_v37 }
  0x24   :  { %419 = vmatmul.mubr.bf16.vlgmr.msra.gmra.mrb[0].mxu1 %v615_v35  ;;  %568 = vmatprep.subr.bf16.mxu0 %v623_v33 }
  0x27   :  { %569 = vmatpush3.bf16.msra.mxu0 %v619_v38 }
  0x28   :  { %570 = vmatprep.subr.bf16.mxu0 %v623_v33 }
  0x2b   :  { %571 = vmatpush3.bf16.msra.mxu0 %v620_v39 }
  0x2c   :  { %572 = vmatprep.subr.bf16.mxu0 %v623_v33 }
  0x2f   :  { %573 = vmatpush3.bf16.msra.mxu0 %v621_v40 }
  0x32   :  { %575 = vmatmul.mubr.msk.bf16.vlgmr.msra.gmra.mrb[4].mxu0 %vm341_vm1, %v622_v41 }
  0xf5   :  { %v533_v42 = vpop.f32.mrb[0].mxu0 }
  0xf6   :  { %v534_v44 = vpop.f32.mrb[1].mxu0 }
  0xf7   :  { %v535_v45 = vadd.f32 %v534_v44, %v533_v42  ;;  %v536_v46 = vpop.f32.mrb[2].mxu0  ;;  %v555_v47 = vpop.f32.mrb[0].mxu1 }
  0xf8   :  { %v537_v48 = vpop.f32.mrb[3].mxu0  ;;  %v556_v51 = vpop.f32.mrb[1].mxu1 }
  0xf9   :  { %v380_v49 = vadd.f32 %v535_v45, %v474_v43  ;;  %v538_v50 = vadd.f32 %v537_v48, %v536_v46  ;;  %v557_v52 = vadd.f32 %v556_v51, %v555_v47  ;;  %v558_v53 = vpop.f32.mrb[2].mxu1 }
  0xfa   :  { %v559_v55 = vpop.f32.mrb[3].mxu1 }
  0xfb   :  { %v383_v54 = vadd.f32 %v538_v50, %v474_v43  ;;  %v560_v56 = vadd.f32 %v559_v55, %v558_v53  ;;  %v421_v57 = vadd.f32 %v557_v52, %v380_v49 }
  0xfd   :  { %v424_v58 = vadd.f32 %v560_v56, %v383_v54 }
 0x105   :  { %v461_v59 = vpop.f32.mrb[4].mxu0 }
 0x106   :  { %v462_v60 = vadd.f32 %v461_v59, %v421_v57  ;;  %v576_v61 = vpop.f32.mrb[5].mxu0 }
 0x107   :  { %v464_v62 = vpop.f32.mrb[6].mxu0 }
 0x108   :  { %468 = vst [vmem:[%s780_s3] sm:$0xff] %v462_v60  ;;  %v465_v63 = vadd.f32 %v464_v62, %v424_v58  ;;  %v577_v0 = vpop.f32.mrb[7].mxu0 }
 0x10a   :  { %469 = vst [vmem:[%s780_s3 + $0x8] sm:$0xff] %v465_v63 }

// kernel: digitnet_forward.6
= control target key start
LH: loop header
LB: loop body
LE: loop exit
PB: predicated region body
PF: predicated region fallthrough
CT: control target
= control target key end

     0   :  { %s2311_s24 = smov 0   ;;  %s2899_s0 = inlined_call_operand.vmem [shape: bf16[32,800], index: 0, kind: input, shape index: {}]   ;;  %s2900_s1 = inlined_call_operand.vmem [shape: bf16[32,800], index: 1, kind: input, shape index: {}]   ;;  %s2901_s2 = inlined_call_operand.vmem [shape: bf16[32,800], index: 2, kind: input, shape index: {}]   ;;  %s2902_s3 = inlined_call_operand.vmem [shape: bf16[32,800], index: 3, kind: input, shape index: {}]   ;;  %s2903_s4 = inlined_call_operand.vmem [shape: bf16[800,128], index: 4, kind: input, shape index: {}]   ;;  %s2904_s5 = inlined_call_operand.vmem [shape: f32[1,128], index: 5, kind: input, shape index: {}]   ;;  %s2905_s6 = inlined_call_operand.vmem [shape: f32[1,128], index: 6, kind: input, shape index: {}]   ;;  %s2906_s7 = inlined_call_operand.vmem [shape: bf16[32,128], index: 7, kind: output, shape index: {}]  }
   0x1 LB: > { %s1742_s25 = sadd.s32 4294967295, %s2267_s24   ;;  %p1746_p0 = scmp.ge.s32.totalorder %s2267_s24, 1  ;;  %s2267_s24 = sphi %s2311_s24, %s17_s24  }
   0x2   : > { %p275_p1 = scmp.lt.s32.totalorder %s2267_s24, 3 }
   0x4   : > { %p276_p2 = pnand %p1746_p0, %p275_p1 }
   0x5   : > { %v2322_v0 = vld [vmem:[%s2903_s4 + $0x40] sm:$0xff] (!%p276_p2)   ;;  %v2345_v4 = vld [vmem:[%s2903_s4 + $0x48] sm:$0xff] (!%p276_p2)   ;;  %v2369_v8 = vld [vmem:[%s2903_s4 + $0x50] sm:$0xff] (!%p276_p2)   ;;  %s1747_s12 = sshll.u32 (!%p276_p2), %s1742_s25, 1  ;;  %v2269_v36 = vmov (!%p276_p2), 0.0   ;;  %vm2270_vm0 = vmmov (!%p276_p2), 0  }
   0x6   : > { %279 = sbr.rel (%p276_p2) target bundleno = 450 (0x1c2), region = 48  ;;  %v2327_v1 = vld [vmem:[%s2903_s4 + $0xc0] sm:$0xff] (!%p276_p2)   ;;  %1852 = vmatprep.subr.bf16.mxu0 (!%p276_p2), %v2322_v0  ;;  %v2351_v5 = vld [vmem:[%s2903_s4 + $0xc8] sm:$0xff] (!%p276_p2)   ;;  %v2375_v9 = vld [vmem:[%s2903_s4 + $0xd0] sm:$0xff] (!%p276_p2)   ;;  %p327_p3 = scmp.lt.s32.totalorder (!%p276_p2), %s1747_s12, 3  ;;  %vm806_vm1 = vcmask (!%p276_p2), 261120  }
   0x7   : > { %v2333_v2 = vld [vmem:[%s2903_s4] sm:$0xff] (!%p276_p2)   ;;  %1874 = vmatprep.subr.bf16.mxu1 (!%p276_p2), %v2327_v1  ;;  %v2357_v6 = vld [vmem:[%s2903_s4 + $0x8] sm:$0xff] (!%p276_p2)   ;;  %v2381_v10 = vld [vmem:[%s2903_s4 + $0x10] sm:$0xff] (!%p276_p2)  }
   0x8   : > { %v2339_v3 = vld [vmem:[%s2903_s4 + $0x80] sm:$0xff] (!%p276_p2)   ;;  %1853 = vmatpush3.bf16.msra.mxu0 (!%p276_p2), %v2333_v2  ;;  %v2363_v7 = vld [vmem:[%s2903_s4 + $0x88] sm:$0xff] (!%p276_p2)   ;;  %v2387_v11 = vld [vmem:[%s2903_s4 + $0x90] sm:$0xff] (!%p276_p2)  }
   0x9   : > { %1875 = vmatpush3.bf16.msra.mxu1 (!%p276_p2), %v2339_v3  ;;  %1854 = vmatprep.subr.bf16.mxu0 (!%p276_p2), %v2345_v4  ;;  %v2393_v12 = vld [vmem:[%s2903_s4 + $0x58] sm:$0xff] (!%p276_p2)   ;;  %v2419_v16 = vld [vmem:[%s2903_s4 + $0x60] sm:$0xff] (!%p276_p2)   ;;  %v2443_v20 = vld [vmem:[%s2903_s4 + $0x68] sm:$0xff] (!%p276_p2)  }
   0xa   : > { %1876 = vmatprep.subr.bf16.mxu1 (!%p276_p2), %v2351_v5  ;;  %v2399_v13 = vld [vmem:[%s2903_s4 + $0xd8] sm:$0xff] (!%p276_p2)   ;;  %v2425_v17 = vld [vmem:[%s2903_s4 + $0xe0] sm:$0xff] (!%p276_p2)   ;;  %v2449_v21 = vld [vmem:[%s2903_s4 + $0xe8] sm:$0xff] (!%p276_p2)  }
   0xb   : > { %v2405_v14 = vld [vmem:[%s2903_s4 + $0x18] sm:$0xff] (!%p276_p2)   ;;  %v2431_v18 = vld [vmem:[%s2903_s4 + $0x20] sm:$0xff] (!%p276_p2)   ;;  %v2457_v22 = vld [vmem:[%s2903_s4 + $0x28] sm:$0xff] (!%p276_p2)  }
   0xc   : > { %1855 = vmatpush3.bf16.msra.mxu0 (!%p276_p2), %v2357_v6  ;;  %v2413_v15 = vld [vmem:[%s2903_s4 + $0x98] sm:$0xff] (!%p276_p2)   ;;  %v2437_v19 = vld [vmem:[%s2903_s4 + $0xa0] sm:$0xff] (!%p276_p2)   ;;  %v2463_v23 = vld [vmem:[%s2903_s4 + $0xa8] sm:$0xff] (!%p276_p2)  }
   0xd   : > { %1877 = vmatpush3.bf16.msra.mxu1 %v2363_v7  ;;  %1856 = vmatprep.subr.bf16.mxu0 %v2369_v8  ;;  %s2908_s12 = smov (!%p327_p3, %s1747_s12), 3  ;;  %v2469_v24 = vld [vmem:[%s2903_s4 + $0x70] sm:$0xff]   ;;  %v2496_v28 = vld [vmem:[%s2903_s4 + $0x78] sm:$0xff]   ;;  %v2532_v37 = vld [vmem:[%s2903_s4 + $0x140] sm:$0xff]  }
   0xe   : > { %1878 = vmatprep.subr.bf16.mxu1 %v2375_v9  ;;  %v2475_v25 = vld [vmem:[%s2903_s4 + $0xf0] sm:$0xff]   ;;  %s2478_s14 = smul.u32 28, %s2908_s12  ;;  %v2502_v29 = vld [vmem:[%s2903_s4 + $0xf8] sm:$0xff]   ;;  %v2537_v38 = vld [vmem:[%s2903_s4 + $0x100] sm:$0xff]  }
   0xf   : > { %v2484_v26 = vld [vmem:[%s2903_s4 + $0x30] sm:$0xff]   ;;  %v2514_v30 = vld [vmem:[%s2903_s4 + $0x38] sm:$0xff]   ;;  %v2543_v39 = vld [vmem:[%s2903_s4 + $0x180] sm:$0xff]  }
  0x10   : > { %1857 = vmatpush3.bf16.msra.mxu0 %v2381_v10  ;;  %v2490_v27 = vld [vmem:[%s2903_s4 + $0xb0] sm:$0xff]   ;;  %s2508_s26 = scalar_lea.vmem %s2899_s0, %s2478_s14  ;;  %v2520_v31 = vld [vmem:[%s2903_s4 + $0xb8] sm:$0xff]   ;;  %v2549_v40 = vld [vmem:[%s2903_s4 + $0x148] sm:$0xff]   ;;  %s2619_s25 = scalar_lea.vmem %s2900_s1, %s2478_s14 }
  0x11   : > { %1879 = vmatpush3.bf16.msra.mxu1 %v2387_v11  ;;  %1858 = vmatprep.subr.bf16.mxu0 %v2393_v12  ;;  %v2203_v32 = vld [vmem:[%s2508_s26] ss:$28 sps:$4 sm:$0xff]   ;;  %v2206_v34 = vld [vmem:[%s2508_s26 + $0x8] ss:$28 sps:$4 sm:$0xff]   ;;  %v2569_v43 = vld [vmem:[%s2903_s4 + $0x150] sm:$0xff]   ;;  %s2654_s9 = scalar_lea.vmem %s2901_s2, %s2478_s14  ;;  %s2670_s16 = scalar_lea.vmem %s2902_s3, %s2478_s14 }
  0x12   : > { %1880 = vmatprep.subr.bf16.mxu1 %v2399_v13  ;;  %v2205_v33 = vld [vmem:[%s2508_s26 + $0x4] ss:$28 sps:$4 sm:$0xff]   ;;  %v2208_v35 = vld [vmem:[%s2508_s26 + $0xc] ss:$28 sps:$4 sm:$0xff]   ;;  %v2216_v44 = vld [vmem:[%s2508_s26 + $0x18] ss:$28 sps:$4 sm:$0xff]  }
  0x13   : > { %842 = vmatprep.mubr.bf16.mxu0 %v2205_v33  ;;  %883 = vmatprep.mubr.bf16.mxu1 %v2208_v35  ;;  %v2557_v41 = vld [vmem:[%s2903_s4 + $0x108] sm:$0xff]   ;;  %v2578_v45 = vld [vmem:[%s2903_s4 + $0x110] sm:$0xff]   ;;  %v2584_v46 = vld [vmem:[%s2903_s4 + $0x158] sm:$0xff]  }
  0x14   : > { %1859 = vmatpush3.bf16.msra.mxu0 %v2405_v14  ;;  %v2564_v42 = vld [vmem:[%s2903_s4 + $0x188] sm:$0xff]   ;;  %v2591_v47 = vld [vmem:[%s2903_s4 + $0x118] sm:$0xff]   ;;  %v2598_v48 = vld [vmem:[%s2903_s4 + $0x160] sm:$0xff]  }
  0x15   : > { %1881 = vmatpush3.bf16.msra.mxu1 %v2413_v15  ;;  %1860 = vmatprep.subr.bf16.mxu0 %v2419_v16  ;;  %v2605_v49 = vld [vmem:[%s2903_s4 + $0x120] sm:$0xff]   ;;  %v2612_v50 = vld [vmem:[%s2903_s4 + $0x168] sm:$0xff]   ;;  %v2230_v52 = vld [vmem:[%s2508_s26 + $0x14] ss:$28 sps:$4 sm:$0xff]  }
  0x16   : > { %1882 = vmatprep.subr.bf16.mxu1 %v2425_v17  ;;  %v2625_v51 = vld [vmem:[%s2903_s4 + $0x128] sm:$0xff]   ;;  %v2633_v53 = vld [vmem:[%s2903_s4 + $0x170] sm:$0xff]   ;;  %v2233_v54 = vld [vmem:[%s2619_s25 + $0x4] ss:$28 sps:$4 sm:$0xff]  }
  0x17   : > { %v2641_v55 = vld [vmem:[%s2903_s4 + $0x130] sm:$0xff]   ;;  %v2648_v56 = vld [vmem:[%s2903_s4 + $0x178] sm:$0xff]   ;;  %v2236_v59 = vld [vmem:[%s2619_s25 + $0xc] ss:$28 sps:$4 sm:$0xff]  }
  0x18   : > { %1861 = vmatpush3.bf16.msra.mxu0 %v2431_v18  ;;  %v2661_v57 = vld [vmem:[%s2903_s4 + $0x138] sm:$0xff]   ;;  %v2228_v58 = vld [vmem:[%s2508_s26 + $0x10] ss:$28 sps:$4 sm:$0xff]   ;;  %v2234_v62 = vld [vmem:[%s2619_s25 + $0x8] ss:$28 sps:$4 sm:$0xff]  }
  0x19   : > { %1883 = vmatpush3.bf16.msra.mxu1 %v2437_v19  ;;  %1862 = vmatprep.subr.bf16.mxu0 %v2443_v20  ;;  %v2231_v60 = vld [vmem:[%s2619_s25] ss:$28 sps:$4 sm:$0xff]   ;;  %v2239_v61 = vld [vmem:[%s2619_s25 + $0x14] ss:$28 sps:$4 sm:$0xff]  }
  0x1a   : > { %1884 = vmatprep.subr.bf16.mxu1 %v2449_v21  ;;  %v2240_v63 = vld [vmem:[%s2619_s25 + $0x18] ss:$28 sps:$4 sm:$0xff]   ;;  %v2243_v33 = vld [vmem:[%s2654_s9 + $0x4] ss:$28 sps:$4 sm:$0xff]  }
  0x1b   : > { %v2241_v35 = vld [vmem:[%s2654_s9] ss:$28 sps:$4 sm:$0xff]  }
  0x1c   : > { %1863 = vmatpush3.bf16.msra.mxu0 %v2457_v22 }
  0x1d   : > { %1885 = vmatpush3.bf16.msra.mxu1 %v2463_v23  ;;  %1864 = vmatprep.subr.bf16.mxu0 %v2469_v24 }
  0x1e   : > { %1886 = vmatprep.subr.bf16.mxu1 %v2475_v25 }
  0x20   : > { %1865 = vmatpush3.bf16.msra.mxu0 %v2484_v26 }
  0x21   : > { %1887 = vmatpush3.bf16.msra.mxu1 %v2490_v27  ;;  %1866 = vmatprep.subr.bf16.mxu0 %v2496_v28 }
  0x22   : > { %1888 = vmatprep.subr.bf16.mxu1 %v2502_v29 }
  0x24   : > { %1867 = vmatpush3.bf16.msra.mxu0 %v2514_v30 }
  0x25   : > { %1889 = vmatpush3.bf16.msra.mxu1 %v2520_v31  ;;  %1896 = vmatprep.subr.bf16.mxu0 %v2532_v37 }
  0x26   : > { %2128 = vmatprep.subr.bf16.mxu1 %v2269_v36 }
  0x27   : > { %843 = vmatmul.mubr.bf16.vlgmr.msra.gmra.mrb[0].mxu0 %v2203_v32  ;;  %v2237_v32 = vld [vmem:[%s2619_s25 + $0x10] ss:$28 sps:$4 sm:$0xff]   ;;  %s1756_s25 = sshll.u32 %s2908_s12, 2 }
  0x28   : > { %884 = vmatmul.mubr.bf16.vlgmr.msra.gmra.mrb[0].mxu1 %v2206_v34  ;;  %1897 = vmatpush3.bf16.msra.mxu0 %v2537_v38  ;;  %v2246_v34 = vld [vmem:[%s2654_s9 + $0xc] ss:$28 sps:$4 sm:$0xff]   ;;  %s358_s21 = scalar_lea.vmem %s2906_s7, %s1756_s25 }
  0x29   : > { %2132 = vmatprep.mubr.msk.bf16.mxu1 %vm2270_vm0, %v2269_v36  ;;  %2129 = vmatpush3.bf16.msra.mxu1 %v2543_v39 }
  0x2a   : > { %1898 = vmatprep.subr.bf16.mxu0 %v2549_v40  ;;  %2130 = vmatprep.subr.bf16.mxu1 %v2269_v36 }
  0x2b   : > { %924 = vmatprep.mubr.bf16.mxu0 %v2230_v52  ;;  %v2250_v52 = vld [vmem:[%s2654_s9 + $0x14] ss:$28 sps:$4 sm:$0xff]  }
  0x2c   : > { %1899 = vmatpush3.bf16.msra.mxu0 %v2557_v41 }
  0x2d   : > { %2131 = vmatpush3.bf16.msra.mxu1 %v2564_v42  ;;  %1900 = vmatprep.subr.bf16.mxu0 %v2569_v43 }
  0x2e   : > { %1921 = vmatprep.subr.bf16.mxu1 %v2322_v0 }
  0x30   : > { %2133 = vmatmul.mubr.msk.bf16.vlgmr.msra.gmra.mrb[4].mxu1 %vm806_vm1, %v2216_v44  ;;  %1901 = vmatpush3.bf16.msra.mxu0 %v2578_v45  ;;  %v2244_v44 = vld [vmem:[%s2654_s9 + $0x8] ss:$28 sps:$4 sm:$0xff]  }
  0x31   : > { %1922 = vmatpush3.bf16.msra.mxu1 %v2333_v2  ;;  %1902 = vmatprep.subr.bf16.mxu0 %v2584_v46 }
  0x32   : > { %1923 = vmatprep.subr.bf16.mxu1 %v2345_v4  ;;  %1068 = vmatprep.mubr.bf16.mxu1 %v2233_v54  ;;  %v2247_v54 = vld [vmem:[%s2654_s9 + $0x18] ss:$28 sps:$4 sm:$0xff]  }
  0x34   : > { %1903 = vmatpush3.bf16.msra.mxu0 %v2591_v47 }
  0x35   : > { %1924 = vmatpush3.bf16.msra.mxu1 %v2357_v6  ;;  %1904 = vmatprep.subr.bf16.mxu0 %v2598_v48 }
  0x36   : > { %1925 = vmatprep.subr.bf16.mxu1 %v2369_v8 }
  0x38   : > { %1905 = vmatpush3.bf16.msra.mxu0 %v2605_v49 }
  0x39   : > { %1926 = vmatpush3.bf16.msra.mxu1 %v2381_v10  ;;  %1906 = vmatprep.subr.bf16.mxu0 %v2612_v50 }
  0x3a   : > { %1927 = vmatprep.subr.bf16.mxu1 %v2393_v12 }
  0x3c   : > { %1907 = vmatpush3.bf16.msra.mxu0 %v2625_v51 }
  0x3d   : > { %1928 = vmatpush3.bf16.msra.mxu1 %v2405_v14  ;;  %1908 = vmatprep.subr.bf16.mxu0 %v2633_v53 }
  0x3e   : > { %1929 = vmatprep.subr.bf16.mxu1 %v2419_v16 }
  0x40   : > { %1909 = vmatpush3.bf16.msra.mxu0 %v2641_v55 }
  0x41   : > { %1930 = vmatpush3.bf16.msra.mxu1 %v2431_v18  ;;  %1910 = vmatprep.subr.bf16.mxu0 %v2648_v56 }
  0x42   : > { %1931 = vmatprep.subr.bf16.mxu1 %v2443_v20 }
  0x44   : > { %1911 = vmatpush3.bf16.msra.mxu0 %v2661_v57 }
  0x45   : > { %1932 = vmatpush3.bf16.msra.mxu1 %v2457_v22  ;;  %1943 = vmatprep.subr.bf16.mxu0 %v2327_v1 }
  0x46   : > { %1933 = vmatprep.subr.bf16.mxu1 %v2469_v24 }
  0x47   : > { %925 = vmatmul.mubr.bf16.vlgmr.msra.gmra.mrb[4].mxu0 %v2228_v58  ;;  %v2253_v58 = vld [vmem:[%s2670_s16 + $0x4] ss:$28 sps:$4 sm:$0xff]  }
  0x48   : > { %1944 = vmatpush3.bf16.msra.mxu0 %v2339_v3  ;;  %1109 = vmatprep.mubr.bf16.mxu0 %v2236_v59 }
  0x49   : > { %1934 = vmatpush3.bf16.msra.mxu1 %v2484_v26  ;;  %1945 = vmatprep.subr.bf16.mxu0 %v2351_v5 }
  0x4a   : > { %1935 = vmatprep.subr.bf16.mxu1 %v2496_v28 }
  0x4c   : > { %1946 = vmatpush3.bf16.msra.mxu0 %v2363_v7 }
  0x4d   : > { %1936 = vmatpush3.bf16.msra.mxu1 %v2514_v30  ;;  %1947 = vmatprep.subr.bf16.mxu0 %v2375_v9 }
  0x4e   : > { %1965 = vmatprep.subr.bf16.mxu1 %v2532_v37 }
  0x50   : > { %1069 = vmatmul.mubr.bf16.vlgmr.msra.gmra.mrb[8].mxu1 %v2231_v60  ;;  %1948 = vmatpush3.bf16.msra.mxu0 %v2387_v11 }
  0x51   : > { %1966 = vmatpush3.bf16.msra.mxu1 %v2537_v38  ;;  %1949 = vmatprep.subr.bf16.mxu0 %v2399_v13 }
  0x52   : > { %1967 = vmatprep.subr.bf16.mxu1 %v2549_v40  ;;  %1150 = vmatprep.mubr.bf16.mxu1 %v2239_v61 }
  0x54   : > { %1950 = vmatpush3.bf16.msra.mxu0 %v2413_v15 }
  0x55   : > { %1968 = vmatpush3.bf16.msra.mxu1 %v2557_v41  ;;  %1951 = vmatprep.subr.bf16.mxu0 %v2425_v17 }
  0x56   : > { %1969 = vmatprep.subr.bf16.mxu1 %v2569_v43 }
  0x58   : > { %1952 = vmatpush3.bf16.msra.mxu0 %v2437_v19 }
  0x59   : > { %1970 = vmatpush3.bf16.msra.mxu1 %v2578_v45  ;;  %1953 = vmatprep.subr.bf16.mxu0 %v2449_v21 }
  0x5a   : > { %1971 = vmatprep.subr.bf16.mxu1 %v2584_v46 }
  0x5c   : > { %1954 = vmatpush3.bf16.msra.mxu0 %v2463_v23 }
  0x5d   : > { %1972 = vmatpush3.bf16.msra.mxu1 %v2591_v47  ;;  %1955 = vmatprep.subr.bf16.mxu0 %v2475_v25 }
  0x5e   : > { %1973 = vmatprep.subr.bf16.mxu1 %v2598_v48 }
  0x60   : > { %1956 = vmatpush3.bf16.msra.mxu0 %v2490_v27 }
  0x61   : > { %1974 = vmatpush3.bf16.msra.mxu1 %v2605_v49  ;;  %1957 = vmatprep.subr.bf16.mxu0 %v2502_v29 }
  0x62   : > { %1975 = vmatprep.subr.bf16.mxu1 %v2612_v50 }
  0x64   : > { %1958 = vmatpush3.bf16.msra.mxu0 %v2520_v31 }
  0x65   : > { %1976 = vmatpush3.bf16.msra.mxu1 %v2625_v51  ;;  %2136 = vmatprep.subr.bf16.mxu0 %v2269_v36 }
  0x66   : > { %1977 = vmatprep.subr.bf16.mxu1 %v2633_v53 }
  0x67   : > { %1110 = vmatmul.mubr.bf16.vlgmr.msra.gmra.mrb[8].mxu0 %v2234_v62 }
  0x68   : > { %2137 = vmatpush3.bf16.msra.mxu0 %v2543_v39  ;;  %2140 = vmatprep.mubr.msk.bf16.mxu0 %vm2270_vm0, %v2269_v36 }
  0x69   : > { %1978 = vmatpush3.bf16.msra.mxu1 %v2641_v55  ;;  %2138 = vmatprep.subr.bf16.mxu0 %v2269_v36 }
  0x6a   : > { %1979 = vmatprep.subr.bf16.mxu1 %v2648_v56 }
  0x6c   : > { %2139 = vmatpush3.bf16.msra.mxu0 %v2564_v42 }
  0x6d   : > { %1980 = vmatpush3.bf16.msra.mxu1 %v2661_v57  ;;  %1990 = vmatprep.subr.bf16.mxu0 %v2322_v0 }
  0x6e   : > { %2012 = vmatprep.subr.bf16.mxu1 %v2327_v1 }
  0x6f   : > { %2141 = vmatmul.mubr.msk.bf16.vlgmr.msra.gmra.mrb[12].mxu0 %vm806_vm1, %v2240_v63 }
  0x70   : > { %1151 = vmatmul.mubr.bf16.vlgmr.msra.gmra.mrb[12].mxu1 %v2237_v32  ;;  %1991 = vmatpush3.bf16.msra.mxu0 %v2333_v2 }
  0x71   : > { %2013 = vmatpush3.bf16.msra.mxu1 %v2339_v3  ;;  %1992 = vmatprep.subr.bf16.mxu0 %v2345_v4 }
  0x72   : > { %2014 = vmatprep.subr.bf16.mxu1 %v2351_v5  ;;  %1284 = vmatprep.mubr.bf16.mxu0 %v2243_v33  ;;  %v2851_v33 = vld [vmem:[%s2904_s5] ss:$0 sm:$0xff] }
  0x73   : > { %1325 = vmatprep.mubr.bf16.mxu1 %v2246_v34 }
  0x74   : > { %1993 = vmatpush3.bf16.msra.mxu0 %v2357_v6 }
  0x75   : > { %2015 = vmatpush3.bf16.msra.mxu1 %v2363_v7  ;;  %1994 = vmatprep.subr.bf16.mxu0 %v2369_v8 }
  0x76   : > { %2016 = vmatprep.subr.bf16.mxu1 %v2375_v9 }
  0x78   : > { %1995 = vmatpush3.bf16.msra.mxu0 %v2381_v10 }
  0x79   : > { %2017 = vmatpush3.bf16.msra.mxu1 %v2387_v11  ;;  %1996 = vmatprep.subr.bf16.mxu0 %v2393_v12 }
  0x7a   : > { %2018 = vmatprep.subr.bf16.mxu1 %v2399_v13 }
  0x7c   : > { %1997 = vmatpush3.bf16.msra.mxu0 %v2405_v14 }
  0x7d   : > { %2019 = vmatpush3.bf16.msra.mxu1 %v2413_v15  ;;  %1998 = vmatprep.subr.bf16.mxu0 %v2419_v16 }
  0x7e   : > { %2020 = vmatprep.subr.bf16.mxu1 %v2425_v17 }
  0x80   : > { %1999 = vmatpush3.bf16.msra.mxu0 %v2431_v18 }
  0x81   : > { %2021 = vmatpush3.bf16.msra.mxu1 %v2437_v19  ;;  %2000 = vmatprep.subr.bf16.mxu0 %v2443_v20 }
  0x82   : > { %2022 = vmatprep.subr.bf16.mxu1 %v2449_v21 }
  0x84   : > { %2001 = vmatpush3.bf16.msra.mxu0 %v2457_v22 }
  0x85   : > { %2023 = vmatpush3.bf16.msra.mxu1 %v2463_v23  ;;  %2002 = vmatprep.subr.bf16.mxu0 %v2469_v24 }
  0x86   : > { %2024 = vmatprep.subr.bf16.mxu1 %v2475_v25 }
  0x88   : > { %2003 = vmatpush3.bf16.msra.mxu0 %v2484_v26 }
  0x89   : > { %2025 = vmatpush3.bf16.msra.mxu1 %v2490_v27  ;;  %2004 = vmatprep.subr.bf16.mxu0 %v2496_v28 }
  0x8a   : > { %2026 = vmatprep.subr.bf16.mxu1 %v2502_v29 }
  0x8c   : > { %2005 = vmatpush3.bf16.msra.mxu0 %v2514_v30 }
  0x8d   : > { %2027 = vmatpush3.bf16.msra.mxu1 %v2520_v31  ;;  %2034 = vmatprep.subr.bf16.mxu0 %v2532_v37 }
  0x8e   : > { %2144 = vmatprep.subr.bf16.mxu1 %v2269_v36 }
  0x8f   : > { %1285 = vmatmul.mubr.bf16.vlgmr.msra.gmra.mrb[16].mxu0 %v2241_v35 }
  0x90   : > { %1326 = vmatmul.mubr.bf16.vlgmr.msra.gmra.mrb[16].mxu1 %v2244_v44  ;;  %2035 = vmatpush3.bf16.msra.mxu0 %v2537_v38 }
  0x91   : > { %2145 = vmatpush3.bf16.msra.mxu1 %v2543_v39  ;;  %2036 = vmatprep.subr.bf16.mxu0 %v2549_v40 }
  0x92   : > { %2146 = vmatprep.subr.bf16.mxu1 %v2269_v36  ;;  %2148 = vmatprep.mubr.msk.bf16.mxu1 %vm2270_vm0, %v2269_v36 }
  0x93   : > { %1366 = vmatprep.mubr.bf16.mxu0 %v2250_v52 }
  0x94   : > { %2037 = vmatpush3.bf16.msra.mxu0 %v2557_v41 }
  0x95   : > { %2147 = vmatpush3.bf16.msra.mxu1 %v2564_v42  ;;  %2038 = vmatprep.subr.bf16.mxu0 %v2569_v43 }
  0x96   : > { %2059 = vmatprep.subr.bf16.mxu1 %v2322_v0  ;;  %v2248_v0 = vld [vmem:[%s2654_s9 + $0x10] ss:$28 sps:$4 sm:$0xff]  }
  0x98   : > { %2149 = vmatmul.mubr.msk.bf16.vlgmr.msra.gmra.mrb[20].mxu1 %vm806_vm1, %v2247_v54  ;;  %2039 = vmatpush3.bf16.msra.mxu0 %v2578_v45 }
  0x99   : > { %2060 = vmatpush3.bf16.msra.mxu1 %v2333_v2  ;;  %2040 = vmatprep.subr.bf16.mxu0 %v2584_v46  ;;  %v2256_v2 = vld [vmem:[%s2670_s16 + $0xc] ss:$28 sps:$4 sm:$0xff]  }
  0x9a   : > { %2061 = vmatprep.subr.bf16.mxu1 %v2345_v4  ;;  %1498 = vmatprep.mubr.bf16.mxu1 %v2253_v58  ;;  %v2251_v4 = vld [vmem:[%s2670_s16] ss:$28 sps:$4 sm:$0xff]  }
  0x9c   : > { %2041 = vmatpush3.bf16.msra.mxu0 %v2591_v47 }
  0x9d   : > { %2062 = vmatpush3.bf16.msra.mxu1 %v2357_v6  ;;  %2042 = vmatprep.subr.bf16.mxu0 %v2598_v48  ;;  %v2257_v6 = vld [vmem:[%s2670_s16 + $0x10] ss:$28 sps:$4 sm:$0xff]  }
  0x9e   : > { %2063 = vmatprep.subr.bf16.mxu1 %v2369_v8 }
  0xa0   : > { %2043 = vmatpush3.bf16.msra.mxu0 %v2605_v49 }
  0xa1   : > { %2064 = vmatpush3.bf16.msra.mxu1 %v2381_v10  ;;  %2044 = vmatprep.subr.bf16.mxu0 %v2612_v50 }
  0xa2   : > { %2065 = vmatprep.subr.bf16.mxu1 %v2393_v12 }
  0xa4   : > { %2045 = vmatpush3.bf16.msra.mxu0 %v2625_v51 }
  0xa5   : > { %2066 = vmatpush3.bf16.msra.mxu1 %v2405_v14  ;;  %2046 = vmatprep.subr.bf16.mxu0 %v2633_v53 }
  0xa6   : > { %2067 = vmatprep.subr.bf16.mxu1 %v2419_v16 }
  0xa8   : > { %2047 = vmatpush3.bf16.msra.mxu0 %v2641_v55 }
  0xa9   : > { %2068 = vmatpush3.bf16.msra.mxu1 %v2431_v18  ;;  %2048 = vmatprep.subr.bf16.mxu0 %v2648_v56 }
  0xaa   : > { %2069 = vmatprep.subr.bf16.mxu1 %v2443_v20 }
  0xac   : > { %2049 = vmatpush3.bf16.msra.mxu0 %v2661_v57 }
  0xad   : > { %2070 = vmatpush3.bf16.msra.mxu1 %v2457_v22  ;;  %2081 = vmatprep.subr.bf16.mxu0 %v2327_v1  ;;  %v2259_v1 = vld [vmem:[%s2670_s16 + $0x14] ss:$28 sps:$4 sm:$0xff]  }
  0xae   : > { %2071 = vmatprep.subr.bf16.mxu1 %v2469_v24 }
  0xaf   : > { %1367 = vmatmul.mubr.bf16.vlgmr.msra.gmra.mrb[20].mxu0 %v2248_v0  ;;  %v2857_v0 = vld [vmem:[%s2905_s6] ss:$0 sm:$0xff] }
  0xb0   : > { %2082 = vmatpush3.bf16.msra.mxu0 %v2339_v3  ;;  %1539 = vmatprep.mubr.bf16.mxu0 %v2256_v2  ;;  %v2254_v3 = vld [vmem:[%s2670_s16 + $0x8] ss:$28 sps:$4 sm:$0xff]  }
  0xb1   : > { %2072 = vmatpush3.bf16.msra.mxu1 %v2484_v26  ;;  %2083 = vmatprep.subr.bf16.mxu0 %v2351_v5  ;;  %v2260_v5 = vld [vmem:[%s2670_s16 + $0x18] ss:$28 sps:$4 sm:$0xff]  }
  0xb2   : > { %2073 = vmatprep.subr.bf16.mxu1 %v2496_v28 }
  0xb4   : > { %2084 = vmatpush3.bf16.msra.mxu0 %v2363_v7 }
  0xb5   : > { %2074 = vmatpush3.bf16.msra.mxu1 %v2514_v30  ;;  %2085 = vmatprep.subr.bf16.mxu0 %v2375_v9 }
  0xb6   : > { %2103 = vmatprep.subr.bf16.mxu1 %v2532_v37 }
  0xb8   : > { %1499 = vmatmul.mubr.bf16.vlgmr.msra.gmra.mrb[24].mxu1 %v2251_v4  ;;  %2086 = vmatpush3.bf16.msra.mxu0 %v2387_v11 }
  0xb9   : > { %2104 = vmatpush3.bf16.msra.mxu1 %v2537_v38  ;;  %2087 = vmatprep.subr.bf16.mxu0 %v2399_v13 }
  0xba   : > { %2105 = vmatprep.subr.bf16.mxu1 %v2549_v40  ;;  %1580 = vmatprep.mubr.bf16.mxu1 %v2259_v1 }
  0xbc   : > { %2088 = vmatpush3.bf16.msra.mxu0 %v2413_v15 }
  0xbd   : > { %2106 = vmatpush3.bf16.msra.mxu1 %v2557_v41  ;;  %2089 = vmatprep.subr.bf16.mxu0 %v2425_v17 }
  0xbe   : > { %2107 = vmatprep.subr.bf16.mxu1 %v2569_v43 }
  0xc0   : > { %2090 = vmatpush3.bf16.msra.mxu0 %v2437_v19 }
  0xc1   : > { %2108 = vmatpush3.bf16.msra.mxu1 %v2578_v45  ;;  %2091 = vmatprep.subr.bf16.mxu0 %v2449_v21 }
  0xc2   : > { %2109 = vmatprep.subr.bf16.mxu1 %v2584_v46 }
  0xc4   : > { %2092 = vmatpush3.bf16.msra.mxu0 %v2463_v23 }
  0xc5   : > { %2110 = vmatpush3.bf16.msra.mxu1 %v2591_v47  ;;  %2093 = vmatprep.subr.bf16.mxu0 %v2475_v25 }
  0xc6   : > { %2111 = vmatprep.subr.bf16.mxu1 %v2598_v48 }
  0xc8   : > { %2094 = vmatpush3.bf16.msra.mxu0 %v2490_v27 }
  0xc9   : > { %2112 = vmatpush3.bf16.msra.mxu1 %v2605_v49  ;;  %2095 = vmatprep.subr.bf16.mxu0 %v2502_v29 }
  0xca   : > { %2113 = vmatprep.subr.bf16.mxu1 %v2612_v50 }
  0xcc   : > { %2096 = vmatpush3.bf16.msra.mxu0 %v2520_v31 }
  0xcd   : > { %2114 = vmatpush3.bf16.msra.mxu1 %v2625_v51  ;;  %2152 = vmatprep.subr.bf16.mxu0 %v2269_v36 }
  0xce   : > { %2115 = vmatprep.subr.bf16.mxu1 %v2633_v53 }
  0xcf   : > { %1540 = vmatmul.mubr.bf16.vlgmr.msra.gmra.mrb[24].mxu0 %v2254_v3 }
  0xd0   : > { %2153 = vmatpush3.bf16.msra.mxu0 %v2543_v39  ;;  %2156 = vmatprep.mubr.msk.bf16.mxu0 %vm2270_vm0, %v2269_v36 }
  0xd1   : > { %2116 = vmatpush3.bf16.msra.mxu1 %v2641_v55  ;;  %2154 = vmatprep.subr.bf16.mxu0 %v2269_v36 }
  0xd2   : > { %2117 = vmatprep.subr.bf16.mxu1 %v2648_v56 }
  0xd4   : > { %2155 = vmatpush3.bf16.msra.mxu0 %v2564_v42 }
  0xd5   : > { %2118 = vmatpush3.bf16.msra.mxu1 %v2661_v57 }
  0xd7   : > { %2157 = vmatmul.mubr.msk.bf16.vlgmr.msra.gmra.mrb[28].mxu0 %vm806_vm1, %v2260_v5 }
  0xd8   : > { %1581 = vmatmul.mubr.bf16.vlgmr.msra.gmra.mrb[28].mxu1 %v2257_v6 }
  0xfa   : > { %v1868_v7 = vpop.f32.mrb[0].mxu0 }
  0xfb   : > { %v1890_v8 = vpop.f32.mrb[0].mxu1  ;;  %v1869_v9 = vpop.f32.mrb[1].mxu0 }
  0xfc   : > { %v1870_v10 = vadd.f32 %v1869_v9, %v1868_v7  ;;  %v1891_v11 = vpop.f32.mrb[1].mxu1  ;;  %v1871_v12 = vpop.f32.mrb[2].mxu0 }
  0xfd   : > { %v1892_v13 = vadd.f32 %v1891_v11, %v1890_v8  ;;  %v1893_v14 = vpop.f32.mrb[2].mxu1  ;;  %v1872_v15 = vpop.f32.mrb[3].mxu0 }
  0xfe   : > { %v1873_v16 = vadd.f32 %v1872_v15, %v1871_v12  ;;  %v1894_v17 = vpop.f32.mrb[3].mxu1 }
  0xff   : > { %v886_v18 = vadd.f32 %v1892_v13, %v1870_v10  ;;  %v1895_v19 = vadd.f32 %v1894_v17, %v1893_v14 }
 0x101   : > { %v889_v20 = vadd.f32 %v1895_v19, %v1873_v16 }
 0x103   : > { %v967_v21 = vpop.f32.mrb[4].mxu1 }
 0x104   : > { %v2134_v22 = vpop.f32.mrb[5].mxu1 }
 0x105   : > { %v970_v23 = vpop.f32.mrb[6].mxu1 }
 0x106   : > { %v2135_v24 = vpop.f32.mrb[7].mxu1 }
 0x11a   : > { %v1912_v25 = vpop.f32.mrb[4].mxu0 }
 0x11b   : > { %v1913_v26 = vpop.f32.mrb[5].mxu0 }
 0x11c   : > { %v1914_v27 = vadd.f32 %v1913_v26, %v1912_v25  ;;  %v1915_v28 = vpop.f32.mrb[6].mxu0 }
 0x11d   : > { %v1916_v29 = vpop.f32.mrb[7].mxu0 }
 0x11e   : > { %v927_v30 = vadd.f32 %v1914_v27, %v886_v18  ;;  %v1917_v31 = vadd.f32 %v1916_v29, %v1915_v28 }
 0x120   : > { %v968_v36 = vadd.f32 %v967_v21, %v927_v30  ;;  %v930_v37 = vadd.f32 %v1917_v31, %v889_v20 }
 0x122   : > { %v971_v38 = vadd.f32 %v970_v23, %v930_v37  ;;  %v980_v52 = vmul.f32 %v2851_v33, %v968_v36 }
 0x123   : > { %v1937_v39 = vpop.f32.mrb[8].mxu1 }
 0x124   : > { %v1938_v40 = vpop.f32.mrb[9].mxu1  ;;  %v981_v2 = vmul.f32 %v2851_v33, %v971_v38  ;;  %v2862_v3 = vadd.f32 %v2857_v0, %v980_v52 }
 0x125   : > { %v1939_v41 = vadd.f32 %v1938_v40, %v1937_v39  ;;  %v1940_v42 = vpop.f32.mrb[10].mxu1 }
 0x126   : > { %v1941_v43 = vpop.f32.mrb[11].mxu1  ;;  %v2871_v8 = vadd.f32 %v2857_v0, %v981_v2 }
 0x127   : > { %v1942_v45 = vadd.f32 %v1941_v43, %v1940_v42 }
 0x13a   : > { %v1959_v46 = vpop.f32.mrb[8].mxu0 }
 0x13b   : > { %v1960_v47 = vpop.f32.mrb[9].mxu0 }
 0x13c   : > { %v1961_v48 = vadd.f32 %v1960_v47, %v1959_v46  ;;  %v1962_v49 = vpop.f32.mrb[10].mxu0 }
 0x13d   : > { %v1963_v50 = vpop.f32.mrb[11].mxu0 }
 0x13e   : > { %v1112_v51 = vadd.f32 %v1961_v48, %v1939_v41  ;;  %v1964_v53 = vadd.f32 %v1963_v50, %v1962_v49 }
 0x140   : > { %v1115_v55 = vadd.f32 %v1964_v53, %v1942_v45 }
 0x142   : > { %v1193_v56 = vpop.f32.mrb[12].mxu0 }
 0x143   : > { %v1981_v57 = vpop.f32.mrb[12].mxu1  ;;  %v2142_v59 = vpop.f32.mrb[13].mxu0 }
 0x144   : > { %v1982_v60 = vpop.f32.mrb[13].mxu1  ;;  %v1196_v61 = vpop.f32.mrb[14].mxu0 }
 0x145   : > { %v1983_v62 = vadd.f32 %v1982_v60, %v1981_v57  ;;  %v1984_v63 = vpop.f32.mrb[14].mxu1  ;;  %v2143_v32 = vpop.f32.mrb[15].mxu0 }
 0x146   : > { %v1985_v34 = vpop.f32.mrb[15].mxu1 }
 0x147   : > { %v1153_v35 = vadd.f32 %v1983_v62, %v1112_v51  ;;  %v1986_v44 = vadd.f32 %v1985_v34, %v1984_v63 }
 0x149   : > { %v1194_v54 = vadd.f32 %v1193_v56, %v1153_v35  ;;  %v1156_v58 = vadd.f32 %v1986_v44, %v1115_v55 }
 0x14b   : > { %v1200_v4 = vmul.f32 %v2851_v33, %v1194_v54  ;;  %v1197_v1 = vadd.f32 %v1196_v61, %v1156_v58 }
 0x14d   : > { %v2865_v5 = vadd.f32 %v2857_v0, %v1200_v4  ;;  %v1201_v6 = vmul.f32 %v2851_v33, %v1197_v1 }
 0x14f   : > { %v1204_v7 = vmax.f32 %v2862_v3, %v2865_v5  ;;  %v2874_v9 = vadd.f32 %v2857_v0, %v1201_v6 }
 0x151   : > { %v1205_v10 = vmax.f32 %v2871_v8, %v2874_v9 }
 0x162   : > { %v2006_v11 = vpop.f32.mrb[16].mxu0 }
 0x163   : > { %v2028_v12 = vpop.f32.mrb[16].mxu1  ;;  %v2007_v13 = vpop.f32.mrb[17].mxu0 }
 0x164   : > { %v2008_v14 = vadd.f32 %v2007_v13, %v2006_v11  ;;  %v2029_v15 = vpop.f32.mrb[17].mxu1  ;;  %v2009_v16 = vpop.f32.mrb[18].mxu0 }
 0x165   : > { %v2030_v17 = vadd.f32 %v2029_v15, %v2028_v12  ;;  %v2031_v18 = vpop.f32.mrb[18].mxu1  ;;  %v2010_v19 = vpop.f32.mrb[19].mxu0 }
 0x166   : > { %v2011_v20 = vadd.f32 %v2010_v19, %v2009_v16  ;;  %v2032_v21 = vpop.f32.mrb[19].mxu1 }
 0x167   : > { %v1328_v22 = vadd.f32 %v2030_v17, %v2008_v14  ;;  %v2033_v23 = vadd.f32 %v2032_v21, %v2031_v18 }
 0x169   : > { %v1331_v24 = vadd.f32 %v2033_v23, %v2011_v20 }
 0x16b   : > { %v1409_v25 = vpop.f32.mrb[20].mxu1 }
 0x16c   : > { %v2150_v26 = vpop.f32.mrb[21].mxu1 }
 0x16d   : > { %v1412_v27 = vpop.f32.mrb[22].mxu1 }
 0x16e   : > { %v2151_v28 = vpop.f32.mrb[23].mxu1 }
 0x182   : > { %v2050_v29 = vpop.f32.mrb[20].mxu0 }
 0x183   : > { %v2051_v30 = vpop.f32.mrb[21].mxu0 }
 0x184   : > { %v2052_v31 = vadd.f32 %v2051_v30, %v2050_v29  ;;  %v2053_v36 = vpop.f32.mrb[22].mxu0 }
 0x185   : > { %v2054_v37 = vpop.f32.mrb[23].mxu0 }
 0x186   : > { %v1369_v38 = vadd.f32 %v2052_v31, %v1328_v22  ;;  %v2055_v39 = vadd.f32 %v2054_v37, %v2053_v36 }
 0x188   : > { %v1410_v40 = vadd.f32 %v1409_v25, %v1369_v38  ;;  %v1372_v41 = vadd.f32 %v2055_v39, %v1331_v24 }
 0x18a   : > { %v1413_v42 = vadd.f32 %v1412_v27, %v1372_v41  ;;  %v1416_v4 = vmul.f32 %v2851_v33, %v1410_v40 }
 0x18b   : > { %v2075_v43 = vpop.f32.mrb[24].mxu1 }
 0x18c   : > { %v2076_v45 = vpop.f32.mrb[25].mxu1  ;;  %v1417_v11 = vmul.f32 %v2851_v33, %v1413_v42  ;;  %v1418_v14 = vadd.f32 %v2857_v0, %v1416_v4 }
 0x18d   : > { %v2077_v46 = vadd.f32 %v2076_v45, %v2075_v43  ;;  %v2078_v47 = vpop.f32.mrb[26].mxu1 }
 0x18e   : > { %v2079_v48 = vpop.f32.mrb[27].mxu1  ;;  %v1419_v18 = vadd.f32 %v2857_v0, %v1417_v11 }
 0x18f   : > { %v2080_v49 = vadd.f32 %v2079_v48, %v2078_v47 }
 0x1a2   : > { %v2097_v50 = vpop.f32.mrb[24].mxu0 }
 0x1a3   : > { %v2098_v51 = vpop.f32.mrb[25].mxu0 }
 0x1a4   : > { %v2099_v53 = vadd.f32 %v2098_v51, %v2097_v50  ;;  %v2100_v55 = vpop.f32.mrb[26].mxu0 }
 0x1a5   : > { %v2101_v56 = vpop.f32.mrb[27].mxu0 }
 0x1a6   : > { %v1542_v57 = vadd.f32 %v2099_v53, %v2077_v46  ;;  %v2102_v59 = vadd.f32 %v2101_v56, %v2100_v55 }
 0x1a8   : > { %v1545_v60 = vadd.f32 %v2102_v59, %v2080_v49 }
 0x1aa   : > { %v1623_v61 = vpop.f32.mrb[28].mxu0 }
 0x1ab   : > { %v2119_v62 = vpop.f32.mrb[28].mxu1  ;;  %v2158_v63 = vpop.f32.mrb[29].mxu0 }
 0x1ac   : > { %v2120_v32 = vpop.f32.mrb[29].mxu1  ;;  %v1626_v34 = vpop.f32.mrb[30].mxu0 }
 0x1ad   : > { %v2121_v35 = vadd.f32 %v2120_v32, %v2119_v62  ;;  %v2122_v44 = vpop.f32.mrb[30].mxu1  ;;  %v2159_v52 = vpop.f32.mrb[31].mxu0 }
 0x1ae   : > { %v2123_v54 = vpop.f32.mrb[31].mxu1 }
 0x1af   : > { %v1583_v58 = vadd.f32 %v2121_v35, %v1542_v57  ;;  %v2124_v2 = vadd.f32 %v2123_v54, %v2122_v44 }
 0x1b1   : > { %v1624_v1 = vadd.f32 %v1623_v61, %v1583_v58  ;;  %v1586_v6 = vadd.f32 %v2124_v2, %v1545_v60 }
 0x1b3   : > { %v1630_v12 = vmul.f32 %v2851_v33, %v1624_v1  ;;  %v1627_v13 = vadd.f32 %v1626_v34, %v1586_v6 }
 0x1b5   : > { %v1632_v15 = vadd.f32 %v2857_v0, %v1630_v12  ;;  %v1631_v16 = vmul.f32 %v2851_v33, %v1627_v13 }
 0x1b7   : > { %v1634_v17 = vmax.f32 %v1418_v14, %v1632_v15  ;;  %v1633_v19 = vadd.f32 %v2857_v0, %v1631_v16 }
 0x1b9   : > { %v1636_v20 = vmax.f32 %v1204_v7, %v1634_v17  ;;  %v1635_v21 = vmax.f32 %v1419_v18, %v1633_v19 }
 0x1bb   : > { %v1637_v22 = vmax.f32 %v1205_v10, %v1635_v21  ;;  %v1638_v23 = vmax.f32 %v1636_v20, 0.0 }
 0x1bd   : > { %v1639_v24 = vmax.f32 %v1637_v22, 0.0 }
 0x1bf   : > { %v1850_v33 = vpack.c.bf16 %v1639_v24, %v1638_v23 }
 0x1c1   : > { %1851 = vst [vmem:[%s358_s21] sm:$0xff] %v1850_v33  }
 0x1c2 PF: > { %s17_s24 = sadd.s32 1, %s2267_s24  }
 0x1c3   : > { %p14_p4 = scmp.ge.s32.totalorder %s17_s24, 4  }
 0x1c5   :  { %16 = sbr.rel (!%p14_p4) target bundleno = 1 (0x1), region = 87 }

</bundles_post_ra>
